<compile_context>
chip_gen: v7x
topology: tpu7x:2x2x1
jax: 0.10.0
libtpu: 0.0.40
codegen_flags: <defaults>
</compile_context>

<pallas_src>
import math
from functools import partial

import jax
import jax.numpy as jnp
from jax import lax
from jax.experimental import pallas as pl
from jax.experimental.pallas import tpu as pltpu


def _round_up(x, m):
    return ((x + m - 1) // m) * m


# conv configs: (Cin, Cout, (kh, kw), (sh, sw), (ph, pw)); last entry = conv_post
_CONV_CFGS = [
    (1, 32, (3, 9), (1, 1), (1, 4)),
    (32, 32, (3, 9), (1, 2), (1, 4)),
    (32, 32, (3, 9), (1, 2), (1, 4)),
    (32, 32, (3, 9), (1, 2), (1, 4)),
    (32, 32, (3, 3), (1, 1), (1, 1)),
    (32, 1, (3, 3), (1, 1), (1, 1)),
]


# ----------------------------- static planning ------------------------------

def _layer_plan(n_frames):
    """Frame-axis (W) sizes [W0..W6] through the conv stack."""
    ws = [n_frames]
    for (_, _, (_, kw), (_, sw), (_, pw)) in _CONV_CFGS:
        ws.append((ws[-1] + 2 * pw - kw) // sw + 1)
    return ws


def make_dft_matrix(n_fft, win_length):
    """Merged windowed DFT weight [cos | -sin], f32, with bin k at column k+1.

    The +1 lane shift plus trailing zero columns give the exact zero halos the
    freq-axis (kh=3, ph=1) convolution needs, so the magnitude map can be used
    as a conv input without any extra padding pass.
    """
    n_bins = n_fft // 2 + 1
    hp = _round_up(n_bins + 2, 128)
    window = jnp.zeros((n_fft,), jnp.float32)
    left = (n_fft - win_length) // 2
    window = window.at[left:left + win_length].set(1.0)
    n = jnp.arange(n_fft, dtype=jnp.float32)[:, None]
    f = jnp.arange(n_bins, dtype=jnp.float32)[None, :]
    ang = 2.0 * math.pi * n * f / n_fft
    cos_m = jnp.cos(ang) * window[:, None]
    sin_m = -jnp.sin(ang) * window[:, None]
    dft = jnp.zeros((n_fft, 2 * hp), jnp.float32)
    dft = dft.at[:, 1:1 + n_bins].set(cos_m)
    dft = dft.at[:, hp + 1:hp + 1 + n_bins].set(sin_m)
    return dft, n_bins, hp


def _prep_weights(params):
    """Per-tap weight layout: wt[j, co, i*Cin+ci] = w[co, ci, i, j]."""
    preps = []
    for l, ((w, b), (cin, cout, (kh, kw), _, _)) in enumerate(zip(params, _CONV_CFGS)):
        cout_p = _round_up(cout, 8)
        wt = jnp.transpose(w, (3, 0, 2, 1)).reshape(kw, cout, kh * cin)
        bias = b.reshape(cout, 1).astype(jnp.float32)
        if cout_p != cout:
            wt = jnp.pad(wt, ((0, 0), (0, cout_p - cout), (0, 0)))
            bias = jnp.pad(bias, ((0, cout_p - cout), (0, 0)))
        dtype = jnp.float32 if l == 0 else jnp.bfloat16   # conv1 is tiny: keep f32
        preps.append((wt.astype(dtype), bias))
    return preps


# ------------------------------ fused kernel --------------------------------

def _build_kernel(cfgs, n_bins, hp, w_sizes, slope):
    n_layers = len(cfgs)
    n_in = 2 + 2 * n_layers
    ho = n_bins

    def kernel(*refs):
        frames_ref, dft_ref = refs[0], refs[1]
        fm_refs = refs[n_in:n_in + n_layers]
        mag_scr = refs[n_in + n_layers]
        act_scr = refs[n_in + n_layers + 1:]

        # ---------------- spectrogram (f32 for torch.stft parity) ----------------
        prod = jnp.dot(frames_ref[0], dft_ref[...],
                       preferred_element_type=jnp.float32)          # (W0, 2*HP)
        re, im = prod[:, :hp], prod[:, hp:]
        mag = jnp.sqrt(re * re + im * im)   # halo lanes are exactly 0 by construction
        w0 = w_sizes[0]
        pw0 = cfgs[0][4][1]
        mag_scr[0:pw0, :] = jnp.zeros((pw0, hp), jnp.float32)        # frame halo
        mag_scr[pw0 + w0:, :] = jnp.zeros((pw0, hp), jnp.float32)
        mag_scr[pw0:pw0 + w0, :] = mag

        # ---------------- conv stack, activations stay in VMEM ----------------
        def run_layer(l):
            cin, cout, (kh, kw), (sh, sw), (ph, pw) = cfgs[l]
            w_ref, b_ref = refs[2 + 2 * l], refs[3 + 2 * l]
            fm_ref = fm_refs[l]
            w_out = w_sizes[l + 1]
            cout_p = w_ref.shape[1]
            last = (l == n_layers - 1)

            if l == 0:
                in_scr = mag_scr

                def read_slab(widx):
                    return in_scr[pl.ds(widx, 1), :]                 # (1, HP) f32
            else:
                in_scr = act_scr[l - 1]

                def read_slab(widx):
                    return in_scr[widx]                              # (32, HP) bf16

            if not last:
                out_scr = act_scr[l]
                pwn = cfgs[l + 1][4][1]
                out_scr[0:pwn, :, :] = jnp.zeros((pwn, 32, hp), jnp.bfloat16)
                out_scr[pwn + w_out:, :, :] = jnp.zeros((pwn, 32, hp), jnp.bfloat16)
            else:
                out_scr, pwn = None, 0

            zcol = jnp.zeros((cout, 1), jnp.float32)

            def w_body(w, carry):
                acc = jnp.zeros((cout_p, ho), jnp.float32)
                for j in range(kw):                                  # static tap loop
                    xj = read_slab(w * sw + j)                       # (Cin, HP)
                    # merge the 3 freq taps into one K = 3*Cin contraction
                    y = jnp.concatenate(
                        [xj[:, 0:ho], xj[:, 1:1 + ho], xj[:, 2:2 + ho]], axis=0)
                    acc = acc + jnp.dot(w_ref[j], y,
                                        preferred_element_type=jnp.float32)
                acc = acc + b_ref[...]
                if not last:
                    acc = jnp.where(acc >= 0.0, acc, slope * acc)    # leaky_relu
                acc = acc[:cout, :]
                fm_ref[0, w, :, :] = acc                             # f32 feature map
                if out_scr is not None:
                    halo = jnp.concatenate([zcol, acc, zcol], axis=1)  # zero freq halo
                    out_scr[w + pwn, :, 0:ho + 2] = halo.astype(jnp.bfloat16)
                return carry

            lax.fori_loop(0, w_out, w_body, 0)

        for l in range(n_layers):
            run_layer(l)

    return kernel


# --------------------------- per-resolution forward --------------------------

@partial(jax.jit, static_argnames=("n_fft", "hop_length", "n_bins", "hp", "lrelu_slope"))
def discriminator_r_forward(params, dft, yy, *, n_fft, hop_length, n_bins, hp,
                            lrelu_slope):
    """yy: (2B, 1, T).  Returns (score (2B, F), 6 NCHW feature maps)."""
    nb = yy.shape[0]
    pad = int((n_fft - hop_length) / 2)
    xp = jnp.pad(yy[:, 0, :], ((0, 0), (pad, pad)), mode="reflect")
    tp = xp.shape[1]
    n_frames = 1 + (tp - n_fft) // hop_length
    # TODO(synk): move the overlapping-frame extraction into the kernel.
    idx = (jnp.arange(n_frames)[:, None] * hop_length
           + jnp.arange(n_fft)[None, :])
    frames = xp[:, idx]                                   # (2B, n_frames, n_fft) f32

    w_sizes = _layer_plan(n_frames)
    preps = _prep_weights(params)
    kernel = _build_kernel(_CONV_CFGS, n_bins, hp, w_sizes, lrelu_slope)

    in_specs = [pl.BlockSpec((1, n_frames, n_fft), lambda b: (b, 0, 0)),
                pl.BlockSpec((n_fft, 2 * hp), lambda b: (0, 0))]
    args = [frames, dft]
    for wt, bias in preps:
        in_specs.append(pl.BlockSpec(wt.shape, lambda b: (0, 0, 0)))
        in_specs.append(pl.BlockSpec(bias.shape, lambda b: (0, 0)))
        args.extend([wt, bias])

    out_shapes, out_specs = [], []
    for l, (_, cout, *_rest) in enumerate(_CONV_CFGS):
        wl = w_sizes[l + 1]
        out_shapes.append(jax.ShapeDtypeStruct((nb, wl, cout, n_bins), jnp.float32))
        out_specs.append(pl.BlockSpec((1, wl, cout, n_bins), lambda b: (b, 0, 0, 0)))

    scratch_shapes = [pltpu.VMEM((w_sizes[0] + 2 * _CONV_CFGS[0][4][1], hp),
                                 jnp.float32)]
    for l in range(len(_CONV_CFGS) - 1):
        pwn = _CONV_CFGS[l + 1][4][1]
        scratch_shapes.append(
            pltpu.VMEM((w_sizes[l + 1] + 2 * pwn, 32, hp), jnp.bfloat16))

    fmaps_wch = pl.pallas_call(
        kernel,
        grid_spec=pltpu.PrefetchScalarGridSpec(
            num_scalar_prefetch=0,
            grid=(nb,),
            in_specs=in_specs,
            out_specs=out_specs,
            scratch_shapes=scratch_shapes),
        out_shape=tuple(out_shapes),
        compiler_params=pltpu.CompilerParams(
            dimension_semantics=("parallel",)),
    )(*args)

    # Single lazy transpose of the terminal outputs to NCHW (module semantics).
    fmaps = [f.transpose(0, 2, 3, 1) for f in fmaps_wch]  # (2B, C, bins, frames)
    score = fmaps[-1].reshape(nb, -1)                     # flatten(x, 1, -1)
    return score, fmaps


# ------------------------------- module glue ---------------------------------

def init_discriminator_params(key):
    params = []
    for cin, cout, (kh, kw), _, _ in _CONV_CFGS:
        key, wkey, bkey = jax.random.split(key, 3)
        fan_in = cin * kh * kw
        w = jax.random.normal(wkey, (cout, cin, kh, kw), jnp.float32) / math.sqrt(fan_in)
        b = 0.01 * jax.random.normal(bkey, (cout,), jnp.float32)
        params.append((w, b))
    return params


def multi_resolution_discriminator_forward(all_params, resolutions, spec_consts,
                                           lrelu_slope, y, y_hat):
    B = y.shape[0]
    yy = jnp.concatenate([y, y_hat], axis=0)   # shared weights -> batch y, y_hat
    real_outputs, fake_outputs = [], []
    real_feature_maps, fake_feature_maps = [], []
    for params, (n_fft, hop, _), (dft, n_bins, hp) in zip(all_params, resolutions,
                                                          spec_consts):
        score, fmap = discriminator_r_forward(
            params, dft, yy, n_fft=n_fft, hop_length=hop, n_bins=n_bins, hp=hp,
            lrelu_slope=lrelu_slope)
        real_outputs.append(score[:B])
        fake_outputs.append(score[B:])
        real_feature_maps.append([f[:B] for f in fmap])
        fake_feature_maps.append([f[B:] for f in fmap])
    return real_outputs, fake_outputs, real_feature_maps, fake_feature_maps


# ---------------------------------- main -------------------------------------

if __name__ == "__main__":
    # config (small / synthetic): (n_fft, hop_length, win_length)
    resolutions = [(64, 16, 64), (128, 32, 128)]
    lrelu_slope = 0.1                                     # config.lReLU_slope

    key = jax.random.PRNGKey(0)
    k_y, k_yh, k_p = jax.random.split(key, 3)
    B, T = 2, 256
    y = jax.random.normal(k_y, (B, 1, T), jnp.float32)
    y_hat = jax.random.normal(k_yh, (B, 1, T), jnp.float32)

    param_keys = jax.random.split(k_p, len(resolutions))
    all_params = [init_discriminator_params(pk) for pk in param_keys]
    spec_consts = [make_dft_matrix(n_fft, win) for (n_fft, _, win) in resolutions]

    out = multi_resolution_discriminator_forward(
        all_params, resolutions, spec_consts, lrelu_slope, y, y_hat)
    jax.block_until_ready(out)

    real_outputs, fake_outputs, real_fmaps, fake_fmaps = out
    assert len(real_outputs) == len(resolutions)
    assert len(real_fmaps[0]) == 6 and len(fake_fmaps[0]) == 6
    assert real_fmaps[0][0].shape == (B, 32, 33, 16)      # NCHW feature map
    assert real_fmaps[0][-1].shape == (B, 1, 33, 2)
    assert real_outputs[0].shape == (B, 66)
    assert fake_outputs[1].shape == (B, 65)
    print("KERNEL_OK")
</pallas_src>

<mosaic_0001>
module attributes {stable_mosaic.version = 11 : i64} {
  func.func @kernel(%arg0: i32, %arg1: memref<1x16x64xf32, #tpu.memory_space<vmem>>, %arg2: memref<64x256xf32, #tpu.memory_space<vmem>>, %arg3: memref<9x32x3xf32, #tpu.memory_space<vmem>>, %arg4: memref<32x1xf32, #tpu.memory_space<vmem>>, %arg5: memref<9x32x96xbf16, #tpu.memory_space<vmem>>, %arg6: memref<32x1xf32, #tpu.memory_space<vmem>>, %arg7: memref<9x32x96xbf16, #tpu.memory_space<vmem>>, %arg8: memref<32x1xf32, #tpu.memory_space<vmem>>, %arg9: memref<9x32x96xbf16, #tpu.memory_space<vmem>>, %arg10: memref<32x1xf32, #tpu.memory_space<vmem>>, %arg11: memref<3x32x96xbf16, #tpu.memory_space<vmem>>, %arg12: memref<32x1xf32, #tpu.memory_space<vmem>>, %arg13: memref<3x8x96xbf16, #tpu.memory_space<vmem>>, %arg14: memref<8x1xf32, #tpu.memory_space<vmem>>, %arg15: memref<1x16x32x33xf32, #tpu.memory_space<vmem>>, %arg16: memref<1x8x32x33xf32, #tpu.memory_space<vmem>>, %arg17: memref<1x4x32x33xf32, #tpu.memory_space<vmem>>, %arg18: memref<1x2x32x33xf32, #tpu.memory_space<vmem>>, %arg19: memref<1x2x32x33xf32, #tpu.memory_space<vmem>>, %arg20: memref<1x2x1x33xf32, #tpu.memory_space<vmem>>, %arg21: memref<24x128xf32, #tpu.memory_space<vmem>>, %arg22: memref<24x32x128xbf16, #tpu.memory_space<vmem>>, %arg23: memref<16x32x128xbf16, #tpu.memory_space<vmem>>, %arg24: memref<12x32x128xbf16, #tpu.memory_space<vmem>>, %arg25: memref<4x32x128xbf16, #tpu.memory_space<vmem>>, %arg26: memref<4x32x128xbf16, #tpu.memory_space<vmem>>) attributes {dimension_semantics = [#tpu.dimension_semantics<parallel>], iteration_bounds = array<i64: 4>, scalar_prefetch = 0 : i64, scratch_operands = 6 : i64, tpu.core_type = #tpu.core_type<tc>, window_params = [{transform_indices = @transform_0, window_bounds = array<i64: 1, 16, 64>}, {pipeline_mode = #tpu.pipeline_mode<synchronous>, transform_indices = @transform_1, window_bounds = array<i64: 64, 256>}, {pipeline_mode = #tpu.pipeline_mode<synchronous>, transform_indices = @transform_2, window_bounds = array<i64: 9, 32, 3>}, {pipeline_mode = #tpu.pipeline_mode<synchronous>, transform_indices = @transform_3, window_bounds = array<i64: 32, 1>}, {pipeline_mode = #tpu.pipeline_mode<synchronous>, transform_indices = @transform_4, window_bounds = array<i64: 9, 32, 96>}, {pipeline_mode = #tpu.pipeline_mode<synchronous>, transform_indices = @transform_5, window_bounds = array<i64: 32, 1>}, {pipeline_mode = #tpu.pipeline_mode<synchronous>, transform_indices = @transform_6, window_bounds = array<i64: 9, 32, 96>}, {pipeline_mode = #tpu.pipeline_mode<synchronous>, transform_indices = @transform_7, window_bounds = array<i64: 32, 1>}, {pipeline_mode = #tpu.pipeline_mode<synchronous>, transform_indices = @transform_8, window_bounds = array<i64: 9, 32, 96>}, {pipeline_mode = #tpu.pipeline_mode<synchronous>, transform_indices = @transform_9, window_bounds = array<i64: 32, 1>}, {pipeline_mode = #tpu.pipeline_mode<synchronous>, transform_indices = @transform_10, window_bounds = array<i64: 3, 32, 96>}, {pipeline_mode = #tpu.pipeline_mode<synchronous>, transform_indices = @transform_11, window_bounds = array<i64: 32, 1>}, {pipeline_mode = #tpu.pipeline_mode<synchronous>, transform_indices = @transform_12, window_bounds = array<i64: 3, 8, 96>}, {pipeline_mode = #tpu.pipeline_mode<synchronous>, transform_indices = @transform_13, window_bounds = array<i64: 8, 1>}, {transform_indices = @transform_14, window_bounds = array<i64: 1, 16, 32, 33>}, {transform_indices = @transform_15, window_bounds = array<i64: 1, 8, 32, 33>}, {transform_indices = @transform_16, window_bounds = array<i64: 1, 4, 32, 33>}, {transform_indices = @transform_17, window_bounds = array<i64: 1, 2, 32, 33>}, {transform_indices = @transform_18, window_bounds = array<i64: 1, 2, 32, 33>}, {transform_indices = @transform_19, window_bounds = array<i64: 1, 2, 1, 33>}]} {
    %c0 = arith.constant 0 : index
    %c0_0 = arith.constant 0 : index
    %c0_1 = arith.constant 0 : index
    %0 = vector.load %arg1[%c0, %c0_0, %c0_1] : memref<1x16x64xf32, #tpu.memory_space<vmem>>, vector<1x16x64xf32>
    %1 = vector.shape_cast %0 : vector<1x16x64xf32> to vector<16x64xf32>
    %c0_2 = arith.constant 0 : index
    %c0_3 = arith.constant 0 : index
    %2 = vector.load %arg2[%c0_2, %c0_3] : memref<64x256xf32, #tpu.memory_space<vmem>>, vector<64x256xf32>
    %cst = arith.constant dense<0.000000e+00> : vector<16x256xf32>
    %3 = tpu.matmul %1, %2, %cst {dimension_numbers = #tpu.dot_dimension_numbers<[1], [0], [0], [1], [0, 0, 1, 1], [], []>} : vector<16x64xf32>, vector<64x256xf32>, vector<16x256xf32> -> vector<16x256xf32>
    %4 = vector.extract_strided_slice %3 {offsets = [0, 0], sizes = [16, 128], strides = [1, 1]} : vector<16x256xf32> to vector<16x128xf32>
    %5 = vector.extract_strided_slice %3 {offsets = [0, 128], sizes = [16, 128], strides = [1, 1]} : vector<16x256xf32> to vector<16x128xf32>
    %6 = arith.mulf %4, %4 : vector<16x128xf32>
    %7 = arith.mulf %5, %5 : vector<16x128xf32>
    %8 = arith.addf %6, %7 : vector<16x128xf32>
    %9 = math.sqrt %8 : vector<16x128xf32>
    %cst_4 = arith.constant 0.000000e+00 : f32
    %10 = vector.broadcast %cst_4 : f32 to vector<4x128xf32>
    %c0_5 = arith.constant 0 : index
    %c0_6 = arith.constant 0 : index
    %11 = vector.load %arg21[%c0_5, %c0_6] : memref<24x128xf32, #tpu.memory_space<vmem>>, vector<4x128xf32>
    tpu.vector_store %arg21[%c0_5, %c0_6], %10 {strides = array<i32>} : memref<24x128xf32, #tpu.memory_space<vmem>>, vector<4x128xf32>,
    %cst_7 = arith.constant 0.000000e+00 : f32
    %12 = vector.broadcast %cst_7 : f32 to vector<4x128xf32>
    %c20 = arith.constant 20 : index
    %c0_8 = arith.constant 0 : index
    %13 = vector.load %arg21[%c20, %c0_8] : memref<24x128xf32, #tpu.memory_space<vmem>>, vector<4x128xf32>
    tpu.vector_store %arg21[%c20, %c0_8], %12 {strides = array<i32>} : memref<24x128xf32, #tpu.memory_space<vmem>>, vector<4x128xf32>,
    %c4 = arith.constant 4 : index
    %c0_9 = arith.constant 0 : index
    %14 = vector.load %arg21[%c4, %c0_9] : memref<24x128xf32, #tpu.memory_space<vmem>>, vector<16x128xf32>
    tpu.vector_store %arg21[%c4, %c0_9], %9 {strides = array<i32>} : memref<24x128xf32, #tpu.memory_space<vmem>>, vector<16x128xf32>,
    %cst_10 = arith.constant 0.000000e+00 : bf16
    %15 = vector.broadcast %cst_10 : bf16 to vector<4x32x128xbf16>
    %c0_11 = arith.constant 0 : index
    %c0_12 = arith.constant 0 : index
    %c0_13 = arith.constant 0 : index
    %16 = vector.load %arg22[%c0_11, %c0_12, %c0_13] : memref<24x32x128xbf16, #tpu.memory_space<vmem>>, vector<4x32x128xbf16>
    tpu.vector_store %arg22[%c0_11, %c0_12, %c0_13], %15 {strides = array<i32>} : memref<24x32x128xbf16, #tpu.memory_space<vmem>>, vector<4x32x128xbf16>,
    %cst_14 = arith.constant 0.000000e+00 : bf16
    %17 = vector.broadcast %cst_14 : bf16 to vector<4x32x128xbf16>
    %c20_15 = arith.constant 20 : index
    %c0_16 = arith.constant 0 : index
    %c0_17 = arith.constant 0 : index
    %18 = vector.load %arg22[%c20_15, %c0_16, %c0_17] : memref<24x32x128xbf16, #tpu.memory_space<vmem>>, vector<4x32x128xbf16>
    tpu.vector_store %arg22[%c20_15, %c0_16, %c0_17], %17 {strides = array<i32>} : memref<24x32x128xbf16, #tpu.memory_space<vmem>>, vector<4x32x128xbf16>,
    %cst_18 = arith.constant 0.000000e+00 : f32
    %19 = vector.broadcast %cst_18 : f32 to vector<32x1xf32>
    %c0_i32 = arith.constant 0 : i32
    %c16_i32 = arith.constant 16 : i32
    %20 = arith.addi %c0_i32, %c16_i32 : i32
    %c1_i32 = arith.constant 1 : i32
    scf.for %arg27 = %c0_i32 to %20 step %c1_i32  : i32 {
      %cst_70 = arith.constant 0.000000e+00 : f32
      %46 = vector.broadcast %cst_70 : f32 to vector<32x33xf32>
      %c1_i32_71 = arith.constant 1 : i32
      %47 = arith.muli %arg27, %c1_i32_71 : i32
      %c0_i32_72 = arith.constant 0 : i32
      %48 = arith.addi %47, %c0_i32_72 : i32
      %49 = arith.index_cast %48 : i32 to index
      %c0_73 = arith.constant 0 : index
      %50 = vector.load %arg21[%49, %c0_73] : memref<24x128xf32, #tpu.memory_space<vmem>>, vector<1x128xf32>
      %51 = vector.extract_strided_slice %50 {offsets = [0, 0], sizes = [1, 33], strides = [1, 1]} : vector<1x128xf32> to vector<1x33xf32>
      %52 = vector.extract_strided_slice %50 {offsets = [0, 1], sizes = [1, 33], strides = [1, 1]} : vector<1x128xf32> to vector<1x33xf32>
      %53 = vector.extract_strided_slice %50 {offsets = [0, 2], sizes = [1, 33], strides = [1, 1]} : vector<1x128xf32> to vector<1x33xf32>
      %54 = tpu.concatenate %51, %52, %53 in 0 : vector<1x33xf32>, vector<1x33xf32>, vector<1x33xf32> -> vector<3x33xf32>
      %c0_74 = arith.constant 0 : index
      %c0_75 = arith.constant 0 : index
      %c0_76 = arith.constant 0 : index
      %55 = vector.load %arg3[%c0_74, %c0_75, %c0_76] : memref<9x32x3xf32, #tpu.memory_space<vmem>>, vector<1x32x3xf32>
      %56 = vector.shape_cast %55 : vector<1x32x3xf32> to vector<32x3xf32>
      %cst_77 = arith.constant dense<0.000000e+00> : vector<32x33xf32>
      %57 = tpu.matmul %56, %54, %cst_77 {dimension_numbers = #tpu.dot_dimension_numbers<[1], [0], [0], [1], [0, 0, 1, 1], [], []>} : vector<32x3xf32>, vector<3x33xf32>, vector<32x33xf32> -> vector<32x33xf32>
      %58 = arith.addf %46, %57 : vector<32x33xf32>
      %c1_i32_78 = arith.constant 1 : i32
      %59 = arith.muli %arg27, %c1_i32_78 : i32
      %c1_i32_79 = arith.constant 1 : i32
      %60 = arith.addi %59, %c1_i32_79 : i32
      %61 = arith.index_cast %60 : i32 to index
      %c0_80 = arith.constant 0 : index
      %62 = vector.load %arg21[%61, %c0_80] : memref<24x128xf32, #tpu.memory_space<vmem>>, vector<1x128xf32>
      %63 = vector.extract_strided_slice %62 {offsets = [0, 0], sizes = [1, 33], strides = [1, 1]} : vector<1x128xf32> to vector<1x33xf32>
      %64 = vector.extract_strided_slice %62 {offsets = [0, 1], sizes = [1, 33], strides = [1, 1]} : vector<1x128xf32> to vector<1x33xf32>
      %65 = vector.extract_strided_slice %62 {offsets = [0, 2], sizes = [1, 33], strides = [1, 1]} : vector<1x128xf32> to vector<1x33xf32>
      %66 = tpu.concatenate %63, %64, %65 in 0 : vector<1x33xf32>, vector<1x33xf32>, vector<1x33xf32> -> vector<3x33xf32>
      %c1 = arith.constant 1 : index
      %c0_81 = arith.constant 0 : index
      %c0_82 = arith.constant 0 : index
      %67 = vector.load %arg3[%c1, %c0_81, %c0_82] : memref<9x32x3xf32, #tpu.memory_space<vmem>>, vector<1x32x3xf32>
      %68 = vector.shape_cast %67 : vector<1x32x3xf32> to vector<32x3xf32>
      %cst_83 = arith.constant dense<0.000000e+00> : vector<32x33xf32>
      %69 = tpu.matmul %68, %66, %cst_83 {dimension_numbers = #tpu.dot_dimension_numbers<[1], [0], [0], [1], [0, 0, 1, 1], [], []>} : vector<32x3xf32>, vector<3x33xf32>, vector<32x33xf32> -> vector<32x33xf32>
      %70 = arith.addf %58, %69 : vector<32x33xf32>
      %c1_i32_84 = arith.constant 1 : i32
      %71 = arith.muli %arg27, %c1_i32_84 : i32
      %c2_i32_85 = arith.constant 2 : i32
      %72 = arith.addi %71, %c2_i32_85 : i32
      %73 = arith.index_cast %72 : i32 to index
      %c0_86 = arith.constant 0 : index
      %74 = vector.load %arg21[%73, %c0_86] : memref<24x128xf32, #tpu.memory_space<vmem>>, vector<1x128xf32>
      %75 = vector.extract_strided_slice %74 {offsets = [0, 0], sizes = [1, 33], strides = [1, 1]} : vector<1x128xf32> to vector<1x33xf32>
      %76 = vector.extract_strided_slice %74 {offsets = [0, 1], sizes = [1, 33], strides = [1, 1]} : vector<1x128xf32> to vector<1x33xf32>
      %77 = vector.extract_strided_slice %74 {offsets = [0, 2], sizes = [1, 33], strides = [1, 1]} : vector<1x128xf32> to vector<1x33xf32>
      %78 = tpu.concatenate %75, %76, %77 in 0 : vector<1x33xf32>, vector<1x33xf32>, vector<1x33xf32> -> vector<3x33xf32>
      %c2 = arith.constant 2 : index
      %c0_87 = arith.constant 0 : index
      %c0_88 = arith.constant 0 : index
      %79 = vector.load %arg3[%c2, %c0_87, %c0_88] : memref<9x32x3xf32, #tpu.memory_space<vmem>>, vector<1x32x3xf32>
      %80 = vector.shape_cast %79 : vector<1x32x3xf32> to vector<32x3xf32>
      %cst_89 = arith.constant dense<0.000000e+00> : vector<32x33xf32>
      %81 = tpu.matmul %80, %78, %cst_89 {dimension_numbers = #tpu.dot_dimension_numbers<[1], [0], [0], [1], [0, 0, 1, 1], [], []>} : vector<32x3xf32>, vector<3x33xf32>, vector<32x33xf32> -> vector<32x33xf32>
      %82 = arith.addf %70, %81 : vector<32x33xf32>
      %c1_i32_90 = arith.constant 1 : i32
      %83 = arith.muli %arg27, %c1_i32_90 : i32
      %c3_i32 = arith.constant 3 : i32
      %84 = arith.addi %83, %c3_i32 : i32
      %85 = arith.index_cast %84 : i32 to index
      %c0_91 = arith.constant 0 : index
      %86 = vector.load %arg21[%85, %c0_91] : memref<24x128xf32, #tpu.memory_space<vmem>>, vector<1x128xf32>
      %87 = vector.extract_strided_slice %86 {offsets = [0, 0], sizes = [1, 33], strides = [1, 1]} : vector<1x128xf32> to vector<1x33xf32>
      %88 = vector.extract_strided_slice %86 {offsets = [0, 1], sizes = [1, 33], strides = [1, 1]} : vector<1x128xf32> to vector<1x33xf32>
      %89 = vector.extract_strided_slice %86 {offsets = [0, 2], sizes = [1, 33], strides = [1, 1]} : vector<1x128xf32> to vector<1x33xf32>
      %90 = tpu.concatenate %87, %88, %89 in 0 : vector<1x33xf32>, vector<1x33xf32>, vector<1x33xf32> -> vector<3x33xf32>
      %c3_92 = arith.constant 3 : index
      %c0_93 = arith.constant 0 : index
      %c0_94 = arith.constant 0 : index
      %91 = vector.load %arg3[%c3_92, %c0_93, %c0_94] : memref<9x32x3xf32, #tpu.memory_space<vmem>>, vector<1x32x3xf32>
      %92 = vector.shape_cast %91 : vector<1x32x3xf32> to vector<32x3xf32>
      %cst_95 = arith.constant dense<0.000000e+00> : vector<32x33xf32>
      %93 = tpu.matmul %92, %90, %cst_95 {dimension_numbers = #tpu.dot_dimension_numbers<[1], [0], [0], [1], [0, 0, 1, 1], [], []>} : vector<32x3xf32>, vector<3x33xf32>, vector<32x33xf32> -> vector<32x33xf32>
      %94 = arith.addf %82, %93 : vector<32x33xf32>
      %c1_i32_96 = arith.constant 1 : i32
      %95 = arith.muli %arg27, %c1_i32_96 : i32
      %c4_i32_97 = arith.constant 4 : i32
      %96 = arith.addi %95, %c4_i32_97 : i32
      %97 = arith.index_cast %96 : i32 to index
      %c0_98 = arith.constant 0 : index
      %98 = vector.load %arg21[%97, %c0_98] : memref<24x128xf32, #tpu.memory_space<vmem>>, vector<1x128xf32>
      %99 = vector.extract_strided_slice %98 {offsets = [0, 0], sizes = [1, 33], strides = [1, 1]} : vector<1x128xf32> to vector<1x33xf32>
      %100 = vector.extract_strided_slice %98 {offsets = [0, 1], sizes = [1, 33], strides = [1, 1]} : vector<1x128xf32> to vector<1x33xf32>
      %101 = vector.extract_strided_slice %98 {offsets = [0, 2], sizes = [1, 33], strides = [1, 1]} : vector<1x128xf32> to vector<1x33xf32>
      %102 = tpu.concatenate %99, %100, %101 in 0 : vector<1x33xf32>, vector<1x33xf32>, vector<1x33xf32> -> vector<3x33xf32>
      %c4_99 = arith.constant 4 : index
      %c0_100 = arith.constant 0 : index
      %c0_101 = arith.constant 0 : index
      %103 = vector.load %arg3[%c4_99, %c0_100, %c0_101] : memref<9x32x3xf32, #tpu.memory_space<vmem>>, vector<1x32x3xf32>
      %104 = vector.shape_cast %103 : vector<1x32x3xf32> to vector<32x3xf32>
      %cst_102 = arith.constant dense<0.000000e+00> : vector<32x33xf32>
      %105 = tpu.matmul %104, %102, %cst_102 {dimension_numbers = #tpu.dot_dimension_numbers<[1], [0], [0], [1], [0, 0, 1, 1], [], []>} : vector<32x3xf32>, vector<3x33xf32>, vector<32x33xf32> -> vector<32x33xf32>
      %106 = arith.addf %94, %105 : vector<32x33xf32>
      %c1_i32_103 = arith.constant 1 : i32
      %107 = arith.muli %arg27, %c1_i32_103 : i32
      %c5_i32 = arith.constant 5 : i32
      %108 = arith.addi %107, %c5_i32 : i32
      %109 = arith.index_cast %108 : i32 to index
      %c0_104 = arith.constant 0 : index
      %110 = vector.load %arg21[%109, %c0_104] : memref<24x128xf32, #tpu.memory_space<vmem>>, vector<1x128xf32>
      %111 = vector.extract_strided_slice %110 {offsets = [0, 0], sizes = [1, 33], strides = [1, 1]} : vector<1x128xf32> to vector<1x33xf32>
      %112 = vector.extract_strided_slice %110 {offsets = [0, 1], sizes = [1, 33], strides = [1, 1]} : vector<1x128xf32> to vector<1x33xf32>
      %113 = vector.extract_strided_slice %110 {offsets = [0, 2], sizes = [1, 33], strides = [1, 1]} : vector<1x128xf32> to vector<1x33xf32>
      %114 = tpu.concatenate %111, %112, %113 in 0 : vector<1x33xf32>, vector<1x33xf32>, vector<1x33xf32> -> vector<3x33xf32>
      %c5 = arith.constant 5 : index
      %c0_105 = arith.constant 0 : index
      %c0_106 = arith.constant 0 : index
      %115 = vector.load %arg3[%c5, %c0_105, %c0_106] : memref<9x32x3xf32, #tpu.memory_space<vmem>>, vector<1x32x3xf32>
      %116 = vector.shape_cast %115 : vector<1x32x3xf32> to vector<32x3xf32>
      %cst_107 = arith.constant dense<0.000000e+00> : vector<32x33xf32>
      %117 = tpu.matmul %116, %114, %cst_107 {dimension_numbers = #tpu.dot_dimension_numbers<[1], [0], [0], [1], [0, 0, 1, 1], [], []>} : vector<32x3xf32>, vector<3x33xf32>, vector<32x33xf32> -> vector<32x33xf32>
      %118 = arith.addf %106, %117 : vector<32x33xf32>
      %c1_i32_108 = arith.constant 1 : i32
      %119 = arith.muli %arg27, %c1_i32_108 : i32
      %c6_i32 = arith.constant 6 : i32
      %120 = arith.addi %119, %c6_i32 : i32
      %121 = arith.index_cast %120 : i32 to index
      %c0_109 = arith.constant 0 : index
      %122 = vector.load %arg21[%121, %c0_109] : memref<24x128xf32, #tpu.memory_space<vmem>>, vector<1x128xf32>
      %123 = vector.extract_strided_slice %122 {offsets = [0, 0], sizes = [1, 33], strides = [1, 1]} : vector<1x128xf32> to vector<1x33xf32>
      %124 = vector.extract_strided_slice %122 {offsets = [0, 1], sizes = [1, 33], strides = [1, 1]} : vector<1x128xf32> to vector<1x33xf32>
      %125 = vector.extract_strided_slice %122 {offsets = [0, 2], sizes = [1, 33], strides = [1, 1]} : vector<1x128xf32> to vector<1x33xf32>
      %126 = tpu.concatenate %123, %124, %125 in 0 : vector<1x33xf32>, vector<1x33xf32>, vector<1x33xf32> -> vector<3x33xf32>
      %c6 = arith.constant 6 : index
      %c0_110 = arith.constant 0 : index
      %c0_111 = arith.constant 0 : index
      %127 = vector.load %arg3[%c6, %c0_110, %c0_111] : memref<9x32x3xf32, #tpu.memory_space<vmem>>, vector<1x32x3xf32>
      %128 = vector.shape_cast %127 : vector<1x32x3xf32> to vector<32x3xf32>
      %cst_112 = arith.constant dense<0.000000e+00> : vector<32x33xf32>
      %129 = tpu.matmul %128, %126, %cst_112 {dimension_numbers = #tpu.dot_dimension_numbers<[1], [0], [0], [1], [0, 0, 1, 1], [], []>} : vector<32x3xf32>, vector<3x33xf32>, vector<32x33xf32> -> vector<32x33xf32>
      %130 = arith.addf %118, %129 : vector<32x33xf32>
      %c1_i32_113 = arith.constant 1 : i32
      %131 = arith.muli %arg27, %c1_i32_113 : i32
      %c7_i32 = arith.constant 7 : i32
      %132 = arith.addi %131, %c7_i32 : i32
      %133 = arith.index_cast %132 : i32 to index
      %c0_114 = arith.constant 0 : index
      %134 = vector.load %arg21[%133, %c0_114] : memref<24x128xf32, #tpu.memory_space<vmem>>, vector<1x128xf32>
      %135 = vector.extract_strided_slice %134 {offsets = [0, 0], sizes = [1, 33], strides = [1, 1]} : vector<1x128xf32> to vector<1x33xf32>
      %136 = vector.extract_strided_slice %134 {offsets = [0, 1], sizes = [1, 33], strides = [1, 1]} : vector<1x128xf32> to vector<1x33xf32>
      %137 = vector.extract_strided_slice %134 {offsets = [0, 2], sizes = [1, 33], strides = [1, 1]} : vector<1x128xf32> to vector<1x33xf32>
      %138 = tpu.concatenate %135, %136, %137 in 0 : vector<1x33xf32>, vector<1x33xf32>, vector<1x33xf32> -> vector<3x33xf32>
      %c7 = arith.constant 7 : index
      %c0_115 = arith.constant 0 : index
      %c0_116 = arith.constant 0 : index
      %139 = vector.load %arg3[%c7, %c0_115, %c0_116] : memref<9x32x3xf32, #tpu.memory_space<vmem>>, vector<1x32x3xf32>
      %140 = vector.shape_cast %139 : vector<1x32x3xf32> to vector<32x3xf32>
      %cst_117 = arith.constant dense<0.000000e+00> : vector<32x33xf32>
      %141 = tpu.matmul %140, %138, %cst_117 {dimension_numbers = #tpu.dot_dimension_numbers<[1], [0], [0], [1], [0, 0, 1, 1], [], []>} : vector<32x3xf32>, vector<3x33xf32>, vector<32x33xf32> -> vector<32x33xf32>
      %142 = arith.addf %130, %141 : vector<32x33xf32>
      %c1_i32_118 = arith.constant 1 : i32
      %143 = arith.muli %arg27, %c1_i32_118 : i32
      %c8_i32_119 = arith.constant 8 : i32
      %144 = arith.addi %143, %c8_i32_119 : i32
      %145 = arith.index_cast %144 : i32 to index
      %c0_120 = arith.constant 0 : index
      %146 = vector.load %arg21[%145, %c0_120] : memref<24x128xf32, #tpu.memory_space<vmem>>, vector<1x128xf32>
      %147 = vector.extract_strided_slice %146 {offsets = [0, 0], sizes = [1, 33], strides = [1, 1]} : vector<1x128xf32> to vector<1x33xf32>
      %148 = vector.extract_strided_slice %146 {offsets = [0, 1], sizes = [1, 33], strides = [1, 1]} : vector<1x128xf32> to vector<1x33xf32>
      %149 = vector.extract_strided_slice %146 {offsets = [0, 2], sizes = [1, 33], strides = [1, 1]} : vector<1x128xf32> to vector<1x33xf32>
      %150 = tpu.concatenate %147, %148, %149 in 0 : vector<1x33xf32>, vector<1x33xf32>, vector<1x33xf32> -> vector<3x33xf32>
      %c8_121 = arith.constant 8 : index
      %c0_122 = arith.constant 0 : index
      %c0_123 = arith.constant 0 : index
      %151 = vector.load %arg3[%c8_121, %c0_122, %c0_123] : memref<9x32x3xf32, #tpu.memory_space<vmem>>, vector<1x32x3xf32>
      %152 = vector.shape_cast %151 : vector<1x32x3xf32> to vector<32x3xf32>
      %cst_124 = arith.constant dense<0.000000e+00> : vector<32x33xf32>
      %153 = tpu.matmul %152, %150, %cst_124 {dimension_numbers = #tpu.dot_dimension_numbers<[1], [0], [0], [1], [0, 0, 1, 1], [], []>} : vector<32x3xf32>, vector<3x33xf32>, vector<32x33xf32> -> vector<32x33xf32>
      %154 = arith.addf %142, %153 : vector<32x33xf32>
      %c0_125 = arith.constant 0 : index
      %c0_126 = arith.constant 0 : index
      %155 = vector.load %arg4[%c0_125, %c0_126] : memref<32x1xf32, #tpu.memory_space<vmem>>, vector<32x1xf32>
      %156 = vector.broadcast %155 : vector<32x1xf32> to vector<32x33xf32>
      %157 = arith.addf %154, %156 : vector<32x33xf32>
      %cst_127 = arith.constant 0.000000e+00 : f32
      %158 = vector.broadcast %cst_127 : f32 to vector<32x33xf32>
      %159 = arith.cmpf oge, %157, %158 : vector<32x33xf32>
      %cst_128 = arith.constant 1.000000e-01 : f32
      %160 = vector.broadcast %cst_128 : f32 to vector<32x33xf32>
      %161 = arith.mulf %160, %157 : vector<32x33xf32>
      %162 = arith.select %159, %157, %161 : vector<32x33xi1>, vector<32x33xf32>
      %c0_129 = arith.constant 0 : index
      %163 = arith.index_cast %arg27 : i32 to index
      %c0_130 = arith.constant 0 : index
      %c0_131 = arith.constant 0 : index
      %164 = vector.load %arg15[%c0_129, %163, %c0_130, %c0_131] : memref<1x16x32x33xf32, #tpu.memory_space<vmem>>, vector<1x1x32x33xf32>
      %165 = vector.shape_cast %164 : vector<1x1x32x33xf32> to vector<32x33xf32>
      %166 = vector.shape_cast %162 : vector<32x33xf32> to vector<1x1x32x33xf32>
      tpu.vector_store %arg15[%c0_129, %163, %c0_130, %c0_131], %166 {strides = array<i32>} : memref<1x16x32x33xf32, #tpu.memory_space<vmem>>, vector<1x1x32x33xf32>,
      %167 = tpu.concatenate %19, %162, %19 in 1 : vector<32x1xf32>, vector<32x33xf32>, vector<32x1xf32> -> vector<32x35xf32>
      %168 = arith.truncf %167 : vector<32x35xf32> to vector<32x35xbf16>
      %c4_i32_132 = arith.constant 4 : i32
      %169 = arith.addi %arg27, %c4_i32_132 : i32
      %170 = arith.index_cast %169 : i32 to index
      %c0_133 = arith.constant 0 : index
      %c0_134 = arith.constant 0 : index
      %171 = vector.load %arg22[%170, %c0_133, %c0_134] : memref<24x32x128xbf16, #tpu.memory_space<vmem>>, vector<1x32x35xbf16>
      %172 = vector.shape_cast %171 : vector<1x32x35xbf16> to vector<32x35xbf16>
      %173 = vector.shape_cast %168 : vector<32x35xbf16> to vector<1x32x35xbf16>
      tpu.vector_store %arg22[%170, %c0_133, %c0_134], %173 {strides = array<i32>} : memref<24x32x128xbf16, #tpu.memory_space<vmem>>, vector<1x32x35xbf16>,
    }
    %c16_i32_19 = arith.constant 16 : i32
    %cst_20 = arith.constant 0.000000e+00 : bf16
    %21 = vector.broadcast %cst_20 : bf16 to vector<4x32x128xbf16>
    %c0_21 = arith.constant 0 : index
    %c0_22 = arith.constant 0 : index
    %c0_23 = arith.constant 0 : index
    %22 = vector.load %arg23[%c0_21, %c0_22, %c0_23] : memref<16x32x128xbf16, #tpu.memory_space<vmem>>, vector<4x32x128xbf16>
    tpu.vector_store %arg23[%c0_21, %c0_22, %c0_23], %21 {strides = array<i32>} : memref<16x32x128xbf16, #tpu.memory_space<vmem>>, vector<4x32x128xbf16>,
    %cst_24 = arith.constant 0.000000e+00 : bf16
    %23 = vector.broadcast %cst_24 : bf16 to vector<4x32x128xbf16>
    %c12 = arith.constant 12 : index
    %c0_25 = arith.constant 0 : index
    %c0_26 = arith.constant 0 : index
    %24 = vector.load %arg23[%c12, %c0_25, %c0_26] : memref<16x32x128xbf16, #tpu.memory_space<vmem>>, vector<4x32x128xbf16>
    tpu.vector_store %arg23[%c12, %c0_25, %c0_26], %23 {strides = array<i32>} : memref<16x32x128xbf16, #tpu.memory_space<vmem>>, vector<4x32x128xbf16>,
    %cst_27 = arith.constant 0.000000e+00 : f32
    %25 = vector.broadcast %cst_27 : f32 to vector<32x1xf32>
    %c0_i32_28 = arith.constant 0 : i32
    %c8_i32 = arith.constant 8 : i32
    %26 = arith.addi %c0_i32_28, %c8_i32 : i32
    %c1_i32_29 = arith.constant 1 : i32
    scf.for %arg27 = %c0_i32_28 to %26 step %c1_i32_29  : i32 {
      %cst_70 = arith.constant 0.000000e+00 : f32
      %46 = vector.broadcast %cst_70 : f32 to vector<32x33xf32>
      %c2_i32_71 = arith.constant 2 : i32
      %47 = arith.muli %arg27, %c2_i32_71 : i32
      %c0_i32_72 = arith.constant 0 : i32
      %48 = arith.addi %47, %c0_i32_72 : i32
      %49 = arith.index_cast %48 : i32 to index
      %c0_73 = arith.constant 0 : index
      %c0_74 = arith.constant 0 : index
      %50 = vector.load %arg22[%49, %c0_73, %c0_74] : memref<24x32x128xbf16, #tpu.memory_space<vmem>>, vector<1x32x128xbf16>
      %51 = vector.shape_cast %50 : vector<1x32x128xbf16> to vector<32x128xbf16>
      %52 = vector.extract_strided_slice %51 {offsets = [0, 0], sizes = [32, 33], strides = [1, 1]} : vector<32x128xbf16> to vector<32x33xbf16>
      %53 = vector.extract_strided_slice %51 {offsets = [0, 1], sizes = [32, 33], strides = [1, 1]} : vector<32x128xbf16> to vector<32x33xbf16>
      %54 = vector.extract_strided_slice %51 {offsets = [0, 2], sizes = [32, 33], strides = [1, 1]} : vector<32x128xbf16> to vector<32x33xbf16>
      %55 = tpu.concatenate %52, %53, %54 in 0 : vector<32x33xbf16>, vector<32x33xbf16>, vector<32x33xbf16> -> vector<96x33xbf16>
      %c0_75 = arith.constant 0 : index
      %c0_76 = arith.constant 0 : index
      %c0_77 = arith.constant 0 : index
      %56 = vector.load %arg5[%c0_75, %c0_76, %c0_77] : memref<9x32x96xbf16, #tpu.memory_space<vmem>>, vector<1x32x96xbf16>
      %57 = vector.shape_cast %56 : vector<1x32x96xbf16> to vector<32x96xbf16>
      %cst_78 = arith.constant dense<0.000000e+00> : vector<32x33xf32>
      %58 = tpu.matmul %57, %55, %cst_78 {dimension_numbers = #tpu.dot_dimension_numbers<[1], [0], [0], [1], [0, 0, 1, 1], [], []>} : vector<32x96xbf16>, vector<96x33xbf16>, vector<32x33xf32> -> vector<32x33xf32>
      %59 = arith.addf %46, %58 : vector<32x33xf32>
      %c2_i32_79 = arith.constant 2 : i32
      %60 = arith.muli %arg27, %c2_i32_79 : i32
      %c1_i32_80 = arith.constant 1 : i32
      %61 = arith.addi %60, %c1_i32_80 : i32
      %62 = arith.index_cast %61 : i32 to index
      %c0_81 = arith.constant 0 : index
      %c0_82 = arith.constant 0 : index
      %63 = vector.load %arg22[%62, %c0_81, %c0_82] : memref<24x32x128xbf16, #tpu.memory_space<vmem>>, vector<1x32x128xbf16>
      %64 = vector.shape_cast %63 : vector<1x32x128xbf16> to vector<32x128xbf16>
      %65 = vector.extract_strided_slice %64 {offsets = [0, 0], sizes = [32, 33], strides = [1, 1]} : vector<32x128xbf16> to vector<32x33xbf16>
      %66 = vector.extract_strided_slice %64 {offsets = [0, 1], sizes = [32, 33], strides = [1, 1]} : vector<32x128xbf16> to vector<32x33xbf16>
      %67 = vector.extract_strided_slice %64 {offsets = [0, 2], sizes = [32, 33], strides = [1, 1]} : vector<32x128xbf16> to vector<32x33xbf16>
      %68 = tpu.concatenate %65, %66, %67 in 0 : vector<32x33xbf16>, vector<32x33xbf16>, vector<32x33xbf16> -> vector<96x33xbf16>
      %c1 = arith.constant 1 : index
      %c0_83 = arith.constant 0 : index
      %c0_84 = arith.constant 0 : index
      %69 = vector.load %arg5[%c1, %c0_83, %c0_84] : memref<9x32x96xbf16, #tpu.memory_space<vmem>>, vector<1x32x96xbf16>
      %70 = vector.shape_cast %69 : vector<1x32x96xbf16> to vector<32x96xbf16>
      %cst_85 = arith.constant dense<0.000000e+00> : vector<32x33xf32>
      %71 = tpu.matmul %70, %68, %cst_85 {dimension_numbers = #tpu.dot_dimension_numbers<[1], [0], [0], [1], [0, 0, 1, 1], [], []>} : vector<32x96xbf16>, vector<96x33xbf16>, vector<32x33xf32> -> vector<32x33xf32>
      %72 = arith.addf %59, %71 : vector<32x33xf32>
      %c2_i32_86 = arith.constant 2 : i32
      %73 = arith.muli %arg27, %c2_i32_86 : i32
      %c2_i32_87 = arith.constant 2 : i32
      %74 = arith.addi %73, %c2_i32_87 : i32
      %75 = arith.index_cast %74 : i32 to index
      %c0_88 = arith.constant 0 : index
      %c0_89 = arith.constant 0 : index
      %76 = vector.load %arg22[%75, %c0_88, %c0_89] : memref<24x32x128xbf16, #tpu.memory_space<vmem>>, vector<1x32x128xbf16>
      %77 = vector.shape_cast %76 : vector<1x32x128xbf16> to vector<32x128xbf16>
      %78 = vector.extract_strided_slice %77 {offsets = [0, 0], sizes = [32, 33], strides = [1, 1]} : vector<32x128xbf16> to vector<32x33xbf16>
      %79 = vector.extract_strided_slice %77 {offsets = [0, 1], sizes = [32, 33], strides = [1, 1]} : vector<32x128xbf16> to vector<32x33xbf16>
      %80 = vector.extract_strided_slice %77 {offsets = [0, 2], sizes = [32, 33], strides = [1, 1]} : vector<32x128xbf16> to vector<32x33xbf16>
      %81 = tpu.concatenate %78, %79, %80 in 0 : vector<32x33xbf16>, vector<32x33xbf16>, vector<32x33xbf16> -> vector<96x33xbf16>
      %c2 = arith.constant 2 : index
      %c0_90 = arith.constant 0 : index
      %c0_91 = arith.constant 0 : index
      %82 = vector.load %arg5[%c2, %c0_90, %c0_91] : memref<9x32x96xbf16, #tpu.memory_space<vmem>>, vector<1x32x96xbf16>
      %83 = vector.shape_cast %82 : vector<1x32x96xbf16> to vector<32x96xbf16>
      %cst_92 = arith.constant dense<0.000000e+00> : vector<32x33xf32>
      %84 = tpu.matmul %83, %81, %cst_92 {dimension_numbers = #tpu.dot_dimension_numbers<[1], [0], [0], [1], [0, 0, 1, 1], [], []>} : vector<32x96xbf16>, vector<96x33xbf16>, vector<32x33xf32> -> vector<32x33xf32>
      %85 = arith.addf %72, %84 : vector<32x33xf32>
      %c2_i32_93 = arith.constant 2 : i32
      %86 = arith.muli %arg27, %c2_i32_93 : i32
      %c3_i32 = arith.constant 3 : i32
      %87 = arith.addi %86, %c3_i32 : i32
      %88 = arith.index_cast %87 : i32 to index
      %c0_94 = arith.constant 0 : index
      %c0_95 = arith.constant 0 : index
      %89 = vector.load %arg22[%88, %c0_94, %c0_95] : memref<24x32x128xbf16, #tpu.memory_space<vmem>>, vector<1x32x128xbf16>
      %90 = vector.shape_cast %89 : vector<1x32x128xbf16> to vector<32x128xbf16>
      %91 = vector.extract_strided_slice %90 {offsets = [0, 0], sizes = [32, 33], strides = [1, 1]} : vector<32x128xbf16> to vector<32x33xbf16>
      %92 = vector.extract_strided_slice %90 {offsets = [0, 1], sizes = [32, 33], strides = [1, 1]} : vector<32x128xbf16> to vector<32x33xbf16>
      %93 = vector.extract_strided_slice %90 {offsets = [0, 2], sizes = [32, 33], strides = [1, 1]} : vector<32x128xbf16> to vector<32x33xbf16>
      %94 = tpu.concatenate %91, %92, %93 in 0 : vector<32x33xbf16>, vector<32x33xbf16>, vector<32x33xbf16> -> vector<96x33xbf16>
      %c3_96 = arith.constant 3 : index
      %c0_97 = arith.constant 0 : index
      %c0_98 = arith.constant 0 : index
      %95 = vector.load %arg5[%c3_96, %c0_97, %c0_98] : memref<9x32x96xbf16, #tpu.memory_space<vmem>>, vector<1x32x96xbf16>
      %96 = vector.shape_cast %95 : vector<1x32x96xbf16> to vector<32x96xbf16>
      %cst_99 = arith.constant dense<0.000000e+00> : vector<32x33xf32>
      %97 = tpu.matmul %96, %94, %cst_99 {dimension_numbers = #tpu.dot_dimension_numbers<[1], [0], [0], [1], [0, 0, 1, 1], [], []>} : vector<32x96xbf16>, vector<96x33xbf16>, vector<32x33xf32> -> vector<32x33xf32>
      %98 = arith.addf %85, %97 : vector<32x33xf32>
      %c2_i32_100 = arith.constant 2 : i32
      %99 = arith.muli %arg27, %c2_i32_100 : i32
      %c4_i32_101 = arith.constant 4 : i32
      %100 = arith.addi %99, %c4_i32_101 : i32
      %101 = arith.index_cast %100 : i32 to index
      %c0_102 = arith.constant 0 : index
      %c0_103 = arith.constant 0 : index
      %102 = vector.load %arg22[%101, %c0_102, %c0_103] : memref<24x32x128xbf16, #tpu.memory_space<vmem>>, vector<1x32x128xbf16>
      %103 = vector.shape_cast %102 : vector<1x32x128xbf16> to vector<32x128xbf16>
      %104 = vector.extract_strided_slice %103 {offsets = [0, 0], sizes = [32, 33], strides = [1, 1]} : vector<32x128xbf16> to vector<32x33xbf16>
      %105 = vector.extract_strided_slice %103 {offsets = [0, 1], sizes = [32, 33], strides = [1, 1]} : vector<32x128xbf16> to vector<32x33xbf16>
      %106 = vector.extract_strided_slice %103 {offsets = [0, 2], sizes = [32, 33], strides = [1, 1]} : vector<32x128xbf16> to vector<32x33xbf16>
      %107 = tpu.concatenate %104, %105, %106 in 0 : vector<32x33xbf16>, vector<32x33xbf16>, vector<32x33xbf16> -> vector<96x33xbf16>
      %c4_104 = arith.constant 4 : index
      %c0_105 = arith.constant 0 : index
      %c0_106 = arith.constant 0 : index
      %108 = vector.load %arg5[%c4_104, %c0_105, %c0_106] : memref<9x32x96xbf16, #tpu.memory_space<vmem>>, vector<1x32x96xbf16>
      %109 = vector.shape_cast %108 : vector<1x32x96xbf16> to vector<32x96xbf16>
      %cst_107 = arith.constant dense<0.000000e+00> : vector<32x33xf32>
      %110 = tpu.matmul %109, %107, %cst_107 {dimension_numbers = #tpu.dot_dimension_numbers<[1], [0], [0], [1], [0, 0, 1, 1], [], []>} : vector<32x96xbf16>, vector<96x33xbf16>, vector<32x33xf32> -> vector<32x33xf32>
      %111 = arith.addf %98, %110 : vector<32x33xf32>
      %c2_i32_108 = arith.constant 2 : i32
      %112 = arith.muli %arg27, %c2_i32_108 : i32
      %c5_i32 = arith.constant 5 : i32
      %113 = arith.addi %112, %c5_i32 : i32
      %114 = arith.index_cast %113 : i32 to index
      %c0_109 = arith.constant 0 : index
      %c0_110 = arith.constant 0 : index
      %115 = vector.load %arg22[%114, %c0_109, %c0_110] : memref<24x32x128xbf16, #tpu.memory_space<vmem>>, vector<1x32x128xbf16>
      %116 = vector.shape_cast %115 : vector<1x32x128xbf16> to vector<32x128xbf16>
      %117 = vector.extract_strided_slice %116 {offsets = [0, 0], sizes = [32, 33], strides = [1, 1]} : vector<32x128xbf16> to vector<32x33xbf16>
      %118 = vector.extract_strided_slice %116 {offsets = [0, 1], sizes = [32, 33], strides = [1, 1]} : vector<32x128xbf16> to vector<32x33xbf16>
      %119 = vector.extract_strided_slice %116 {offsets = [0, 2], sizes = [32, 33], strides = [1, 1]} : vector<32x128xbf16> to vector<32x33xbf16>
      %120 = tpu.concatenate %117, %118, %119 in 0 : vector<32x33xbf16>, vector<32x33xbf16>, vector<32x33xbf16> -> vector<96x33xbf16>
      %c5 = arith.constant 5 : index
      %c0_111 = arith.constant 0 : index
      %c0_112 = arith.constant 0 : index
      %121 = vector.load %arg5[%c5, %c0_111, %c0_112] : memref<9x32x96xbf16, #tpu.memory_space<vmem>>, vector<1x32x96xbf16>
      %122 = vector.shape_cast %121 : vector<1x32x96xbf16> to vector<32x96xbf16>
      %cst_113 = arith.constant dense<0.000000e+00> : vector<32x33xf32>
      %123 = tpu.matmul %122, %120, %cst_113 {dimension_numbers = #tpu.dot_dimension_numbers<[1], [0], [0], [1], [0, 0, 1, 1], [], []>} : vector<32x96xbf16>, vector<96x33xbf16>, vector<32x33xf32> -> vector<32x33xf32>
      %124 = arith.addf %111, %123 : vector<32x33xf32>
      %c2_i32_114 = arith.constant 2 : i32
      %125 = arith.muli %arg27, %c2_i32_114 : i32
      %c6_i32 = arith.constant 6 : i32
      %126 = arith.addi %125, %c6_i32 : i32
      %127 = arith.index_cast %126 : i32 to index
      %c0_115 = arith.constant 0 : index
      %c0_116 = arith.constant 0 : index
      %128 = vector.load %arg22[%127, %c0_115, %c0_116] : memref<24x32x128xbf16, #tpu.memory_space<vmem>>, vector<1x32x128xbf16>
      %129 = vector.shape_cast %128 : vector<1x32x128xbf16> to vector<32x128xbf16>
      %130 = vector.extract_strided_slice %129 {offsets = [0, 0], sizes = [32, 33], strides = [1, 1]} : vector<32x128xbf16> to vector<32x33xbf16>
      %131 = vector.extract_strided_slice %129 {offsets = [0, 1], sizes = [32, 33], strides = [1, 1]} : vector<32x128xbf16> to vector<32x33xbf16>
      %132 = vector.extract_strided_slice %129 {offsets = [0, 2], sizes = [32, 33], strides = [1, 1]} : vector<32x128xbf16> to vector<32x33xbf16>
      %133 = tpu.concatenate %130, %131, %132 in 0 : vector<32x33xbf16>, vector<32x33xbf16>, vector<32x33xbf16> -> vector<96x33xbf16>
      %c6 = arith.constant 6 : index
      %c0_117 = arith.constant 0 : index
      %c0_118 = arith.constant 0 : index
      %134 = vector.load %arg5[%c6, %c0_117, %c0_118] : memref<9x32x96xbf16, #tpu.memory_space<vmem>>, vector<1x32x96xbf16>
      %135 = vector.shape_cast %134 : vector<1x32x96xbf16> to vector<32x96xbf16>
      %cst_119 = arith.constant dense<0.000000e+00> : vector<32x33xf32>
      %136 = tpu.matmul %135, %133, %cst_119 {dimension_numbers = #tpu.dot_dimension_numbers<[1], [0], [0], [1], [0, 0, 1, 1], [], []>} : vector<32x96xbf16>, vector<96x33xbf16>, vector<32x33xf32> -> vector<32x33xf32>
      %137 = arith.addf %124, %136 : vector<32x33xf32>
      %c2_i32_120 = arith.constant 2 : i32
      %138 = arith.muli %arg27, %c2_i32_120 : i32
      %c7_i32 = arith.constant 7 : i32
      %139 = arith.addi %138, %c7_i32 : i32
      %140 = arith.index_cast %139 : i32 to index
      %c0_121 = arith.constant 0 : index
      %c0_122 = arith.constant 0 : index
      %141 = vector.load %arg22[%140, %c0_121, %c0_122] : memref<24x32x128xbf16, #tpu.memory_space<vmem>>, vector<1x32x128xbf16>
      %142 = vector.shape_cast %141 : vector<1x32x128xbf16> to vector<32x128xbf16>
      %143 = vector.extract_strided_slice %142 {offsets = [0, 0], sizes = [32, 33], strides = [1, 1]} : vector<32x128xbf16> to vector<32x33xbf16>
      %144 = vector.extract_strided_slice %142 {offsets = [0, 1], sizes = [32, 33], strides = [1, 1]} : vector<32x128xbf16> to vector<32x33xbf16>
      %145 = vector.extract_strided_slice %142 {offsets = [0, 2], sizes = [32, 33], strides = [1, 1]} : vector<32x128xbf16> to vector<32x33xbf16>
      %146 = tpu.concatenate %143, %144, %145 in 0 : vector<32x33xbf16>, vector<32x33xbf16>, vector<32x33xbf16> -> vector<96x33xbf16>
      %c7 = arith.constant 7 : index
      %c0_123 = arith.constant 0 : index
      %c0_124 = arith.constant 0 : index
      %147 = vector.load %arg5[%c7, %c0_123, %c0_124] : memref<9x32x96xbf16, #tpu.memory_space<vmem>>, vector<1x32x96xbf16>
      %148 = vector.shape_cast %147 : vector<1x32x96xbf16> to vector<32x96xbf16>
      %cst_125 = arith.constant dense<0.000000e+00> : vector<32x33xf32>
      %149 = tpu.matmul %148, %146, %cst_125 {dimension_numbers = #tpu.dot_dimension_numbers<[1], [0], [0], [1], [0, 0, 1, 1], [], []>} : vector<32x96xbf16>, vector<96x33xbf16>, vector<32x33xf32> -> vector<32x33xf32>
      %150 = arith.addf %137, %149 : vector<32x33xf32>
      %c2_i32_126 = arith.constant 2 : i32
      %151 = arith.muli %arg27, %c2_i32_126 : i32
      %c8_i32_127 = arith.constant 8 : i32
      %152 = arith.addi %151, %c8_i32_127 : i32
      %153 = arith.index_cast %152 : i32 to index
      %c0_128 = arith.constant 0 : index
      %c0_129 = arith.constant 0 : index
      %154 = vector.load %arg22[%153, %c0_128, %c0_129] : memref<24x32x128xbf16, #tpu.memory_space<vmem>>, vector<1x32x128xbf16>
      %155 = vector.shape_cast %154 : vector<1x32x128xbf16> to vector<32x128xbf16>
      %156 = vector.extract_strided_slice %155 {offsets = [0, 0], sizes = [32, 33], strides = [1, 1]} : vector<32x128xbf16> to vector<32x33xbf16>
      %157 = vector.extract_strided_slice %155 {offsets = [0, 1], sizes = [32, 33], strides = [1, 1]} : vector<32x128xbf16> to vector<32x33xbf16>
      %158 = vector.extract_strided_slice %155 {offsets = [0, 2], sizes = [32, 33], strides = [1, 1]} : vector<32x128xbf16> to vector<32x33xbf16>
      %159 = tpu.concatenate %156, %157, %158 in 0 : vector<32x33xbf16>, vector<32x33xbf16>, vector<32x33xbf16> -> vector<96x33xbf16>
      %c8_130 = arith.constant 8 : index
      %c0_131 = arith.constant 0 : index
      %c0_132 = arith.constant 0 : index
      %160 = vector.load %arg5[%c8_130, %c0_131, %c0_132] : memref<9x32x96xbf16, #tpu.memory_space<vmem>>, vector<1x32x96xbf16>
      %161 = vector.shape_cast %160 : vector<1x32x96xbf16> to vector<32x96xbf16>
      %cst_133 = arith.constant dense<0.000000e+00> : vector<32x33xf32>
      %162 = tpu.matmul %161, %159, %cst_133 {dimension_numbers = #tpu.dot_dimension_numbers<[1], [0], [0], [1], [0, 0, 1, 1], [], []>} : vector<32x96xbf16>, vector<96x33xbf16>, vector<32x33xf32> -> vector<32x33xf32>
      %163 = arith.addf %150, %162 : vector<32x33xf32>
      %c0_134 = arith.constant 0 : index
      %c0_135 = arith.constant 0 : index
      %164 = vector.load %arg6[%c0_134, %c0_135] : memref<32x1xf32, #tpu.memory_space<vmem>>, vector<32x1xf32>
      %165 = vector.broadcast %164 : vector<32x1xf32> to vector<32x33xf32>
      %166 = arith.addf %163, %165 : vector<32x33xf32>
      %cst_136 = arith.constant 0.000000e+00 : f32
      %167 = vector.broadcast %cst_136 : f32 to vector<32x33xf32>
      %168 = arith.cmpf oge, %166, %167 : vector<32x33xf32>
      %cst_137 = arith.constant 1.000000e-01 : f32
      %169 = vector.broadcast %cst_137 : f32 to vector<32x33xf32>
      %170 = arith.mulf %169, %166 : vector<32x33xf32>
      %171 = arith.select %168, %166, %170 : vector<32x33xi1>, vector<32x33xf32>
      %c0_138 = arith.constant 0 : index
      %172 = arith.index_cast %arg27 : i32 to index
      %c0_139 = arith.constant 0 : index
      %c0_140 = arith.constant 0 : index
      %173 = vector.load %arg16[%c0_138, %172, %c0_139, %c0_140] : memref<1x8x32x33xf32, #tpu.memory_space<vmem>>, vector<1x1x32x33xf32>
      %174 = vector.shape_cast %173 : vector<1x1x32x33xf32> to vector<32x33xf32>
      %175 = vector.shape_cast %171 : vector<32x33xf32> to vector<1x1x32x33xf32>
      tpu.vector_store %arg16[%c0_138, %172, %c0_139, %c0_140], %175 {strides = array<i32>} : memref<1x8x32x33xf32, #tpu.memory_space<vmem>>, vector<1x1x32x33xf32>,
      %176 = tpu.concatenate %25, %171, %25 in 1 : vector<32x1xf32>, vector<32x33xf32>, vector<32x1xf32> -> vector<32x35xf32>
      %177 = arith.truncf %176 : vector<32x35xf32> to vector<32x35xbf16>
      %c4_i32_141 = arith.constant 4 : i32
      %178 = arith.addi %arg27, %c4_i32_141 : i32
      %179 = arith.index_cast %178 : i32 to index
      %c0_142 = arith.constant 0 : index
      %c0_143 = arith.constant 0 : index
      %180 = vector.load %arg23[%179, %c0_142, %c0_143] : memref<16x32x128xbf16, #tpu.memory_space<vmem>>, vector<1x32x35xbf16>
      %181 = vector.shape_cast %180 : vector<1x32x35xbf16> to vector<32x35xbf16>
      %182 = vector.shape_cast %177 : vector<32x35xbf16> to vector<1x32x35xbf16>
      tpu.vector_store %arg23[%179, %c0_142, %c0_143], %182 {strides = array<i32>} : memref<16x32x128xbf16, #tpu.memory_space<vmem>>, vector<1x32x35xbf16>,
    }
    %c8_i32_30 = arith.constant 8 : i32
    %cst_31 = arith.constant 0.000000e+00 : bf16
    %27 = vector.broadcast %cst_31 : bf16 to vector<4x32x128xbf16>
    %c0_32 = arith.constant 0 : index
    %c0_33 = arith.constant 0 : index
    %c0_34 = arith.constant 0 : index
    %28 = vector.load %arg24[%c0_32, %c0_33, %c0_34] : memref<12x32x128xbf16, #tpu.memory_space<vmem>>, vector<4x32x128xbf16>
    tpu.vector_store %arg24[%c0_32, %c0_33, %c0_34], %27 {strides = array<i32>} : memref<12x32x128xbf16, #tpu.memory_space<vmem>>, vector<4x32x128xbf16>,
    %cst_35 = arith.constant 0.000000e+00 : bf16
    %29 = vector.broadcast %cst_35 : bf16 to vector<4x32x128xbf16>
    %c8 = arith.constant 8 : index
    %c0_36 = arith.constant 0 : index
    %c0_37 = arith.constant 0 : index
    %30 = vector.load %arg24[%c8, %c0_36, %c0_37] : memref<12x32x128xbf16, #tpu.memory_space<vmem>>, vector<4x32x128xbf16>
    tpu.vector_store %arg24[%c8, %c0_36, %c0_37], %29 {strides = array<i32>} : memref<12x32x128xbf16, #tpu.memory_space<vmem>>, vector<4x32x128xbf16>,
    %cst_38 = arith.constant 0.000000e+00 : f32
    %31 = vector.broadcast %cst_38 : f32 to vector<32x1xf32>
    %c0_i32_39 = arith.constant 0 : i32
    %c4_i32 = arith.constant 4 : i32
    %32 = arith.addi %c0_i32_39, %c4_i32 : i32
    %c1_i32_40 = arith.constant 1 : i32
    scf.for %arg27 = %c0_i32_39 to %32 step %c1_i32_40  : i32 {
      %cst_70 = arith.constant 0.000000e+00 : f32
      %46 = vector.broadcast %cst_70 : f32 to vector<32x33xf32>
      %c2_i32_71 = arith.constant 2 : i32
      %47 = arith.muli %arg27, %c2_i32_71 : i32
      %c0_i32_72 = arith.constant 0 : i32
      %48 = arith.addi %47, %c0_i32_72 : i32
      %49 = arith.index_cast %48 : i32 to index
      %c0_73 = arith.constant 0 : index
      %c0_74 = arith.constant 0 : index
      %50 = vector.load %arg23[%49, %c0_73, %c0_74] : memref<16x32x128xbf16, #tpu.memory_space<vmem>>, vector<1x32x128xbf16>
      %51 = vector.shape_cast %50 : vector<1x32x128xbf16> to vector<32x128xbf16>
      %52 = vector.extract_strided_slice %51 {offsets = [0, 0], sizes = [32, 33], strides = [1, 1]} : vector<32x128xbf16> to vector<32x33xbf16>
      %53 = vector.extract_strided_slice %51 {offsets = [0, 1], sizes = [32, 33], strides = [1, 1]} : vector<32x128xbf16> to vector<32x33xbf16>
      %54 = vector.extract_strided_slice %51 {offsets = [0, 2], sizes = [32, 33], strides = [1, 1]} : vector<32x128xbf16> to vector<32x33xbf16>
      %55 = tpu.concatenate %52, %53, %54 in 0 : vector<32x33xbf16>, vector<32x33xbf16>, vector<32x33xbf16> -> vector<96x33xbf16>
      %c0_75 = arith.constant 0 : index
      %c0_76 = arith.constant 0 : index
      %c0_77 = arith.constant 0 : index
      %56 = vector.load %arg7[%c0_75, %c0_76, %c0_77] : memref<9x32x96xbf16, #tpu.memory_space<vmem>>, vector<1x32x96xbf16>
      %57 = vector.shape_cast %56 : vector<1x32x96xbf16> to vector<32x96xbf16>
      %cst_78 = arith.constant dense<0.000000e+00> : vector<32x33xf32>
      %58 = tpu.matmul %57, %55, %cst_78 {dimension_numbers = #tpu.dot_dimension_numbers<[1], [0], [0], [1], [0, 0, 1, 1], [], []>} : vector<32x96xbf16>, vector<96x33xbf16>, vector<32x33xf32> -> vector<32x33xf32>
      %59 = arith.addf %46, %58 : vector<32x33xf32>
      %c2_i32_79 = arith.constant 2 : i32
      %60 = arith.muli %arg27, %c2_i32_79 : i32
      %c1_i32_80 = arith.constant 1 : i32
      %61 = arith.addi %60, %c1_i32_80 : i32
      %62 = arith.index_cast %61 : i32 to index
      %c0_81 = arith.constant 0 : index
      %c0_82 = arith.constant 0 : index
      %63 = vector.load %arg23[%62, %c0_81, %c0_82] : memref<16x32x128xbf16, #tpu.memory_space<vmem>>, vector<1x32x128xbf16>
      %64 = vector.shape_cast %63 : vector<1x32x128xbf16> to vector<32x128xbf16>
      %65 = vector.extract_strided_slice %64 {offsets = [0, 0], sizes = [32, 33], strides = [1, 1]} : vector<32x128xbf16> to vector<32x33xbf16>
      %66 = vector.extract_strided_slice %64 {offsets = [0, 1], sizes = [32, 33], strides = [1, 1]} : vector<32x128xbf16> to vector<32x33xbf16>
      %67 = vector.extract_strided_slice %64 {offsets = [0, 2], sizes = [32, 33], strides = [1, 1]} : vector<32x128xbf16> to vector<32x33xbf16>
      %68 = tpu.concatenate %65, %66, %67 in 0 : vector<32x33xbf16>, vector<32x33xbf16>, vector<32x33xbf16> -> vector<96x33xbf16>
      %c1 = arith.constant 1 : index
      %c0_83 = arith.constant 0 : index
      %c0_84 = arith.constant 0 : index
      %69 = vector.load %arg7[%c1, %c0_83, %c0_84] : memref<9x32x96xbf16, #tpu.memory_space<vmem>>, vector<1x32x96xbf16>
      %70 = vector.shape_cast %69 : vector<1x32x96xbf16> to vector<32x96xbf16>
      %cst_85 = arith.constant dense<0.000000e+00> : vector<32x33xf32>
      %71 = tpu.matmul %70, %68, %cst_85 {dimension_numbers = #tpu.dot_dimension_numbers<[1], [0], [0], [1], [0, 0, 1, 1], [], []>} : vector<32x96xbf16>, vector<96x33xbf16>, vector<32x33xf32> -> vector<32x33xf32>
      %72 = arith.addf %59, %71 : vector<32x33xf32>
      %c2_i32_86 = arith.constant 2 : i32
      %73 = arith.muli %arg27, %c2_i32_86 : i32
      %c2_i32_87 = arith.constant 2 : i32
      %74 = arith.addi %73, %c2_i32_87 : i32
      %75 = arith.index_cast %74 : i32 to index
      %c0_88 = arith.constant 0 : index
      %c0_89 = arith.constant 0 : index
      %76 = vector.load %arg23[%75, %c0_88, %c0_89] : memref<16x32x128xbf16, #tpu.memory_space<vmem>>, vector<1x32x128xbf16>
      %77 = vector.shape_cast %76 : vector<1x32x128xbf16> to vector<32x128xbf16>
      %78 = vector.extract_strided_slice %77 {offsets = [0, 0], sizes = [32, 33], strides = [1, 1]} : vector<32x128xbf16> to vector<32x33xbf16>
      %79 = vector.extract_strided_slice %77 {offsets = [0, 1], sizes = [32, 33], strides = [1, 1]} : vector<32x128xbf16> to vector<32x33xbf16>
      %80 = vector.extract_strided_slice %77 {offsets = [0, 2], sizes = [32, 33], strides = [1, 1]} : vector<32x128xbf16> to vector<32x33xbf16>
      %81 = tpu.concatenate %78, %79, %80 in 0 : vector<32x33xbf16>, vector<32x33xbf16>, vector<32x33xbf16> -> vector<96x33xbf16>
      %c2 = arith.constant 2 : index
      %c0_90 = arith.constant 0 : index
      %c0_91 = arith.constant 0 : index
      %82 = vector.load %arg7[%c2, %c0_90, %c0_91] : memref<9x32x96xbf16, #tpu.memory_space<vmem>>, vector<1x32x96xbf16>
      %83 = vector.shape_cast %82 : vector<1x32x96xbf16> to vector<32x96xbf16>
      %cst_92 = arith.constant dense<0.000000e+00> : vector<32x33xf32>
      %84 = tpu.matmul %83, %81, %cst_92 {dimension_numbers = #tpu.dot_dimension_numbers<[1], [0], [0], [1], [0, 0, 1, 1], [], []>} : vector<32x96xbf16>, vector<96x33xbf16>, vector<32x33xf32> -> vector<32x33xf32>
      %85 = arith.addf %72, %84 : vector<32x33xf32>
      %c2_i32_93 = arith.constant 2 : i32
      %86 = arith.muli %arg27, %c2_i32_93 : i32
      %c3_i32 = arith.constant 3 : i32
      %87 = arith.addi %86, %c3_i32 : i32
      %88 = arith.index_cast %87 : i32 to index
      %c0_94 = arith.constant 0 : index
      %c0_95 = arith.constant 0 : index
      %89 = vector.load %arg23[%88, %c0_94, %c0_95] : memref<16x32x128xbf16, #tpu.memory_space<vmem>>, vector<1x32x128xbf16>
      %90 = vector.shape_cast %89 : vector<1x32x128xbf16> to vector<32x128xbf16>
      %91 = vector.extract_strided_slice %90 {offsets = [0, 0], sizes = [32, 33], strides = [1, 1]} : vector<32x128xbf16> to vector<32x33xbf16>
      %92 = vector.extract_strided_slice %90 {offsets = [0, 1], sizes = [32, 33], strides = [1, 1]} : vector<32x128xbf16> to vector<32x33xbf16>
      %93 = vector.extract_strided_slice %90 {offsets = [0, 2], sizes = [32, 33], strides = [1, 1]} : vector<32x128xbf16> to vector<32x33xbf16>
      %94 = tpu.concatenate %91, %92, %93 in 0 : vector<32x33xbf16>, vector<32x33xbf16>, vector<32x33xbf16> -> vector<96x33xbf16>
      %c3_96 = arith.constant 3 : index
      %c0_97 = arith.constant 0 : index
      %c0_98 = arith.constant 0 : index
      %95 = vector.load %arg7[%c3_96, %c0_97, %c0_98] : memref<9x32x96xbf16, #tpu.memory_space<vmem>>, vector<1x32x96xbf16>
      %96 = vector.shape_cast %95 : vector<1x32x96xbf16> to vector<32x96xbf16>
      %cst_99 = arith.constant dense<0.000000e+00> : vector<32x33xf32>
      %97 = tpu.matmul %96, %94, %cst_99 {dimension_numbers = #tpu.dot_dimension_numbers<[1], [0], [0], [1], [0, 0, 1, 1], [], []>} : vector<32x96xbf16>, vector<96x33xbf16>, vector<32x33xf32> -> vector<32x33xf32>
      %98 = arith.addf %85, %97 : vector<32x33xf32>
      %c2_i32_100 = arith.constant 2 : i32
      %99 = arith.muli %arg27, %c2_i32_100 : i32
      %c4_i32_101 = arith.constant 4 : i32
      %100 = arith.addi %99, %c4_i32_101 : i32
      %101 = arith.index_cast %100 : i32 to index
      %c0_102 = arith.constant 0 : index
      %c0_103 = arith.constant 0 : index
      %102 = vector.load %arg23[%101, %c0_102, %c0_103] : memref<16x32x128xbf16, #tpu.memory_space<vmem>>, vector<1x32x128xbf16>
      %103 = vector.shape_cast %102 : vector<1x32x128xbf16> to vector<32x128xbf16>
      %104 = vector.extract_strided_slice %103 {offsets = [0, 0], sizes = [32, 33], strides = [1, 1]} : vector<32x128xbf16> to vector<32x33xbf16>
      %105 = vector.extract_strided_slice %103 {offsets = [0, 1], sizes = [32, 33], strides = [1, 1]} : vector<32x128xbf16> to vector<32x33xbf16>
      %106 = vector.extract_strided_slice %103 {offsets = [0, 2], sizes = [32, 33], strides = [1, 1]} : vector<32x128xbf16> to vector<32x33xbf16>
      %107 = tpu.concatenate %104, %105, %106 in 0 : vector<32x33xbf16>, vector<32x33xbf16>, vector<32x33xbf16> -> vector<96x33xbf16>
      %c4_104 = arith.constant 4 : index
      %c0_105 = arith.constant 0 : index
      %c0_106 = arith.constant 0 : index
      %108 = vector.load %arg7[%c4_104, %c0_105, %c0_106] : memref<9x32x96xbf16, #tpu.memory_space<vmem>>, vector<1x32x96xbf16>
      %109 = vector.shape_cast %108 : vector<1x32x96xbf16> to vector<32x96xbf16>
      %cst_107 = arith.constant dense<0.000000e+00> : vector<32x33xf32>
      %110 = tpu.matmul %109, %107, %cst_107 {dimension_numbers = #tpu.dot_dimension_numbers<[1], [0], [0], [1], [0, 0, 1, 1], [], []>} : vector<32x96xbf16>, vector<96x33xbf16>, vector<32x33xf32> -> vector<32x33xf32>
      %111 = arith.addf %98, %110 : vector<32x33xf32>
      %c2_i32_108 = arith.constant 2 : i32
      %112 = arith.muli %arg27, %c2_i32_108 : i32
      %c5_i32 = arith.constant 5 : i32
      %113 = arith.addi %112, %c5_i32 : i32
      %114 = arith.index_cast %113 : i32 to index
      %c0_109 = arith.constant 0 : index
      %c0_110 = arith.constant 0 : index
      %115 = vector.load %arg23[%114, %c0_109, %c0_110] : memref<16x32x128xbf16, #tpu.memory_space<vmem>>, vector<1x32x128xbf16>
      %116 = vector.shape_cast %115 : vector<1x32x128xbf16> to vector<32x128xbf16>
      %117 = vector.extract_strided_slice %116 {offsets = [0, 0], sizes = [32, 33], strides = [1, 1]} : vector<32x128xbf16> to vector<32x33xbf16>
      %118 = vector.extract_strided_slice %116 {offsets = [0, 1], sizes = [32, 33], strides = [1, 1]} : vector<32x128xbf16> to vector<32x33xbf16>
      %119 = vector.extract_strided_slice %116 {offsets = [0, 2], sizes = [32, 33], strides = [1, 1]} : vector<32x128xbf16> to vector<32x33xbf16>
      %120 = tpu.concatenate %117, %118, %119 in 0 : vector<32x33xbf16>, vector<32x33xbf16>, vector<32x33xbf16> -> vector<96x33xbf16>
      %c5 = arith.constant 5 : index
      %c0_111 = arith.constant 0 : index
      %c0_112 = arith.constant 0 : index
      %121 = vector.load %arg7[%c5, %c0_111, %c0_112] : memref<9x32x96xbf16, #tpu.memory_space<vmem>>, vector<1x32x96xbf16>
      %122 = vector.shape_cast %121 : vector<1x32x96xbf16> to vector<32x96xbf16>
      %cst_113 = arith.constant dense<0.000000e+00> : vector<32x33xf32>
      %123 = tpu.matmul %122, %120, %cst_113 {dimension_numbers = #tpu.dot_dimension_numbers<[1], [0], [0], [1], [0, 0, 1, 1], [], []>} : vector<32x96xbf16>, vector<96x33xbf16>, vector<32x33xf32> -> vector<32x33xf32>
      %124 = arith.addf %111, %123 : vector<32x33xf32>
      %c2_i32_114 = arith.constant 2 : i32
      %125 = arith.muli %arg27, %c2_i32_114 : i32
      %c6_i32 = arith.constant 6 : i32
      %126 = arith.addi %125, %c6_i32 : i32
      %127 = arith.index_cast %126 : i32 to index
      %c0_115 = arith.constant 0 : index
      %c0_116 = arith.constant 0 : index
      %128 = vector.load %arg23[%127, %c0_115, %c0_116] : memref<16x32x128xbf16, #tpu.memory_space<vmem>>, vector<1x32x128xbf16>
      %129 = vector.shape_cast %128 : vector<1x32x128xbf16> to vector<32x128xbf16>
      %130 = vector.extract_strided_slice %129 {offsets = [0, 0], sizes = [32, 33], strides = [1, 1]} : vector<32x128xbf16> to vector<32x33xbf16>
      %131 = vector.extract_strided_slice %129 {offsets = [0, 1], sizes = [32, 33], strides = [1, 1]} : vector<32x128xbf16> to vector<32x33xbf16>
      %132 = vector.extract_strided_slice %129 {offsets = [0, 2], sizes = [32, 33], strides = [1, 1]} : vector<32x128xbf16> to vector<32x33xbf16>
      %133 = tpu.concatenate %130, %131, %132 in 0 : vector<32x33xbf16>, vector<32x33xbf16>, vector<32x33xbf16> -> vector<96x33xbf16>
      %c6 = arith.constant 6 : index
      %c0_117 = arith.constant 0 : index
      %c0_118 = arith.constant 0 : index
      %134 = vector.load %arg7[%c6, %c0_117, %c0_118] : memref<9x32x96xbf16, #tpu.memory_space<vmem>>, vector<1x32x96xbf16>
      %135 = vector.shape_cast %134 : vector<1x32x96xbf16> to vector<32x96xbf16>
      %cst_119 = arith.constant dense<0.000000e+00> : vector<32x33xf32>
      %136 = tpu.matmul %135, %133, %cst_119 {dimension_numbers = #tpu.dot_dimension_numbers<[1], [0], [0], [1], [0, 0, 1, 1], [], []>} : vector<32x96xbf16>, vector<96x33xbf16>, vector<32x33xf32> -> vector<32x33xf32>
      %137 = arith.addf %124, %136 : vector<32x33xf32>
      %c2_i32_120 = arith.constant 2 : i32
      %138 = arith.muli %arg27, %c2_i32_120 : i32
      %c7_i32 = arith.constant 7 : i32
      %139 = arith.addi %138, %c7_i32 : i32
      %140 = arith.index_cast %139 : i32 to index
      %c0_121 = arith.constant 0 : index
      %c0_122 = arith.constant 0 : index
      %141 = vector.load %arg23[%140, %c0_121, %c0_122] : memref<16x32x128xbf16, #tpu.memory_space<vmem>>, vector<1x32x128xbf16>
      %142 = vector.shape_cast %141 : vector<1x32x128xbf16> to vector<32x128xbf16>
      %143 = vector.extract_strided_slice %142 {offsets = [0, 0], sizes = [32, 33], strides = [1, 1]} : vector<32x128xbf16> to vector<32x33xbf16>
      %144 = vector.extract_strided_slice %142 {offsets = [0, 1], sizes = [32, 33], strides = [1, 1]} : vector<32x128xbf16> to vector<32x33xbf16>
      %145 = vector.extract_strided_slice %142 {offsets = [0, 2], sizes = [32, 33], strides = [1, 1]} : vector<32x128xbf16> to vector<32x33xbf16>
      %146 = tpu.concatenate %143, %144, %145 in 0 : vector<32x33xbf16>, vector<32x33xbf16>, vector<32x33xbf16> -> vector<96x33xbf16>
      %c7 = arith.constant 7 : index
      %c0_123 = arith.constant 0 : index
      %c0_124 = arith.constant 0 : index
      %147 = vector.load %arg7[%c7, %c0_123, %c0_124] : memref<9x32x96xbf16, #tpu.memory_space<vmem>>, vector<1x32x96xbf16>
      %148 = vector.shape_cast %147 : vector<1x32x96xbf16> to vector<32x96xbf16>
      %cst_125 = arith.constant dense<0.000000e+00> : vector<32x33xf32>
      %149 = tpu.matmul %148, %146, %cst_125 {dimension_numbers = #tpu.dot_dimension_numbers<[1], [0], [0], [1], [0, 0, 1, 1], [], []>} : vector<32x96xbf16>, vector<96x33xbf16>, vector<32x33xf32> -> vector<32x33xf32>
      %150 = arith.addf %137, %149 : vector<32x33xf32>
      %c2_i32_126 = arith.constant 2 : i32
      %151 = arith.muli %arg27, %c2_i32_126 : i32
      %c8_i32_127 = arith.constant 8 : i32
      %152 = arith.addi %151, %c8_i32_127 : i32
      %153 = arith.index_cast %152 : i32 to index
      %c0_128 = arith.constant 0 : index
      %c0_129 = arith.constant 0 : index
      %154 = vector.load %arg23[%153, %c0_128, %c0_129] : memref<16x32x128xbf16, #tpu.memory_space<vmem>>, vector<1x32x128xbf16>
      %155 = vector.shape_cast %154 : vector<1x32x128xbf16> to vector<32x128xbf16>
      %156 = vector.extract_strided_slice %155 {offsets = [0, 0], sizes = [32, 33], strides = [1, 1]} : vector<32x128xbf16> to vector<32x33xbf16>
      %157 = vector.extract_strided_slice %155 {offsets = [0, 1], sizes = [32, 33], strides = [1, 1]} : vector<32x128xbf16> to vector<32x33xbf16>
      %158 = vector.extract_strided_slice %155 {offsets = [0, 2], sizes = [32, 33], strides = [1, 1]} : vector<32x128xbf16> to vector<32x33xbf16>
      %159 = tpu.concatenate %156, %157, %158 in 0 : vector<32x33xbf16>, vector<32x33xbf16>, vector<32x33xbf16> -> vector<96x33xbf16>
      %c8_130 = arith.constant 8 : index
      %c0_131 = arith.constant 0 : index
      %c0_132 = arith.constant 0 : index
      %160 = vector.load %arg7[%c8_130, %c0_131, %c0_132] : memref<9x32x96xbf16, #tpu.memory_space<vmem>>, vector<1x32x96xbf16>
      %161 = vector.shape_cast %160 : vector<1x32x96xbf16> to vector<32x96xbf16>
      %cst_133 = arith.constant dense<0.000000e+00> : vector<32x33xf32>
      %162 = tpu.matmul %161, %159, %cst_133 {dimension_numbers = #tpu.dot_dimension_numbers<[1], [0], [0], [1], [0, 0, 1, 1], [], []>} : vector<32x96xbf16>, vector<96x33xbf16>, vector<32x33xf32> -> vector<32x33xf32>
      %163 = arith.addf %150, %162 : vector<32x33xf32>
      %c0_134 = arith.constant 0 : index
      %c0_135 = arith.constant 0 : index
      %164 = vector.load %arg8[%c0_134, %c0_135] : memref<32x1xf32, #tpu.memory_space<vmem>>, vector<32x1xf32>
      %165 = vector.broadcast %164 : vector<32x1xf32> to vector<32x33xf32>
      %166 = arith.addf %163, %165 : vector<32x33xf32>
      %cst_136 = arith.constant 0.000000e+00 : f32
      %167 = vector.broadcast %cst_136 : f32 to vector<32x33xf32>
      %168 = arith.cmpf oge, %166, %167 : vector<32x33xf32>
      %cst_137 = arith.constant 1.000000e-01 : f32
      %169 = vector.broadcast %cst_137 : f32 to vector<32x33xf32>
      %170 = arith.mulf %169, %166 : vector<32x33xf32>
      %171 = arith.select %168, %166, %170 : vector<32x33xi1>, vector<32x33xf32>
      %c0_138 = arith.constant 0 : index
      %172 = arith.index_cast %arg27 : i32 to index
      %c0_139 = arith.constant 0 : index
      %c0_140 = arith.constant 0 : index
      %173 = vector.load %arg17[%c0_138, %172, %c0_139, %c0_140] : memref<1x4x32x33xf32, #tpu.memory_space<vmem>>, vector<1x1x32x33xf32>
      %174 = vector.shape_cast %173 : vector<1x1x32x33xf32> to vector<32x33xf32>
      %175 = vector.shape_cast %171 : vector<32x33xf32> to vector<1x1x32x33xf32>
      tpu.vector_store %arg17[%c0_138, %172, %c0_139, %c0_140], %175 {strides = array<i32>} : memref<1x4x32x33xf32, #tpu.memory_space<vmem>>, vector<1x1x32x33xf32>,
      %176 = tpu.concatenate %31, %171, %31 in 1 : vector<32x1xf32>, vector<32x33xf32>, vector<32x1xf32> -> vector<32x35xf32>
      %177 = arith.truncf %176 : vector<32x35xf32> to vector<32x35xbf16>
      %c4_i32_141 = arith.constant 4 : i32
      %178 = arith.addi %arg27, %c4_i32_141 : i32
      %179 = arith.index_cast %178 : i32 to index
      %c0_142 = arith.constant 0 : index
      %c0_143 = arith.constant 0 : index
      %180 = vector.load %arg24[%179, %c0_142, %c0_143] : memref<12x32x128xbf16, #tpu.memory_space<vmem>>, vector<1x32x35xbf16>
      %181 = vector.shape_cast %180 : vector<1x32x35xbf16> to vector<32x35xbf16>
      %182 = vector.shape_cast %177 : vector<32x35xbf16> to vector<1x32x35xbf16>
      tpu.vector_store %arg24[%179, %c0_142, %c0_143], %182 {strides = array<i32>} : memref<12x32x128xbf16, #tpu.memory_space<vmem>>, vector<1x32x35xbf16>,
    }
    %c4_i32_41 = arith.constant 4 : i32
    %cst_42 = arith.constant 0.000000e+00 : bf16
    %33 = vector.broadcast %cst_42 : bf16 to vector<1x32x128xbf16>
    %c0_43 = arith.constant 0 : index
    %c0_44 = arith.constant 0 : index
    %c0_45 = arith.constant 0 : index
    %34 = vector.load %arg25[%c0_43, %c0_44, %c0_45] : memref<4x32x128xbf16, #tpu.memory_space<vmem>>, vector<1x32x128xbf16>
    tpu.vector_store %arg25[%c0_43, %c0_44, %c0_45], %33 {strides = array<i32>} : memref<4x32x128xbf16, #tpu.memory_space<vmem>>, vector<1x32x128xbf16>,
    %cst_46 = arith.constant 0.000000e+00 : bf16
    %35 = vector.broadcast %cst_46 : bf16 to vector<1x32x128xbf16>
    %c3 = arith.constant 3 : index
    %c0_47 = arith.constant 0 : index
    %c0_48 = arith.constant 0 : index
    %36 = vector.load %arg25[%c3, %c0_47, %c0_48] : memref<4x32x128xbf16, #tpu.memory_space<vmem>>, vector<1x32x128xbf16>
    tpu.vector_store %arg25[%c3, %c0_47, %c0_48], %35 {strides = array<i32>} : memref<4x32x128xbf16, #tpu.memory_space<vmem>>, vector<1x32x128xbf16>,
    %cst_49 = arith.constant 0.000000e+00 : f32
    %37 = vector.broadcast %cst_49 : f32 to vector<32x1xf32>
    %c0_i32_50 = arith.constant 0 : i32
    %c2_i32 = arith.constant 2 : i32
    %38 = arith.addi %c0_i32_50, %c2_i32 : i32
    %c1_i32_51 = arith.constant 1 : i32
    scf.for %arg27 = %c0_i32_50 to %38 step %c1_i32_51  : i32 {
      %cst_70 = arith.constant 0.000000e+00 : f32
      %46 = vector.broadcast %cst_70 : f32 to vector<32x33xf32>
      %c2_i32_71 = arith.constant 2 : i32
      %47 = arith.muli %arg27, %c2_i32_71 : i32
      %c0_i32_72 = arith.constant 0 : i32
      %48 = arith.addi %47, %c0_i32_72 : i32
      %49 = arith.index_cast %48 : i32 to index
      %c0_73 = arith.constant 0 : index
      %c0_74 = arith.constant 0 : index
      %50 = vector.load %arg24[%49, %c0_73, %c0_74] : memref<12x32x128xbf16, #tpu.memory_space<vmem>>, vector<1x32x128xbf16>
      %51 = vector.shape_cast %50 : vector<1x32x128xbf16> to vector<32x128xbf16>
      %52 = vector.extract_strided_slice %51 {offsets = [0, 0], sizes = [32, 33], strides = [1, 1]} : vector<32x128xbf16> to vector<32x33xbf16>
      %53 = vector.extract_strided_slice %51 {offsets = [0, 1], sizes = [32, 33], strides = [1, 1]} : vector<32x128xbf16> to vector<32x33xbf16>
      %54 = vector.extract_strided_slice %51 {offsets = [0, 2], sizes = [32, 33], strides = [1, 1]} : vector<32x128xbf16> to vector<32x33xbf16>
      %55 = tpu.concatenate %52, %53, %54 in 0 : vector<32x33xbf16>, vector<32x33xbf16>, vector<32x33xbf16> -> vector<96x33xbf16>
      %c0_75 = arith.constant 0 : index
      %c0_76 = arith.constant 0 : index
      %c0_77 = arith.constant 0 : index
      %56 = vector.load %arg9[%c0_75, %c0_76, %c0_77] : memref<9x32x96xbf16, #tpu.memory_space<vmem>>, vector<1x32x96xbf16>
      %57 = vector.shape_cast %56 : vector<1x32x96xbf16> to vector<32x96xbf16>
      %cst_78 = arith.constant dense<0.000000e+00> : vector<32x33xf32>
      %58 = tpu.matmul %57, %55, %cst_78 {dimension_numbers = #tpu.dot_dimension_numbers<[1], [0], [0], [1], [0, 0, 1, 1], [], []>} : vector<32x96xbf16>, vector<96x33xbf16>, vector<32x33xf32> -> vector<32x33xf32>
      %59 = arith.addf %46, %58 : vector<32x33xf32>
      %c2_i32_79 = arith.constant 2 : i32
      %60 = arith.muli %arg27, %c2_i32_79 : i32
      %c1_i32_80 = arith.constant 1 : i32
      %61 = arith.addi %60, %c1_i32_80 : i32
      %62 = arith.index_cast %61 : i32 to index
      %c0_81 = arith.constant 0 : index
      %c0_82 = arith.constant 0 : index
      %63 = vector.load %arg24[%62, %c0_81, %c0_82] : memref<12x32x128xbf16, #tpu.memory_space<vmem>>, vector<1x32x128xbf16>
      %64 = vector.shape_cast %63 : vector<1x32x128xbf16> to vector<32x128xbf16>
      %65 = vector.extract_strided_slice %64 {offsets = [0, 0], sizes = [32, 33], strides = [1, 1]} : vector<32x128xbf16> to vector<32x33xbf16>
      %66 = vector.extract_strided_slice %64 {offsets = [0, 1], sizes = [32, 33], strides = [1, 1]} : vector<32x128xbf16> to vector<32x33xbf16>
      %67 = vector.extract_strided_slice %64 {offsets = [0, 2], sizes = [32, 33], strides = [1, 1]} : vector<32x128xbf16> to vector<32x33xbf16>
      %68 = tpu.concatenate %65, %66, %67 in 0 : vector<32x33xbf16>, vector<32x33xbf16>, vector<32x33xbf16> -> vector<96x33xbf16>
      %c1 = arith.constant 1 : index
      %c0_83 = arith.constant 0 : index
      %c0_84 = arith.constant 0 : index
      %69 = vector.load %arg9[%c1, %c0_83, %c0_84] : memref<9x32x96xbf16, #tpu.memory_space<vmem>>, vector<1x32x96xbf16>
      %70 = vector.shape_cast %69 : vector<1x32x96xbf16> to vector<32x96xbf16>
      %cst_85 = arith.constant dense<0.000000e+00> : vector<32x33xf32>
      %71 = tpu.matmul %70, %68, %cst_85 {dimension_numbers = #tpu.dot_dimension_numbers<[1], [0], [0], [1], [0, 0, 1, 1], [], []>} : vector<32x96xbf16>, vector<96x33xbf16>, vector<32x33xf32> -> vector<32x33xf32>
      %72 = arith.addf %59, %71 : vector<32x33xf32>
      %c2_i32_86 = arith.constant 2 : i32
      %73 = arith.muli %arg27, %c2_i32_86 : i32
      %c2_i32_87 = arith.constant 2 : i32
      %74 = arith.addi %73, %c2_i32_87 : i32
      %75 = arith.index_cast %74 : i32 to index
      %c0_88 = arith.constant 0 : index
      %c0_89 = arith.constant 0 : index
      %76 = vector.load %arg24[%75, %c0_88, %c0_89] : memref<12x32x128xbf16, #tpu.memory_space<vmem>>, vector<1x32x128xbf16>
      %77 = vector.shape_cast %76 : vector<1x32x128xbf16> to vector<32x128xbf16>
      %78 = vector.extract_strided_slice %77 {offsets = [0, 0], sizes = [32, 33], strides = [1, 1]} : vector<32x128xbf16> to vector<32x33xbf16>
      %79 = vector.extract_strided_slice %77 {offsets = [0, 1], sizes = [32, 33], strides = [1, 1]} : vector<32x128xbf16> to vector<32x33xbf16>
      %80 = vector.extract_strided_slice %77 {offsets = [0, 2], sizes = [32, 33], strides = [1, 1]} : vector<32x128xbf16> to vector<32x33xbf16>
      %81 = tpu.concatenate %78, %79, %80 in 0 : vector<32x33xbf16>, vector<32x33xbf16>, vector<32x33xbf16> -> vector<96x33xbf16>
      %c2 = arith.constant 2 : index
      %c0_90 = arith.constant 0 : index
      %c0_91 = arith.constant 0 : index
      %82 = vector.load %arg9[%c2, %c0_90, %c0_91] : memref<9x32x96xbf16, #tpu.memory_space<vmem>>, vector<1x32x96xbf16>
      %83 = vector.shape_cast %82 : vector<1x32x96xbf16> to vector<32x96xbf16>
      %cst_92 = arith.constant dense<0.000000e+00> : vector<32x33xf32>
      %84 = tpu.matmul %83, %81, %cst_92 {dimension_numbers = #tpu.dot_dimension_numbers<[1], [0], [0], [1], [0, 0, 1, 1], [], []>} : vector<32x96xbf16>, vector<96x33xbf16>, vector<32x33xf32> -> vector<32x33xf32>
      %85 = arith.addf %72, %84 : vector<32x33xf32>
      %c2_i32_93 = arith.constant 2 : i32
      %86 = arith.muli %arg27, %c2_i32_93 : i32
      %c3_i32 = arith.constant 3 : i32
      %87 = arith.addi %86, %c3_i32 : i32
      %88 = arith.index_cast %87 : i32 to index
      %c0_94 = arith.constant 0 : index
      %c0_95 = arith.constant 0 : index
      %89 = vector.load %arg24[%88, %c0_94, %c0_95] : memref<12x32x128xbf16, #tpu.memory_space<vmem>>, vector<1x32x128xbf16>
      %90 = vector.shape_cast %89 : vector<1x32x128xbf16> to vector<32x128xbf16>
      %91 = vector.extract_strided_slice %90 {offsets = [0, 0], sizes = [32, 33], strides = [1, 1]} : vector<32x128xbf16> to vector<32x33xbf16>
      %92 = vector.extract_strided_slice %90 {offsets = [0, 1], sizes = [32, 33], strides = [1, 1]} : vector<32x128xbf16> to vector<32x33xbf16>
      %93 = vector.extract_strided_slice %90 {offsets = [0, 2], sizes = [32, 33], strides = [1, 1]} : vector<32x128xbf16> to vector<32x33xbf16>
      %94 = tpu.concatenate %91, %92, %93 in 0 : vector<32x33xbf16>, vector<32x33xbf16>, vector<32x33xbf16> -> vector<96x33xbf16>
      %c3_96 = arith.constant 3 : index
      %c0_97 = arith.constant 0 : index
      %c0_98 = arith.constant 0 : index
      %95 = vector.load %arg9[%c3_96, %c0_97, %c0_98] : memref<9x32x96xbf16, #tpu.memory_space<vmem>>, vector<1x32x96xbf16>
      %96 = vector.shape_cast %95 : vector<1x32x96xbf16> to vector<32x96xbf16>
      %cst_99 = arith.constant dense<0.000000e+00> : vector<32x33xf32>
      %97 = tpu.matmul %96, %94, %cst_99 {dimension_numbers = #tpu.dot_dimension_numbers<[1], [0], [0], [1], [0, 0, 1, 1], [], []>} : vector<32x96xbf16>, vector<96x33xbf16>, vector<32x33xf32> -> vector<32x33xf32>
      %98 = arith.addf %85, %97 : vector<32x33xf32>
      %c2_i32_100 = arith.constant 2 : i32
      %99 = arith.muli %arg27, %c2_i32_100 : i32
      %c4_i32_101 = arith.constant 4 : i32
      %100 = arith.addi %99, %c4_i32_101 : i32
      %101 = arith.index_cast %100 : i32 to index
      %c0_102 = arith.constant 0 : index
      %c0_103 = arith.constant 0 : index
      %102 = vector.load %arg24[%101, %c0_102, %c0_103] : memref<12x32x128xbf16, #tpu.memory_space<vmem>>, vector<1x32x128xbf16>
      %103 = vector.shape_cast %102 : vector<1x32x128xbf16> to vector<32x128xbf16>
      %104 = vector.extract_strided_slice %103 {offsets = [0, 0], sizes = [32, 33], strides = [1, 1]} : vector<32x128xbf16> to vector<32x33xbf16>
      %105 = vector.extract_strided_slice %103 {offsets = [0, 1], sizes = [32, 33], strides = [1, 1]} : vector<32x128xbf16> to vector<32x33xbf16>
      %106 = vector.extract_strided_slice %103 {offsets = [0, 2], sizes = [32, 33], strides = [1, 1]} : vector<32x128xbf16> to vector<32x33xbf16>
      %107 = tpu.concatenate %104, %105, %106 in 0 : vector<32x33xbf16>, vector<32x33xbf16>, vector<32x33xbf16> -> vector<96x33xbf16>
      %c4_104 = arith.constant 4 : index
      %c0_105 = arith.constant 0 : index
      %c0_106 = arith.constant 0 : index
      %108 = vector.load %arg9[%c4_104, %c0_105, %c0_106] : memref<9x32x96xbf16, #tpu.memory_space<vmem>>, vector<1x32x96xbf16>
      %109 = vector.shape_cast %108 : vector<1x32x96xbf16> to vector<32x96xbf16>
      %cst_107 = arith.constant dense<0.000000e+00> : vector<32x33xf32>
      %110 = tpu.matmul %109, %107, %cst_107 {dimension_numbers = #tpu.dot_dimension_numbers<[1], [0], [0], [1], [0, 0, 1, 1], [], []>} : vector<32x96xbf16>, vector<96x33xbf16>, vector<32x33xf32> -> vector<32x33xf32>
      %111 = arith.addf %98, %110 : vector<32x33xf32>
      %c2_i32_108 = arith.constant 2 : i32
      %112 = arith.muli %arg27, %c2_i32_108 : i32
      %c5_i32 = arith.constant 5 : i32
      %113 = arith.addi %112, %c5_i32 : i32
      %114 = arith.index_cast %113 : i32 to index
      %c0_109 = arith.constant 0 : index
      %c0_110 = arith.constant 0 : index
      %115 = vector.load %arg24[%114, %c0_109, %c0_110] : memref<12x32x128xbf16, #tpu.memory_space<vmem>>, vector<1x32x128xbf16>
      %116 = vector.shape_cast %115 : vector<1x32x128xbf16> to vector<32x128xbf16>
      %117 = vector.extract_strided_slice %116 {offsets = [0, 0], sizes = [32, 33], strides = [1, 1]} : vector<32x128xbf16> to vector<32x33xbf16>
      %118 = vector.extract_strided_slice %116 {offsets = [0, 1], sizes = [32, 33], strides = [1, 1]} : vector<32x128xbf16> to vector<32x33xbf16>
      %119 = vector.extract_strided_slice %116 {offsets = [0, 2], sizes = [32, 33], strides = [1, 1]} : vector<32x128xbf16> to vector<32x33xbf16>
      %120 = tpu.concatenate %117, %118, %119 in 0 : vector<32x33xbf16>, vector<32x33xbf16>, vector<32x33xbf16> -> vector<96x33xbf16>
      %c5 = arith.constant 5 : index
      %c0_111 = arith.constant 0 : index
      %c0_112 = arith.constant 0 : index
      %121 = vector.load %arg9[%c5, %c0_111, %c0_112] : memref<9x32x96xbf16, #tpu.memory_space<vmem>>, vector<1x32x96xbf16>
      %122 = vector.shape_cast %121 : vector<1x32x96xbf16> to vector<32x96xbf16>
      %cst_113 = arith.constant dense<0.000000e+00> : vector<32x33xf32>
      %123 = tpu.matmul %122, %120, %cst_113 {dimension_numbers = #tpu.dot_dimension_numbers<[1], [0], [0], [1], [0, 0, 1, 1], [], []>} : vector<32x96xbf16>, vector<96x33xbf16>, vector<32x33xf32> -> vector<32x33xf32>
      %124 = arith.addf %111, %123 : vector<32x33xf32>
      %c2_i32_114 = arith.constant 2 : i32
      %125 = arith.muli %arg27, %c2_i32_114 : i32
      %c6_i32 = arith.constant 6 : i32
      %126 = arith.addi %125, %c6_i32 : i32
      %127 = arith.index_cast %126 : i32 to index
      %c0_115 = arith.constant 0 : index
      %c0_116 = arith.constant 0 : index
      %128 = vector.load %arg24[%127, %c0_115, %c0_116] : memref<12x32x128xbf16, #tpu.memory_space<vmem>>, vector<1x32x128xbf16>
      %129 = vector.shape_cast %128 : vector<1x32x128xbf16> to vector<32x128xbf16>
      %130 = vector.extract_strided_slice %129 {offsets = [0, 0], sizes = [32, 33], strides = [1, 1]} : vector<32x128xbf16> to vector<32x33xbf16>
      %131 = vector.extract_strided_slice %129 {offsets = [0, 1], sizes = [32, 33], strides = [1, 1]} : vector<32x128xbf16> to vector<32x33xbf16>
      %132 = vector.extract_strided_slice %129 {offsets = [0, 2], sizes = [32, 33], strides = [1, 1]} : vector<32x128xbf16> to vector<32x33xbf16>
      %133 = tpu.concatenate %130, %131, %132 in 0 : vector<32x33xbf16>, vector<32x33xbf16>, vector<32x33xbf16> -> vector<96x33xbf16>
      %c6 = arith.constant 6 : index
      %c0_117 = arith.constant 0 : index
      %c0_118 = arith.constant 0 : index
      %134 = vector.load %arg9[%c6, %c0_117, %c0_118] : memref<9x32x96xbf16, #tpu.memory_space<vmem>>, vector<1x32x96xbf16>
      %135 = vector.shape_cast %134 : vector<1x32x96xbf16> to vector<32x96xbf16>
      %cst_119 = arith.constant dense<0.000000e+00> : vector<32x33xf32>
      %136 = tpu.matmul %135, %133, %cst_119 {dimension_numbers = #tpu.dot_dimension_numbers<[1], [0], [0], [1], [0, 0, 1, 1], [], []>} : vector<32x96xbf16>, vector<96x33xbf16>, vector<32x33xf32> -> vector<32x33xf32>
      %137 = arith.addf %124, %136 : vector<32x33xf32>
      %c2_i32_120 = arith.constant 2 : i32
      %138 = arith.muli %arg27, %c2_i32_120 : i32
      %c7_i32 = arith.constant 7 : i32
      %139 = arith.addi %138, %c7_i32 : i32
      %140 = arith.index_cast %139 : i32 to index
      %c0_121 = arith.constant 0 : index
      %c0_122 = arith.constant 0 : index
      %141 = vector.load %arg24[%140, %c0_121, %c0_122] : memref<12x32x128xbf16, #tpu.memory_space<vmem>>, vector<1x32x128xbf16>
      %142 = vector.shape_cast %141 : vector<1x32x128xbf16> to vector<32x128xbf16>
      %143 = vector.extract_strided_slice %142 {offsets = [0, 0], sizes = [32, 33], strides = [1, 1]} : vector<32x128xbf16> to vector<32x33xbf16>
      %144 = vector.extract_strided_slice %142 {offsets = [0, 1], sizes = [32, 33], strides = [1, 1]} : vector<32x128xbf16> to vector<32x33xbf16>
      %145 = vector.extract_strided_slice %142 {offsets = [0, 2], sizes = [32, 33], strides = [1, 1]} : vector<32x128xbf16> to vector<32x33xbf16>
      %146 = tpu.concatenate %143, %144, %145 in 0 : vector<32x33xbf16>, vector<32x33xbf16>, vector<32x33xbf16> -> vector<96x33xbf16>
      %c7 = arith.constant 7 : index
      %c0_123 = arith.constant 0 : index
      %c0_124 = arith.constant 0 : index
      %147 = vector.load %arg9[%c7, %c0_123, %c0_124] : memref<9x32x96xbf16, #tpu.memory_space<vmem>>, vector<1x32x96xbf16>
      %148 = vector.shape_cast %147 : vector<1x32x96xbf16> to vector<32x96xbf16>
      %cst_125 = arith.constant dense<0.000000e+00> : vector<32x33xf32>
      %149 = tpu.matmul %148, %146, %cst_125 {dimension_numbers = #tpu.dot_dimension_numbers<[1], [0], [0], [1], [0, 0, 1, 1], [], []>} : vector<32x96xbf16>, vector<96x33xbf16>, vector<32x33xf32> -> vector<32x33xf32>
      %150 = arith.addf %137, %149 : vector<32x33xf32>
      %c2_i32_126 = arith.constant 2 : i32
      %151 = arith.muli %arg27, %c2_i32_126 : i32
      %c8_i32_127 = arith.constant 8 : i32
      %152 = arith.addi %151, %c8_i32_127 : i32
      %153 = arith.index_cast %152 : i32 to index
      %c0_128 = arith.constant 0 : index
      %c0_129 = arith.constant 0 : index
      %154 = vector.load %arg24[%153, %c0_128, %c0_129] : memref<12x32x128xbf16, #tpu.memory_space<vmem>>, vector<1x32x128xbf16>
      %155 = vector.shape_cast %154 : vector<1x32x128xbf16> to vector<32x128xbf16>
      %156 = vector.extract_strided_slice %155 {offsets = [0, 0], sizes = [32, 33], strides = [1, 1]} : vector<32x128xbf16> to vector<32x33xbf16>
      %157 = vector.extract_strided_slice %155 {offsets = [0, 1], sizes = [32, 33], strides = [1, 1]} : vector<32x128xbf16> to vector<32x33xbf16>
      %158 = vector.extract_strided_slice %155 {offsets = [0, 2], sizes = [32, 33], strides = [1, 1]} : vector<32x128xbf16> to vector<32x33xbf16>
      %159 = tpu.concatenate %156, %157, %158 in 0 : vector<32x33xbf16>, vector<32x33xbf16>, vector<32x33xbf16> -> vector<96x33xbf16>
      %c8_130 = arith.constant 8 : index
      %c0_131 = arith.constant 0 : index
      %c0_132 = arith.constant 0 : index
      %160 = vector.load %arg9[%c8_130, %c0_131, %c0_132] : memref<9x32x96xbf16, #tpu.memory_space<vmem>>, vector<1x32x96xbf16>
      %161 = vector.shape_cast %160 : vector<1x32x96xbf16> to vector<32x96xbf16>
      %cst_133 = arith.constant dense<0.000000e+00> : vector<32x33xf32>
      %162 = tpu.matmul %161, %159, %cst_133 {dimension_numbers = #tpu.dot_dimension_numbers<[1], [0], [0], [1], [0, 0, 1, 1], [], []>} : vector<32x96xbf16>, vector<96x33xbf16>, vector<32x33xf32> -> vector<32x33xf32>
      %163 = arith.addf %150, %162 : vector<32x33xf32>
      %c0_134 = arith.constant 0 : index
      %c0_135 = arith.constant 0 : index
      %164 = vector.load %arg10[%c0_134, %c0_135] : memref<32x1xf32, #tpu.memory_space<vmem>>, vector<32x1xf32>
      %165 = vector.broadcast %164 : vector<32x1xf32> to vector<32x33xf32>
      %166 = arith.addf %163, %165 : vector<32x33xf32>
      %cst_136 = arith.constant 0.000000e+00 : f32
      %167 = vector.broadcast %cst_136 : f32 to vector<32x33xf32>
      %168 = arith.cmpf oge, %166, %167 : vector<32x33xf32>
      %cst_137 = arith.constant 1.000000e-01 : f32
      %169 = vector.broadcast %cst_137 : f32 to vector<32x33xf32>
      %170 = arith.mulf %169, %166 : vector<32x33xf32>
      %171 = arith.select %168, %166, %170 : vector<32x33xi1>, vector<32x33xf32>
      %c0_138 = arith.constant 0 : index
      %172 = arith.index_cast %arg27 : i32 to index
      %c0_139 = arith.constant 0 : index
      %c0_140 = arith.constant 0 : index
      %173 = vector.load %arg18[%c0_138, %172, %c0_139, %c0_140] : memref<1x2x32x33xf32, #tpu.memory_space<vmem>>, vector<1x1x32x33xf32>
      %174 = vector.shape_cast %173 : vector<1x1x32x33xf32> to vector<32x33xf32>
      %175 = vector.shape_cast %171 : vector<32x33xf32> to vector<1x1x32x33xf32>
      tpu.vector_store %arg18[%c0_138, %172, %c0_139, %c0_140], %175 {strides = array<i32>} : memref<1x2x32x33xf32, #tpu.memory_space<vmem>>, vector<1x1x32x33xf32>,
      %176 = tpu.concatenate %37, %171, %37 in 1 : vector<32x1xf32>, vector<32x33xf32>, vector<32x1xf32> -> vector<32x35xf32>
      %177 = arith.truncf %176 : vector<32x35xf32> to vector<32x35xbf16>
      %c1_i32_141 = arith.constant 1 : i32
      %178 = arith.addi %arg27, %c1_i32_141 : i32
      %179 = arith.index_cast %178 : i32 to index
      %c0_142 = arith.constant 0 : index
      %c0_143 = arith.constant 0 : index
      %180 = vector.load %arg25[%179, %c0_142, %c0_143] : memref<4x32x128xbf16, #tpu.memory_space<vmem>>, vector<1x32x35xbf16>
      %181 = vector.shape_cast %180 : vector<1x32x35xbf16> to vector<32x35xbf16>
      %182 = vector.shape_cast %177 : vector<32x35xbf16> to vector<1x32x35xbf16>
      tpu.vector_store %arg25[%179, %c0_142, %c0_143], %182 {strides = array<i32>} : memref<4x32x128xbf16, #tpu.memory_space<vmem>>, vector<1x32x35xbf16>,
    }
    %c2_i32_52 = arith.constant 2 : i32
    %cst_53 = arith.constant 0.000000e+00 : bf16
    %39 = vector.broadcast %cst_53 : bf16 to vector<1x32x128xbf16>
    %c0_54 = arith.constant 0 : index
    %c0_55 = arith.constant 0 : index
    %c0_56 = arith.constant 0 : index
    %40 = vector.load %arg26[%c0_54, %c0_55, %c0_56] : memref<4x32x128xbf16, #tpu.memory_space<vmem>>, vector<1x32x128xbf16>
    tpu.vector_store %arg26[%c0_54, %c0_55, %c0_56], %39 {strides = array<i32>} : memref<4x32x128xbf16, #tpu.memory_space<vmem>>, vector<1x32x128xbf16>,
    %cst_57 = arith.constant 0.000000e+00 : bf16
    %41 = vector.broadcast %cst_57 : bf16 to vector<1x32x128xbf16>
    %c3_58 = arith.constant 3 : index
    %c0_59 = arith.constant 0 : index
    %c0_60 = arith.constant 0 : index
    %42 = vector.load %arg26[%c3_58, %c0_59, %c0_60] : memref<4x32x128xbf16, #tpu.memory_space<vmem>>, vector<1x32x128xbf16>
    tpu.vector_store %arg26[%c3_58, %c0_59, %c0_60], %41 {strides = array<i32>} : memref<4x32x128xbf16, #tpu.memory_space<vmem>>, vector<1x32x128xbf16>,
    %cst_61 = arith.constant 0.000000e+00 : f32
    %43 = vector.broadcast %cst_61 : f32 to vector<32x1xf32>
    %c0_i32_62 = arith.constant 0 : i32
    %c2_i32_63 = arith.constant 2 : i32
    %44 = arith.addi %c0_i32_62, %c2_i32_63 : i32
    %c1_i32_64 = arith.constant 1 : i32
    scf.for %arg27 = %c0_i32_62 to %44 step %c1_i32_64  : i32 {
      %cst_70 = arith.constant 0.000000e+00 : f32
      %46 = vector.broadcast %cst_70 : f32 to vector<32x33xf32>
      %c1_i32_71 = arith.constant 1 : i32
      %47 = arith.muli %arg27, %c1_i32_71 : i32
      %c0_i32_72 = arith.constant 0 : i32
      %48 = arith.addi %47, %c0_i32_72 : i32
      %49 = arith.index_cast %48 : i32 to index
      %c0_73 = arith.constant 0 : index
      %c0_74 = arith.constant 0 : index
      %50 = vector.load %arg25[%49, %c0_73, %c0_74] : memref<4x32x128xbf16, #tpu.memory_space<vmem>>, vector<1x32x128xbf16>
      %51 = vector.shape_cast %50 : vector<1x32x128xbf16> to vector<32x128xbf16>
      %52 = vector.extract_strided_slice %51 {offsets = [0, 0], sizes = [32, 33], strides = [1, 1]} : vector<32x128xbf16> to vector<32x33xbf16>
      %53 = vector.extract_strided_slice %51 {offsets = [0, 1], sizes = [32, 33], strides = [1, 1]} : vector<32x128xbf16> to vector<32x33xbf16>
      %54 = vector.extract_strided_slice %51 {offsets = [0, 2], sizes = [32, 33], strides = [1, 1]} : vector<32x128xbf16> to vector<32x33xbf16>
      %55 = tpu.concatenate %52, %53, %54 in 0 : vector<32x33xbf16>, vector<32x33xbf16>, vector<32x33xbf16> -> vector<96x33xbf16>
      %c0_75 = arith.constant 0 : index
      %c0_76 = arith.constant 0 : index
      %c0_77 = arith.constant 0 : index
      %56 = vector.load %arg11[%c0_75, %c0_76, %c0_77] : memref<3x32x96xbf16, #tpu.memory_space<vmem>>, vector<1x32x96xbf16>
      %57 = vector.shape_cast %56 : vector<1x32x96xbf16> to vector<32x96xbf16>
      %cst_78 = arith.constant dense<0.000000e+00> : vector<32x33xf32>
      %58 = tpu.matmul %57, %55, %cst_78 {dimension_numbers = #tpu.dot_dimension_numbers<[1], [0], [0], [1], [0, 0, 1, 1], [], []>} : vector<32x96xbf16>, vector<96x33xbf16>, vector<32x33xf32> -> vector<32x33xf32>
      %59 = arith.addf %46, %58 : vector<32x33xf32>
      %c1_i32_79 = arith.constant 1 : i32
      %60 = arith.muli %arg27, %c1_i32_79 : i32
      %c1_i32_80 = arith.constant 1 : i32
      %61 = arith.addi %60, %c1_i32_80 : i32
      %62 = arith.index_cast %61 : i32 to index
      %c0_81 = arith.constant 0 : index
      %c0_82 = arith.constant 0 : index
      %63 = vector.load %arg25[%62, %c0_81, %c0_82] : memref<4x32x128xbf16, #tpu.memory_space<vmem>>, vector<1x32x128xbf16>
      %64 = vector.shape_cast %63 : vector<1x32x128xbf16> to vector<32x128xbf16>
      %65 = vector.extract_strided_slice %64 {offsets = [0, 0], sizes = [32, 33], strides = [1, 1]} : vector<32x128xbf16> to vector<32x33xbf16>
      %66 = vector.extract_strided_slice %64 {offsets = [0, 1], sizes = [32, 33], strides = [1, 1]} : vector<32x128xbf16> to vector<32x33xbf16>
      %67 = vector.extract_strided_slice %64 {offsets = [0, 2], sizes = [32, 33], strides = [1, 1]} : vector<32x128xbf16> to vector<32x33xbf16>
      %68 = tpu.concatenate %65, %66, %67 in 0 : vector<32x33xbf16>, vector<32x33xbf16>, vector<32x33xbf16> -> vector<96x33xbf16>
      %c1 = arith.constant 1 : index
      %c0_83 = arith.constant 0 : index
      %c0_84 = arith.constant 0 : index
      %69 = vector.load %arg11[%c1, %c0_83, %c0_84] : memref<3x32x96xbf16, #tpu.memory_space<vmem>>, vector<1x32x96xbf16>
      %70 = vector.shape_cast %69 : vector<1x32x96xbf16> to vector<32x96xbf16>
      %cst_85 = arith.constant dense<0.000000e+00> : vector<32x33xf32>
      %71 = tpu.matmul %70, %68, %cst_85 {dimension_numbers = #tpu.dot_dimension_numbers<[1], [0], [0], [1], [0, 0, 1, 1], [], []>} : vector<32x96xbf16>, vector<96x33xbf16>, vector<32x33xf32> -> vector<32x33xf32>
      %72 = arith.addf %59, %71 : vector<32x33xf32>
      %c1_i32_86 = arith.constant 1 : i32
      %73 = arith.muli %arg27, %c1_i32_86 : i32
      %c2_i32_87 = arith.constant 2 : i32
      %74 = arith.addi %73, %c2_i32_87 : i32
      %75 = arith.index_cast %74 : i32 to index
      %c0_88 = arith.constant 0 : index
      %c0_89 = arith.constant 0 : index
      %76 = vector.load %arg25[%75, %c0_88, %c0_89] : memref<4x32x128xbf16, #tpu.memory_space<vmem>>, vector<1x32x128xbf16>
      %77 = vector.shape_cast %76 : vector<1x32x128xbf16> to vector<32x128xbf16>
      %78 = vector.extract_strided_slice %77 {offsets = [0, 0], sizes = [32, 33], strides = [1, 1]} : vector<32x128xbf16> to vector<32x33xbf16>
      %79 = vector.extract_strided_slice %77 {offsets = [0, 1], sizes = [32, 33], strides = [1, 1]} : vector<32x128xbf16> to vector<32x33xbf16>
      %80 = vector.extract_strided_slice %77 {offsets = [0, 2], sizes = [32, 33], strides = [1, 1]} : vector<32x128xbf16> to vector<32x33xbf16>
      %81 = tpu.concatenate %78, %79, %80 in 0 : vector<32x33xbf16>, vector<32x33xbf16>, vector<32x33xbf16> -> vector<96x33xbf16>
      %c2 = arith.constant 2 : index
      %c0_90 = arith.constant 0 : index
      %c0_91 = arith.constant 0 : index
      %82 = vector.load %arg11[%c2, %c0_90, %c0_91] : memref<3x32x96xbf16, #tpu.memory_space<vmem>>, vector<1x32x96xbf16>
      %83 = vector.shape_cast %82 : vector<1x32x96xbf16> to vector<32x96xbf16>
      %cst_92 = arith.constant dense<0.000000e+00> : vector<32x33xf32>
      %84 = tpu.matmul %83, %81, %cst_92 {dimension_numbers = #tpu.dot_dimension_numbers<[1], [0], [0], [1], [0, 0, 1, 1], [], []>} : vector<32x96xbf16>, vector<96x33xbf16>, vector<32x33xf32> -> vector<32x33xf32>
      %85 = arith.addf %72, %84 : vector<32x33xf32>
      %c0_93 = arith.constant 0 : index
      %c0_94 = arith.constant 0 : index
      %86 = vector.load %arg12[%c0_93, %c0_94] : memref<32x1xf32, #tpu.memory_space<vmem>>, vector<32x1xf32>
      %87 = vector.broadcast %86 : vector<32x1xf32> to vector<32x33xf32>
      %88 = arith.addf %85, %87 : vector<32x33xf32>
      %cst_95 = arith.constant 0.000000e+00 : f32
      %89 = vector.broadcast %cst_95 : f32 to vector<32x33xf32>
      %90 = arith.cmpf oge, %88, %89 : vector<32x33xf32>
      %cst_96 = arith.constant 1.000000e-01 : f32
      %91 = vector.broadcast %cst_96 : f32 to vector<32x33xf32>
      %92 = arith.mulf %91, %88 : vector<32x33xf32>
      %93 = arith.select %90, %88, %92 : vector<32x33xi1>, vector<32x33xf32>
      %c0_97 = arith.constant 0 : index
      %94 = arith.index_cast %arg27 : i32 to index
      %c0_98 = arith.constant 0 : index
      %c0_99 = arith.constant 0 : index
      %95 = vector.load %arg19[%c0_97, %94, %c0_98, %c0_99] : memref<1x2x32x33xf32, #tpu.memory_space<vmem>>, vector<1x1x32x33xf32>
      %96 = vector.shape_cast %95 : vector<1x1x32x33xf32> to vector<32x33xf32>
      %97 = vector.shape_cast %93 : vector<32x33xf32> to vector<1x1x32x33xf32>
      tpu.vector_store %arg19[%c0_97, %94, %c0_98, %c0_99], %97 {strides = array<i32>} : memref<1x2x32x33xf32, #tpu.memory_space<vmem>>, vector<1x1x32x33xf32>,
      %98 = tpu.concatenate %43, %93, %43 in 1 : vector<32x1xf32>, vector<32x33xf32>, vector<32x1xf32> -> vector<32x35xf32>
      %99 = arith.truncf %98 : vector<32x35xf32> to vector<32x35xbf16>
      %c1_i32_100 = arith.constant 1 : i32
      %100 = arith.addi %arg27, %c1_i32_100 : i32
      %101 = arith.index_cast %100 : i32 to index
      %c0_101 = arith.constant 0 : index
      %c0_102 = arith.constant 0 : index
      %102 = vector.load %arg26[%101, %c0_101, %c0_102] : memref<4x32x128xbf16, #tpu.memory_space<vmem>>, vector<1x32x35xbf16>
      %103 = vector.shape_cast %102 : vector<1x32x35xbf16> to vector<32x35xbf16>
      %104 = vector.shape_cast %99 : vector<32x35xbf16> to vector<1x32x35xbf16>
      tpu.vector_store %arg26[%101, %c0_101, %c0_102], %104 {strides = array<i32>} : memref<4x32x128xbf16, #tpu.memory_space<vmem>>, vector<1x32x35xbf16>,
    }
    %c2_i32_65 = arith.constant 2 : i32
    %c0_i32_66 = arith.constant 0 : i32
    %c2_i32_67 = arith.constant 2 : i32
    %45 = arith.addi %c0_i32_66, %c2_i32_67 : i32
    %c1_i32_68 = arith.constant 1 : i32
    scf.for %arg27 = %c0_i32_66 to %45 step %c1_i32_68  : i32 {
      %cst_70 = arith.constant 0.000000e+00 : f32
      %46 = vector.broadcast %cst_70 : f32 to vector<8x33xf32>
      %c1_i32_71 = arith.constant 1 : i32
      %47 = arith.muli %arg27, %c1_i32_71 : i32
      %c0_i32_72 = arith.constant 0 : i32
      %48 = arith.addi %47, %c0_i32_72 : i32
      %49 = arith.index_cast %48 : i32 to index
      %c0_73 = arith.constant 0 : index
      %c0_74 = arith.constant 0 : index
      %50 = vector.load %arg26[%49, %c0_73, %c0_74] : memref<4x32x128xbf16, #tpu.memory_space<vmem>>, vector<1x32x128xbf16>
      %51 = vector.shape_cast %50 : vector<1x32x128xbf16> to vector<32x128xbf16>
      %52 = vector.extract_strided_slice %51 {offsets = [0, 0], sizes = [32, 33], strides = [1, 1]} : vector<32x128xbf16> to vector<32x33xbf16>
      %53 = vector.extract_strided_slice %51 {offsets = [0, 1], sizes = [32, 33], strides = [1, 1]} : vector<32x128xbf16> to vector<32x33xbf16>
      %54 = vector.extract_strided_slice %51 {offsets = [0, 2], sizes = [32, 33], strides = [1, 1]} : vector<32x128xbf16> to vector<32x33xbf16>
      %55 = tpu.concatenate %52, %53, %54 in 0 : vector<32x33xbf16>, vector<32x33xbf16>, vector<32x33xbf16> -> vector<96x33xbf16>
      %c0_75 = arith.constant 0 : index
      %c0_76 = arith.constant 0 : index
      %c0_77 = arith.constant 0 : index
      %56 = vector.load %arg13[%c0_75, %c0_76, %c0_77] : memref<3x8x96xbf16, #tpu.memory_space<vmem>>, vector<1x8x96xbf16>
      %57 = vector.shape_cast %56 : vector<1x8x96xbf16> to vector<8x96xbf16>
      %cst_78 = arith.constant dense<0.000000e+00> : vector<8x33xf32>
      %58 = tpu.matmul %57, %55, %cst_78 {dimension_numbers = #tpu.dot_dimension_numbers<[1], [0], [0], [1], [0, 0, 1, 1], [], []>} : vector<8x96xbf16>, vector<96x33xbf16>, vector<8x33xf32> -> vector<8x33xf32>
      %59 = arith.addf %46, %58 : vector<8x33xf32>
      %c1_i32_79 = arith.constant 1 : i32
      %60 = arith.muli %arg27, %c1_i32_79 : i32
      %c1_i32_80 = arith.constant 1 : i32
      %61 = arith.addi %60, %c1_i32_80 : i32
      %62 = arith.index_cast %61 : i32 to index
      %c0_81 = arith.constant 0 : index
      %c0_82 = arith.constant 0 : index
      %63 = vector.load %arg26[%62, %c0_81, %c0_82] : memref<4x32x128xbf16, #tpu.memory_space<vmem>>, vector<1x32x128xbf16>
      %64 = vector.shape_cast %63 : vector<1x32x128xbf16> to vector<32x128xbf16>
      %65 = vector.extract_strided_slice %64 {offsets = [0, 0], sizes = [32, 33], strides = [1, 1]} : vector<32x128xbf16> to vector<32x33xbf16>
      %66 = vector.extract_strided_slice %64 {offsets = [0, 1], sizes = [32, 33], strides = [1, 1]} : vector<32x128xbf16> to vector<32x33xbf16>
      %67 = vector.extract_strided_slice %64 {offsets = [0, 2], sizes = [32, 33], strides = [1, 1]} : vector<32x128xbf16> to vector<32x33xbf16>
      %68 = tpu.concatenate %65, %66, %67 in 0 : vector<32x33xbf16>, vector<32x33xbf16>, vector<32x33xbf16> -> vector<96x33xbf16>
      %c1 = arith.constant 1 : index
      %c0_83 = arith.constant 0 : index
      %c0_84 = arith.constant 0 : index
      %69 = vector.load %arg13[%c1, %c0_83, %c0_84] : memref<3x8x96xbf16, #tpu.memory_space<vmem>>, vector<1x8x96xbf16>
      %70 = vector.shape_cast %69 : vector<1x8x96xbf16> to vector<8x96xbf16>
      %cst_85 = arith.constant dense<0.000000e+00> : vector<8x33xf32>
      %71 = tpu.matmul %70, %68, %cst_85 {dimension_numbers = #tpu.dot_dimension_numbers<[1], [0], [0], [1], [0, 0, 1, 1], [], []>} : vector<8x96xbf16>, vector<96x33xbf16>, vector<8x33xf32> -> vector<8x33xf32>
      %72 = arith.addf %59, %71 : vector<8x33xf32>
      %c1_i32_86 = arith.constant 1 : i32
      %73 = arith.muli %arg27, %c1_i32_86 : i32
      %c2_i32_87 = arith.constant 2 : i32
      %74 = arith.addi %73, %c2_i32_87 : i32
      %75 = arith.index_cast %74 : i32 to index
      %c0_88 = arith.constant 0 : index
      %c0_89 = arith.constant 0 : index
      %76 = vector.load %arg26[%75, %c0_88, %c0_89] : memref<4x32x128xbf16, #tpu.memory_space<vmem>>, vector<1x32x128xbf16>
      %77 = vector.shape_cast %76 : vector<1x32x128xbf16> to vector<32x128xbf16>
      %78 = vector.extract_strided_slice %77 {offsets = [0, 0], sizes = [32, 33], strides = [1, 1]} : vector<32x128xbf16> to vector<32x33xbf16>
      %79 = vector.extract_strided_slice %77 {offsets = [0, 1], sizes = [32, 33], strides = [1, 1]} : vector<32x128xbf16> to vector<32x33xbf16>
      %80 = vector.extract_strided_slice %77 {offsets = [0, 2], sizes = [32, 33], strides = [1, 1]} : vector<32x128xbf16> to vector<32x33xbf16>
      %81 = tpu.concatenate %78, %79, %80 in 0 : vector<32x33xbf16>, vector<32x33xbf16>, vector<32x33xbf16> -> vector<96x33xbf16>
      %c2 = arith.constant 2 : index
      %c0_90 = arith.constant 0 : index
      %c0_91 = arith.constant 0 : index
      %82 = vector.load %arg13[%c2, %c0_90, %c0_91] : memref<3x8x96xbf16, #tpu.memory_space<vmem>>, vector<1x8x96xbf16>
      %83 = vector.shape_cast %82 : vector<1x8x96xbf16> to vector<8x96xbf16>
      %cst_92 = arith.constant dense<0.000000e+00> : vector<8x33xf32>
      %84 = tpu.matmul %83, %81, %cst_92 {dimension_numbers = #tpu.dot_dimension_numbers<[1], [0], [0], [1], [0, 0, 1, 1], [], []>} : vector<8x96xbf16>, vector<96x33xbf16>, vector<8x33xf32> -> vector<8x33xf32>
      %85 = arith.addf %72, %84 : vector<8x33xf32>
      %c0_93 = arith.constant 0 : index
      %c0_94 = arith.constant 0 : index
      %86 = vector.load %arg14[%c0_93, %c0_94] : memref<8x1xf32, #tpu.memory_space<vmem>>, vector<8x1xf32>
      %87 = vector.broadcast %86 : vector<8x1xf32> to vector<8x33xf32>
      %88 = arith.addf %85, %87 : vector<8x33xf32>
      %89 = vector.extract_strided_slice %88 {offsets = [0, 0], sizes = [1, 33], strides = [1, 1]} : vector<8x33xf32> to vector<1x33xf32>
      %c0_95 = arith.constant 0 : index
      %90 = arith.index_cast %arg27 : i32 to index
      %c0_96 = arith.constant 0 : index
      %c0_97 = arith.constant 0 : index
      %91 = vector.load %arg20[%c0_95, %90, %c0_96, %c0_97] : memref<1x2x1x33xf32, #tpu.memory_space<vmem>>, vector<1x1x1x33xf32>
      %92 = vector.shape_cast %91 : vector<1x1x1x33xf32> to vector<1x33xf32>
      %93 = vector.shape_cast %89 : vector<1x33xf32> to vector<1x1x1x33xf32>
      tpu.vector_store %arg20[%c0_95, %90, %c0_96, %c0_97], %93 {strides = array<i32>} : memref<1x2x1x33xf32, #tpu.memory_space<vmem>>, vector<1x1x1x33xf32>,
    }
    %c2_i32_69 = arith.constant 2 : i32
    return
  }
  func.func @transform_0(%arg0: i32) -> (i32, i32, i32) {
    %c0_i32 = arith.constant 0 : i32
    %c0_i32_0 = arith.constant 0 : i32
    %c0_i32_1 = arith.constant 0 : i32
    return %arg0, %c0_i32, %c0_i32_0 : i32, i32, i32
  }
  func.func @transform_1(%arg0: i32) -> (i32, i32) {
    %c0_i32 = arith.constant 0 : i32
    %c0_i32_0 = arith.constant 0 : i32
    %c0_i32_1 = arith.constant 0 : i32
    return %c0_i32, %c0_i32_0 : i32, i32
  }
  func.func @transform_2(%arg0: i32) -> (i32, i32, i32) {
    %c0_i32 = arith.constant 0 : i32
    %c0_i32_0 = arith.constant 0 : i32
    %c0_i32_1 = arith.constant 0 : i32
    %c0_i32_2 = arith.constant 0 : i32
    return %c0_i32, %c0_i32_0, %c0_i32_1 : i32, i32, i32
  }
  func.func @transform_3(%arg0: i32) -> (i32, i32) {
    %c0_i32 = arith.constant 0 : i32
    %c0_i32_0 = arith.constant 0 : i32
    %c0_i32_1 = arith.constant 0 : i32
    return %c0_i32, %c0_i32_0 : i32, i32
  }
  func.func @transform_4(%arg0: i32) -> (i32, i32, i32) {
    %c0_i32 = arith.constant 0 : i32
    %c0_i32_0 = arith.constant 0 : i32
    %c0_i32_1 = arith.constant 0 : i32
    %c0_i32_2 = arith.constant 0 : i32
    return %c0_i32, %c0_i32_0, %c0_i32_1 : i32, i32, i32
  }
  func.func @transform_5(%arg0: i32) -> (i32, i32) {
    %c0_i32 = arith.constant 0 : i32
    %c0_i32_0 = arith.constant 0 : i32
    %c0_i32_1 = arith.constant 0 : i32
    return %c0_i32, %c0_i32_0 : i32, i32
  }
  func.func @transform_6(%arg0: i32) -> (i32, i32, i32) {
    %c0_i32 = arith.constant 0 : i32
    %c0_i32_0 = arith.constant 0 : i32
    %c0_i32_1 = arith.constant 0 : i32
    %c0_i32_2 = arith.constant 0 : i32
    return %c0_i32, %c0_i32_0, %c0_i32_1 : i32, i32, i32
  }
  func.func @transform_7(%arg0: i32) -> (i32, i32) {
    %c0_i32 = arith.constant 0 : i32
    %c0_i32_0 = arith.constant 0 : i32
    %c0_i32_1 = arith.constant 0 : i32
    return %c0_i32, %c0_i32_0 : i32, i32
  }
  func.func @transform_8(%arg0: i32) -> (i32, i32, i32) {
    %c0_i32 = arith.constant 0 : i32
    %c0_i32_0 = arith.constant 0 : i32
    %c0_i32_1 = arith.constant 0 : i32
    %c0_i32_2 = arith.constant 0 : i32
    return %c0_i32, %c0_i32_0, %c0_i32_1 : i32, i32, i32
  }
  func.func @transform_9(%arg0: i32) -> (i32, i32) {
    %c0_i32 = arith.constant 0 : i32
    %c0_i32_0 = arith.constant 0 : i32
    %c0_i32_1 = arith.constant 0 : i32
    return %c0_i32, %c0_i32_0 : i32, i32
  }
  func.func @transform_10(%arg0: i32) -> (i32, i32, i32) {
    %c0_i32 = arith.constant 0 : i32
    %c0_i32_0 = arith.constant 0 : i32
    %c0_i32_1 = arith.constant 0 : i32
    %c0_i32_2 = arith.constant 0 : i32
    return %c0_i32, %c0_i32_0, %c0_i32_1 : i32, i32, i32
  }
  func.func @transform_11(%arg0: i32) -> (i32, i32) {
    %c0_i32 = arith.constant 0 : i32
    %c0_i32_0 = arith.constant 0 : i32
    %c0_i32_1 = arith.constant 0 : i32
    return %c0_i32, %c0_i32_0 : i32, i32
  }
  func.func @transform_12(%arg0: i32) -> (i32, i32, i32) {
    %c0_i32 = arith.constant 0 : i32
    %c0_i32_0 = arith.constant 0 : i32
    %c0_i32_1 = arith.constant 0 : i32
    %c0_i32_2 = arith.constant 0 : i32
    return %c0_i32, %c0_i32_0, %c0_i32_1 : i32, i32, i32
  }
  func.func @transform_13(%arg0: i32) -> (i32, i32) {
    %c0_i32 = arith.constant 0 : i32
    %c0_i32_0 = arith.constant 0 : i32
    %c0_i32_1 = arith.constant 0 : i32
    return %c0_i32, %c0_i32_0 : i32, i32
  }
  func.func @transform_14(%arg0: i32) -> (i32, i32, i32, i32) {
    %c0_i32 = arith.constant 0 : i32
    %c0_i32_0 = arith.constant 0 : i32
    %c0_i32_1 = arith.constant 0 : i32
    %c0_i32_2 = arith.constant 0 : i32
    return %arg0, %c0_i32, %c0_i32_0, %c0_i32_1 : i32, i32, i32, i32
  }
  func.func @transform_15(%arg0: i32) -> (i32, i32, i32, i32) {
    %c0_i32 = arith.constant 0 : i32
    %c0_i32_0 = arith.constant 0 : i32
    %c0_i32_1 = arith.constant 0 : i32
    %c0_i32_2 = arith.constant 0 : i32
    return %arg0, %c0_i32, %c0_i32_0, %c0_i32_1 : i32, i32, i32, i32
  }
  func.func @transform_16(%arg0: i32) -> (i32, i32, i32, i32) {
    %c0_i32 = arith.constant 0 : i32
    %c0_i32_0 = arith.constant 0 : i32
    %c0_i32_1 = arith.constant 0 : i32
    %c0_i32_2 = arith.constant 0 : i32
    return %arg0, %c0_i32, %c0_i32_0, %c0_i32_1 : i32, i32, i32, i32
  }
  func.func @transform_17(%arg0: i32) -> (i32, i32, i32, i32) {
    %c0_i32 = arith.constant 0 : i32
    %c0_i32_0 = arith.constant 0 : i32
    %c0_i32_1 = arith.constant 0 : i32
    %c0_i32_2 = arith.constant 0 : i32
    return %arg0, %c0_i32, %c0_i32_0, %c0_i32_1 : i32, i32, i32, i32
  }
  func.func @transform_18(%arg0: i32) -> (i32, i32, i32, i32) {
    %c0_i32 = arith.constant 0 : i32
    %c0_i32_0 = arith.constant 0 : i32
    %c0_i32_1 = arith.constant 0 : i32
    %c0_i32_2 = arith.constant 0 : i32
    return %arg0, %c0_i32, %c0_i32_0, %c0_i32_1 : i32, i32, i32, i32
  }
  func.func @transform_19(%arg0: i32) -> (i32, i32, i32, i32) {
    %c0_i32 = arith.constant 0 : i32
    %c0_i32_0 = arith.constant 0 : i32
    %c0_i32_1 = arith.constant 0 : i32
    %c0_i32_2 = arith.constant 0 : i32
    return %arg0, %c0_i32, %c0_i32_0, %c0_i32_1 : i32, i32, i32, i32
  }
}

</mosaic_0001>

<bundles_post_ra>
// kernel: discriminator_r_forward.1
= control target key start
LH: loop header
LB: loop body
LE: loop exit
PB: predicated region body
PF: predicated region fallthrough
CT: control target
= control target key end

     0   :  { %s9105_s0 = inlined_call_operand.vmem [shape: f32[4,16,64], index: 0, kind: input, shape index: {}]   ;;  %s9106_s1 = inlined_call_operand.vmem [shape: f32[64,256], index: 1, kind: input, shape index: {}]   ;;  %s9107_s2 = inlined_call_operand.vmem [shape: f32[9,32,3], index: 2, kind: input, shape index: {}]   ;;  %s9108_s3 = inlined_call_operand.vmem [shape: f32[32,1], index: 3, kind: input, shape index: {}]   ;;  %s9109_s4 = inlined_call_operand.vmem [shape: bf16[9,32,96], index: 4, kind: input, shape index: {}]   ;;  %s9110_s5 = inlined_call_operand.vmem [shape: f32[32,1], index: 5, kind: input, shape index: {}]   ;;  %s9111_s6 = inlined_call_operand.vmem [shape: bf16[9,32,96], index: 6, kind: input, shape index: {}]   ;;  %s9112_s7 = inlined_call_operand.vmem [shape: f32[32,1], index: 7, kind: input, shape index: {}]   ;;  %s9113_s8 = inlined_call_operand.vmem [shape: bf16[9,32,96], index: 8, kind: input, shape index: {}]   ;;  %s9114_s9 = inlined_call_operand.vmem [shape: f32[32,1], index: 9, kind: input, shape index: {}]   ;;  %s9115_s10 = inlined_call_operand.vmem [shape: bf16[3,32,96], index: 10, kind: input, shape index: {}]   ;;  %s9116_s11 = inlined_call_operand.vmem [shape: f32[32,1], index: 11, kind: input, shape index: {}]   ;;  %s9117_s12 = inlined_call_operand.vmem [shape: bf16[3,8,96], index: 12, kind: input, shape index: {}]   ;;  %s9118_s13 = inlined_call_operand.vmem [shape: f32[8,1], index: 13, kind: input, shape index: {}]   ;;  %s9119_s14 = inlined_call_operand.vmem [shape: f32[4,16,32,33], index: 14, kind: output, shape index: {0}]   ;;  %s9120_s15 = inlined_call_operand.vmem [shape: f32[4,8,32,33], index: 15, kind: output, shape index: {1}]   ;;  %s9121_s16 = inlined_call_operand.vmem [shape: f32[4,4,32,33], index: 16, kind: output, shape index: {2}]   ;;  %s9122_s17 = inlined_call_operand.vmem [shape: f32[4,2,32,33], index: 17, kind: output, shape index: {3}]   ;;  %s9123_s18 = inlined_call_operand.vmem [shape: f32[4,2,32,33], index: 18, kind: output, shape index: {4}]   ;;  %s9124_s19 = inlined_call_operand.vmem [shape: f32[4,2,1,33], index: 19, kind: output, shape index: {5}]  }
   0x1   :  { %9130 = sst [smem:[#allocation9_spill]] %s9105_s0  ;;  %s7769_s0 = smov 0  }
   0x2   :  { %9131 = sst [smem:[#allocation10_spill]] %s9106_s1 }
   0x3   :  { %9132 = sst [smem:[#allocation11_spill]] %s9107_s2 }
   0x4   :  { %9133 = sst [smem:[#allocation12_spill]] %s9108_s3 }
   0x5   :  { %9134 = sst [smem:[#allocation13_spill]] %s9117_s12 }
   0x6   :  { %9135 = sst [smem:[#allocation14_spill]] %s9118_s13 }
   0x7   :  { %9136 = sst [smem:[#allocation15_spill]] %s9119_s14 }
   0x8   :  { %9137 = sst [smem:[#allocation16_spill]] %s9120_s15 }
   0x9   :  { %9138 = sst [smem:[#allocation17_spill]] %s9121_s16 }
   0xa LB: > { %9139 = sst [smem:[#allocation8_spill]] %s7616_s0  ;;  %s5795_s30 = sadd.s32 4294967295, %s7616_s0   ;;  %s7616_s0 = sphi %s7769_s0, %s30_s0  }
   0xb   : > { %p5799_p0 = scmp.ge.s32.totalorder %s7616_s0, 1  ;;  %p548_p1 = scmp.lt.s32.totalorder %s7616_s0, 5 }
   0xd   : > { %p549_p2 = pnand %p5799_p0, %p548_p1 }
   0xe   : > { %s9140_s1 = sld [smem:[#allocation10_spill]] (!%p549_p2)  ;;  %p7786_p3 = scmp.lt.s32.totalorder (!%p549_p2), %s5795_s30, 3  ;;  %v7642_v7 = vmov (!%p549_p2), 0.0   ;;  %vm681_vm0 = vcmask (!%p549_p2), 523264   ;;  %v7643_v27 = vmov (!%p549_p2), 0  }
   0xf   : > { %552 = sbr.rel (%p549_p2) target bundleno = 3414 (0xd56), region = 76  ;;  %752 = vmatprep.mubr.f32.mxu0 (!%p549_p2), %v7642_v7  ;;  %785 = vst [vmem:[#allocation2] sm:$0xf] (!%p549_p2), %v7642_v7  ;;  %786 = vst [vmem:[#allocation2 + $0x14] sm:$0xf] (!%p549_p2), %v7642_v7  ;;  %758 = vmatprep.mubr.f32.mxu1 (!%p549_p2), %v7642_v7  ;;  %s9142_s14 = sld [smem:[#allocation15_spill]] (!%p549_p2) }
  0x10   : > { %s9143_s15 = sld [smem:[#allocation16_spill]] (!%p549_p2)  ;;  %s9144_s16 = sld [smem:[#allocation17_spill]] (!%p549_p2)  ;;  %789 = vst [vmem:[#allocation3] sm:$0xff] (!%p549_p2), %v7643_v27  ;;  %790 = vst [vmem:[#allocation3 + $0x8] sm:$0xff] (!%p549_p2), %v7643_v27 }
  0x11   : > { %791 = vst [vmem:[#allocation3 + $0x10] sm:$0xff] (!%p549_p2), %v7643_v27  ;;  %792 = vst [vmem:[#allocation3 + $0x18] sm:$0xff] (!%p549_p2), %v7643_v27  ;;  %s7888_s13 = smov (!%p549_p2), 0  }
  0x12   : > { %793 = vst [vmem:[#allocation3 + $0x20] sm:$0xff] (!%p549_p2), %v7643_v27  ;;  %794 = vst [vmem:[#allocation3 + $0x28] sm:$0xff] (!%p549_p2), %v7643_v27 }
  0x13   : > { %795 = vst [vmem:[#allocation3 + $0x30] sm:$0xff] (!%p549_p2), %v7643_v27  ;;  %796 = vst [vmem:[#allocation3 + $0x38] sm:$0xff] (!%p549_p2), %v7643_v27 }
  0x14   : > { %v666_v0 = vld [vmem:[%s9140_s1 + $0x8] sm:$0xff] (!%p549_p2)  ;;  %v668_v1 = vld [vmem:[%s9140_s1 + $0x18] sm:$0xff] (!%p549_p2)  ;;  %v665_v2 = vld [vmem:[%s9140_s1] sm:$0xff] (!%p549_p2)  ;;  %798 = vst [vmem:[#allocation3 + $0x140] sm:$0xff] (!%p549_p2), %v7643_v27 }
  0x15   : > { %v7216_v3 = vpack.c.bf16 (!%p549_p2), %v668_v1, %v666_v0  ;;  %v667_v4 = vld [vmem:[%s9140_s1 + $0x10] sm:$0xff] (!%p549_p2)  ;;  %v670_v5 = vld [vmem:[%s9140_s1 + $0x28] sm:$0xff] (!%p549_p2)  ;;  %v672_v6 = vld [vmem:[%s9140_s1 + $0x38] sm:$0xff] (!%p549_p2)  ;;  %799 = vst [vmem:[#allocation3 + $0x148] sm:$0xff] (!%p549_p2), %v7643_v27 }
  0x16   : > { %v7218_v8 = vpack.c.bf16 %v667_v4, %v665_v2  ;;  %v7220_v9 = vpack.c.bf16 %v672_v6, %v670_v5  ;;  %v669_v10 = vld [vmem:[%s9140_s1 + $0x20] sm:$0xff]  ;;  %v671_v11 = vld [vmem:[%s9140_s1 + $0x30] sm:$0xff]  ;;  %v674_v12 = vld [vmem:[%s9140_s1 + $0x48] sm:$0xff]  ;;  %s9153_s30 = smov (!%p7786_p3, %s5795_s30), 3  ;;  %800 = vst [vmem:[#allocation3 + $0x150] sm:$0xff] %v7643_v27 }
  0x17   : > { %7217 = vmatprep.subr.bf16.mxu0 %v7216_v3  ;;  %7232 = vmatprep.subr.bf16.mxu1 %v7216_v3  ;;  %v676_v13 = vld [vmem:[%s9140_s1 + $0x58] sm:$0xff]  ;;  %v7222_v14 = vpack.c.bf16 %v671_v11, %v669_v10  ;;  %s6273_s28 = sshll.u32 %s9153_s30, 9  ;;  %v673_v16 = vld [vmem:[%s9140_s1 + $0x40] sm:$0xff]  ;;  %v675_v17 = vld [vmem:[%s9140_s1 + $0x50] sm:$0xff]  ;;  %s6274_s0 = sshll.u32 %s9153_s30, 8  ;;  %801 = vst [vmem:[#allocation3 + $0x158] sm:$0xff] %v7643_v27 }
  0x18   : > { %7219 = vmatpush1.bf16.msra.mxu0 %v7218_v8  ;;  %7236 = vmatpush1.bf16.msra.mxu1 %v7218_v8  ;;  %v7224_v15 = vpack.c.bf16 %v676_v13, %v674_v12  ;;  %s7825_s23 = scalar_lea.vmem %s9142_s14, %s6273_s28  ;;  %v678_v18 = vld [vmem:[%s9140_s1 + $0x68] sm:$0xff]  ;;  %v680_v19 = vld [vmem:[%s9140_s1 + $0x78] sm:$0xff]  ;;  %s6275_s25 = sshll.u32 %s9153_s30, 7  ;;  %v7226_v20 = vpack.c.bf16 %v675_v17, %v673_v16  ;;  %v677_v22 = vld [vmem:[%s9140_s1 + $0x60] sm:$0xff]  ;;  %802 = vst [vmem:[#allocation3 + $0x160] sm:$0xff] %v7643_v27 }
  0x19   : > { %7221 = vmatprep.subr.bf16.mxu0 %v7220_v9  ;;  %7233 = vmatprep.subr.bf16.mxu1 %v7220_v9  ;;  %s7838_s20 = scalar_lea.vmem %s9143_s15, %s6274_s0  ;;  %s7843_s28 = scalar_lea.vmem %s9144_s16, %s6275_s25  ;;  %v7228_v21 = vpack.c.bf16 %v680_v19, %v678_v18  ;;  %v679_v23 = vld [vmem:[%s9140_s1 + $0x70] sm:$0xff]  ;;  %803 = vst [vmem:[#allocation3 + $0x168] sm:$0xff] %v7643_v27  ;;  %804 = vst [vmem:[#allocation3 + $0x170] sm:$0xff] %v7643_v27 }
  0x1a   : > { %s6276_s2 = sshll.u32 %s9153_s30, 6  ;;  %s5812_s24 = sshll.u32 %s9153_s30, 1  ;;  %v7230_v24 = vpack.c.bf16 %v679_v23, %v677_v22  ;;  %805 = vst [vmem:[#allocation3 + $0x178] sm:$0xff] %v7643_v27 }
  0x1b   : > { %s7856_s25 = scalar_lea.vmem %s9122_s17, %s6276_s2  ;;  %s7861_s14 = scalar_lea.vmem %s9123_s18, %s6276_s2 }
  0x1c   : > { %7223 = vmatpush1.bf16.msra.mxu0 %v7222_v14  ;;  %7237 = vmatpush1.bf16.msra.mxu1 %v7222_v14  ;;  %s6272_s15 = sshll.u32 %s9153_s30, 4  ;;  %s7867_s3 = scalar_lea.vmem %s9124_s19, %s5812_s24 }
  0x1d   : > { %7225 = vmatprep.subr.bf16.mxu0 %v7224_v15  ;;  %7234 = vmatprep.subr.bf16.mxu1 %v7224_v15  ;;  %s9145_s0 = sld [smem:[#allocation9_spill]] }
  0x20   : > { %7227 = vmatpush1.bf16.msra.mxu0 %v7226_v20  ;;  %7238 = vmatpush1.bf16.msra.mxu1 %v7226_v20 }
  0x21   : > { %7229 = vmatprep.subr.bf16.mxu0 %v7228_v21  ;;  %7235 = vmatprep.subr.bf16.mxu1 %v7228_v21 }
  0x23   : > { %s632_s27 = scalar_lea.vmem %s9145_s0, %s6272_s15 }
  0x24   : > { %7231 = vmatpush1.bf16.msra.mxu0 %v7230_v24  ;;  %7239 = vmatpush1.bf16.msra.mxu1 %v7230_v24  ;;  %v663_v25 = vld [vmem:[%s632_s27] sm:$0xff]  ;;  %v664_v26 = vld [vmem:[%s632_s27 + $0x8] sm:$0xff] }
  0x27   : > { %5813 = vmatmul.mubr.msk.f32.vlgmr.msra.gmra.mrb[0].mxu0 %vm681_vm0, %v663_v25  ;;  %5814 = vmatmul.mubr.msk.f32.vlgmr.msra.gmra.mrb[0].mxu1 %vm681_vm0, %v664_v26 }
  0xfa   : > { %v754_v28 = vpop.f32.mrb[0].mxu0  ;;  %v760_v29 = vpop.f32.mrb[0].mxu1 }
  0xfb   : > { %v765_v30 = vmul.f32 %v754_v28, %v754_v28  ;;  %v766_v31 = vmul.f32 %v760_v29, %v760_v29  ;;  %v756_v32 = vpop.f32.mrb[1].mxu0  ;;  %v762_v33 = vpop.f32.mrb[1].mxu1 }
  0xfc   : > { %v767_v34 = vmul.f32 %v756_v32, %v756_v32  ;;  %v768_v35 = vmul.f32 %v762_v33, %v762_v33 }
  0xfe   : > { %v769_v36 = vadd.f32 %v767_v34, %v765_v30  ;;  %v770_v37 = vadd.f32 %v768_v35, %v766_v31 }
 0x100   : > { %7461 = vrsqrt.f32 %v769_v36  ;;  %vm773_vm1 = vcmp.eq.f32.partialorder %v769_v36, inf  ;;  %v776_v41 = vand.u32 2147483648, %v769_v36  ;;  %vm775_vm2 = vcmp.eq.f32.partialorder %v769_v36, 0.0 }
 0x101   : > { %7463 = vrsqrt.f32 %v770_v37  ;;  %vm780_vm3 = vcmp.eq.f32.partialorder %v770_v37, inf  ;;  %v783_v44 = vand.u32 2147483648, %v770_v37  ;;  %vm782_vm4 = vcmp.eq.f32.partialorder %v770_v37, 0.0 }
 0x10a   : > { %v7462_v38 = vpop.eup %7461 }
 0x10b   : > { %v7464_v39 = vpop.eup %7463  ;;  %v772_v40 = vmul.f32 %v7462_v38, %v769_v36 }
 0x10c   : > { %v779_v42 = vmul.f32 %v7464_v39, %v770_v37 }
 0x10d   : > { %v774_v43 = vsel %vm773_vm1, %v769_v36, %v772_v40 }
 0x10e   : > { %v777_v45 = vsel %vm775_vm2, %v776_v41, %v774_v43  ;;  %v781_v46 = vsel %vm780_vm3, %v770_v37, %v779_v42 }
 0x10f   : > { %787 = vst [vmem:[#allocation2 + $0x4] sm:$0xff] %v777_v45  ;;  %v784_v47 = vsel %vm782_vm4, %v783_v44, %v781_v46 }
 0x110   : > { %788 = vst [vmem:[#allocation2 + $0xc] sm:$0xff] %v784_v47 }
 0x111 LB: >> { %s9146_s30 = sld [smem:[#allocation11_spill]]  ;;  %vm850_vm5 = vcmask 23552   ;;  %s7902_s29 = scalar_lea.vmem [#allocation2], %s7620_s13  ;;  %v7646_v13 = vmov 0   ;;  %vm823_vm6 = vcmask 1040384   ;;  %vm825_vm7 = vcmask 1041408   ;;  %s7620_s13 = sphi %s7888_s13, %s811_s13  }
 0x112   : >> { %s7644_s21 = smov 126   ;;  %s7645_s22 = smov 127   ;;  %7466 = vset.pattern.permute.xlu1 %v7646_v13  ;;  %7465 = vset.pattern.permute.xlu0 %v7646_v13  ;;  %vm863_vm8 = vcmask 1042432   ;;  %vm1955_vm10 = vcmask 269312   ;;  %vm1976_vm14 = vcmask 7168   ;;  %vm1981_vm15 = vcmask 277504  }
 0x113   : >> { %s9147_s0 = sld [smem:[#allocation12_spill]]  ;;  %s5901_s26 = sshll.u32 %s7620_s13, 4  ;;  %vm1991_vm0 = vcmask 285696  }
 0x114   : >> { %s5535_s12 = scalar_lea.vmem [#allocation3], %s5901_s26 }
 0x117   : >> { %v5816_v48 = vld [vmem:[%s9146_s30 + $0x20] sm:$0xff]  ;;  %v7959_v10 = vld [vmem:[%s7902_s29 + $0x8] sm:$0x1]  ;;  %v5818_v23 = vld [vmem:[%s9146_s30 + $0x30] sm:$0xff] }
 0x118   : >> { %6618 = vmatprep.mubr.msk.f32.mxu1 %vm850_vm5, %v5816_v48  ;;  %v5851_v49 = vld [vmem:[%s9146_s30 + $0x80] sm:$0xff]  ;;  %v1794_v11 = vrot.slane %v7959_v10, 7  ;;  %v1798_v12 = vrot.slane %v7959_v10, 6  ;;  %v5817_v22 = vld [vmem:[%s9146_s30 + $0x28] sm:$0xff]  ;;  %v5819_v30 = vld [vmem:[%s9146_s30 + $0x38] sm:$0xff] }
 0x119   : >> { %6650 = vmatprep.mubr.msk.f32.mxu0 %vm850_vm5, %v5851_v49  ;;  %v7905_v50 = vld [vmem:[%s7902_s29 + $0x1] sm:$0x1]  ;;  %v7908_v51 = vld [vmem:[%s7902_s29 + $0x4] sm:$0x1]  ;;  %v7917_v56 = vld [vmem:[%s7902_s29 + $0x5] sm:$0x1]  ;;  %s9148_s27 = smov %s9147_s0 }
 0x11a   : >> { %v839_v52 = vrot.slane %v7905_v50, 6  ;;  %v835_v53 = vrot.slane %v7905_v50, 7  ;;  %v1306_v54 = vrot.slane %v7908_v51, 6  ;;  %v1302_v55 = vrot.slane %v7908_v51, 7  ;;  %v7920_v57 = vld [vmem:[%s7902_s29] sm:$0x1] }
 0x11b   : >> { %v1425_v58 = vrot.slane %v7917_v56, 7  ;;  %v815_v59 = vrot.slane %v7920_v57, 7  ;;  %v1429_v60 = vrot.slane %v7917_v56, 6  ;;  %v819_v61 = vrot.slane %v7920_v57, 6  ;;  %v7931_v62 = vld [vmem:[%s7902_s29 + $0x6] sm:$0x1] }
 0x11c   : >> { %840 = vrot.lane.b32.xlu1 %v839_v52, %s7644_s21  ;;  %836 = vrot.lane.b32.xlu0 %v835_v53, %s7645_s22  ;;  %v7934_v63 = vld [vmem:[%s7902_s29 + $0x2] sm:$0x1]  ;;  %v1548_v0 = vrot.slane %v7931_v62, 7  ;;  %v1552_v2 = vrot.slane %v7931_v62, 6  ;;  %v7945_v4 = vld [vmem:[%s7902_s29 + $0x7] sm:$0x1] }
 0x11d   : >> { %v1056_v1 = vrot.slane %v7934_v63, 7  ;;  %v1060_v3 = vrot.slane %v7934_v63, 6  ;;  %v7948_v5 = vld [vmem:[%s7902_s29 + $0x3] sm:$0x1]  ;;  %v1671_v6 = vrot.slane %v7945_v4, 7  ;;  %v1675_v8 = vrot.slane %v7945_v4, 6 }
 0x11e   : >> { %v1179_v7 = vrot.slane %v7948_v5, 7  ;;  %v1183_v9 = vrot.slane %v7948_v5, 6  ;;  %v1914_v14 = vld [vmem:[%s9147_s0 + $0x8] sm:$0xff]  ;;  %v1913_v15 = vld [vmem:[%s9148_s27] sm:$0xff]  ;;  %v1916_v16 = vld [vmem:[%s9148_s27 + $0x18] sm:$0xff]  ;;  %s5900_s29 = sshll.u32 %s7620_s13, 5 }
 0x11f   : >> { %v1915_v17 = vld [vmem:[%s9148_s27 + $0x10] sm:$0xff]  ;;  %v5852_v29 = vld [vmem:[%s9146_s30 + $0x88] sm:$0xff]  ;;  %v827_v31 = vld [vmem:[%s9146_s30] sm:$0xff]  ;;  %s811_s13 = sadd.s32 1, %s7620_s13  }
 0x120   : >> { %1307 = vrot.lane.b32.xlu1 %v1306_v54, %s7644_s21  ;;  %1303 = vrot.lane.b32.xlu0 %v1302_v55, %s7645_s22  ;;  %v5861_v32 = vld [vmem:[%s9146_s30 + $0xa0] sm:$0xff]  ;;  %v828_v41 = vld [vmem:[%s9146_s30 + $0x8] sm:$0xff]  ;;  %p808_p4 = scmp.ge.s32.totalorder %s811_s13, 16  }
 0x121   : >> { %v5862_v42 = vld [vmem:[%s9146_s30 + $0xa8] sm:$0xff]  ;;  %v829_v43 = vld [vmem:[%s9146_s30 + $0x10] sm:$0xff]  ;;  %v830_v47 = vld [vmem:[%s9146_s30 + $0x18] sm:$0xff]  ;;  %1994 = vst [vmem:[#allocation4] sm:$0xff] (%p808_p4), %v7643_v27 }
 0x122   : >> { %v5863_v44 = vld [vmem:[%s9146_s30 + $0xb0] sm:$0xff]  ;;  %v5864_v48 = vld [vmem:[%s9146_s30 + $0xb8] sm:$0xff]  ;;  %v5831_v49 = vld [vmem:[%s9146_s30 + $0x40] sm:$0xff]  ;;  %1995 = vst [vmem:[#allocation4 + $0x8] sm:$0xff] (%p808_p4), %v7643_v27 }
 0x123   : > { %1996 = vst [vmem:[#allocation4 + $0x10] sm:$0xff] (%p808_p4), %v7643_v27  ;;  %1997 = vst [vmem:[#allocation4 + $0x18] sm:$0xff] (%p808_p4), %v7643_v27 }
 0x124   : >> { %1426 = vrot.lane.b32.xlu1 %v1425_v58, %s7645_s22  ;;  %816 = vrot.lane.b32.xlu0 %v815_v59, %s7645_s22  ;;  %v5872_v58 = vld [vmem:[%s9146_s30 + $0xc8] sm:$0xff]  ;;  %v5833_v59 = vld [vmem:[%s9146_s30 + $0x50] sm:$0xff]  ;;  %1998 = vst [vmem:[#allocation4 + $0x20] sm:$0xff] (%p808_p4), %v7643_v27  ;;  %1999 = vst [vmem:[#allocation4 + $0x28] sm:$0xff] (%p808_p4), %v7643_v27 }
 0x125   : > { %2000 = vst [vmem:[#allocation4 + $0x30] sm:$0xff] (%p808_p4), %v7643_v27  ;;  %2001 = vst [vmem:[#allocation4 + $0x38] sm:$0xff] (%p808_p4), %v7643_v27 }
 0x126   : > { %2003 = vst [vmem:[#allocation4 + $0xc0] sm:$0xff] (%p808_p4), %v7643_v27  ;;  %2004 = vst [vmem:[#allocation4 + $0xc8] sm:$0xff] (%p808_p4), %v7643_v27 }
 0x127   : > { %2005 = vst [vmem:[#allocation4 + $0xd0] sm:$0xff] (%p808_p4), %v7643_v27  ;;  %2006 = vst [vmem:[#allocation4 + $0xd8] sm:$0xff] (%p808_p4), %v7643_v27 }
 0x128   : >> { %1430 = vrot.lane.b32.xlu1 %v1429_v60, %s7644_s21  ;;  %820 = vrot.lane.b32.xlu0 %v819_v61, %s7644_s21  ;;  %v5873_v60 = vld [vmem:[%s9146_s30 + $0xd0] sm:$0xff]  ;;  %2007 = vst [vmem:[#allocation4 + $0xe0] sm:$0xff] (%p808_p4), %v7643_v27  ;;  %2008 = vst [vmem:[#allocation4 + $0xe8] sm:$0xff] (%p808_p4), %v7643_v27 }
 0x129   : > { %2009 = vst [vmem:[#allocation4 + $0xf0] sm:$0xff] (%p808_p4), %v7643_v27  ;;  %2010 = vst [vmem:[#allocation4 + $0xf8] sm:$0xff] (%p808_p4), %v7643_v27 }
 0x12c   : >> { %1549 = vrot.lane.b32.xlu1 %v1548_v0, %s7645_s22  ;;  %1057 = vrot.lane.b32.xlu0 %v1056_v1, %s7645_s22  ;;  %v5874_v0 = vld [vmem:[%s9146_s30 + $0xd8] sm:$0xff]  ;;  %v5841_v1 = vld [vmem:[%s9146_s30 + $0x60] sm:$0xff] }
 0x130   : >> { %1553 = vrot.lane.b32.xlu1 %v1552_v2, %s7644_s21  ;;  %1061 = vrot.lane.b32.xlu0 %v1060_v3, %s7644_s21 }
 0x134   : >> { %1672 = vrot.lane.b32.xlu1 %v1671_v6, %s7645_s22  ;;  %1180 = vrot.lane.b32.xlu0 %v1179_v7, %s7645_s22 }
 0x138   : >> { %1676 = vrot.lane.b32.xlu1 %v1675_v8, %s7644_s21  ;;  %1184 = vrot.lane.b32.xlu0 %v1183_v9, %s7644_s21 }
 0x13c   : >> { %1795 = vrot.lane.b32.xlu0 %v1794_v11, %s7645_s22  ;;  %1799 = vrot.lane.b32.xlu1 %v1798_v12, %s7644_s21  ;;  %v5842_v11 = vld [vmem:[%s9146_s30 + $0x68] sm:$0xff]  ;;  %v5843_v12 = vld [vmem:[%s9146_s30 + $0x70] sm:$0xff]  ;;  %s1954_s22 = scalar_lea.vmem %s7825_s23, %s5900_s29  ;;  %s7647_s21 = smov 1  }
 0x13d   : > { %s8204_s23 = smov (%p808_p4), 0  }
 0x140   : >> { %1924 = vperm.xlu1 %7466, %v1914_v14   ;;  %1919 = vperm.xlu0 %7465, %v1913_v15   ;;  %v5883_v15 = vld [vmem:[%s9146_s30 + $0xf0] sm:$0xff] }
 0x144   : >> { %1934 = vperm.xlu0 %7465, %v1916_v16   ;;  %1929 = vperm.xlu1 %7466, %v1915_v17   ;;  %v5844_v17 = vld [vmem:[%s9146_s30 + $0x78] sm:$0xff] }
 0x18e   : >> { %v841_v18 = vpop.permute.xlu1 %840  ;;  %v837_v19 = vpop.permute.xlu0 %836 }
 0x18f   : >> { %v843_v20 = vsel %vm823_vm6, %v7905_v50, %v837_v19  ;;  %v5853_v19 = vld [vmem:[%s9146_s30 + $0x90] sm:$0xff] }
 0x190   : >> { %v844_v21 = vsel %vm825_vm7, %v843_v20, %v841_v18  ;;  %v5891_v20 = vld [vmem:[%s9146_s30 + $0x100] sm:$0xff] }
 0x191   : >> { %6616 = vmatprep.subr.msk.mxu1 %vm863_vm8, %v844_v21 }
 0x192   : >> { %v1308_v24 = vpop.permute.xlu1 %1307  ;;  %6617 = vmatpush3.msk.msra.mxu1 %vm863_vm8, %v844_v21  ;;  %v1304_v25 = vpop.permute.xlu0 %1303  ;;  %v5892_v21 = vld [vmem:[%s9146_s30 + $0x108] sm:$0xff] }
 0x193   : >> { %v1310_v26 = vsel %vm823_vm6, %v7908_v51, %v1304_v25  ;;  %6619 = vmatmul.mubr.msk.f32.vlgmr.msra.gmra.mrb[0].mxu1 %vm850_vm5, %v5817_v22  ;;  %v5893_v22 = vld [vmem:[%s9146_s30 + $0x110] sm:$0xff] }
 0x194   : >> { %v7994_v28 = vsel %vm825_vm7, %v1310_v26, %v1308_v24  ;;  %6621 = vmatprep.mubr.msk.f32.mxu1 %vm850_vm5, %v5818_v23  ;;  %v5854_v23 = vld [vmem:[%s9146_s30 + $0x98] sm:$0xff] }
 0x195   : >> { %6648 = vmatprep.subr.msk.mxu0 %vm863_vm8, %v7994_v28  ;;  %v5894_v24 = vld [vmem:[%s9146_s30 + $0x118] sm:$0xff] }
 0x196   : >> { %v1427_v33 = vpop.permute.xlu1 %1426  ;;  %6649 = vmatpush3.msk.msra.mxu0 %vm863_vm8, %v7994_v28  ;;  %v817_v34 = vpop.permute.xlu0 %816 }
 0x197   : >> { %6651 = vmatmul.mubr.msk.f32.vlgmr.msra.gmra.mrb[0].mxu0 %vm850_vm5, %v5852_v29  ;;  %6622 = vmatmul.mubr.msk.f32.gmra.mrb[2].mxu1 %vm850_vm5, %v5819_v30  ;;  %v1433_v35 = vsel %vm823_vm6, %v7917_v56, %v1427_v33  ;;  %v824_v36 = vsel %vm823_vm6, %v7920_v57, %v817_v34  ;;  %v5832_v56 = vld [vmem:[%s9146_s30 + $0x48] sm:$0xff]  ;;  %v5871_v57 = vld [vmem:[%s9146_s30 + $0xc0] sm:$0xff] }
 0x198   : >> { %6626 = vmatprep.mubr.msk.f32.mxu1 %vm850_vm5, %v827_v31  ;;  %6658 = vmatprep.mubr.msk.f32.mxu0 %vm850_vm5, %v5861_v32 }
 0x19a   : >> { %v1431_v37 = vpop.permute.xlu1 %1430  ;;  %v821_v38 = vpop.permute.xlu0 %820 }
 0x19b   : >> { %v1434_v39 = vsel %vm825_vm7, %v1433_v35, %v1431_v37  ;;  %v826_v40 = vsel %vm825_vm7, %v824_v36, %v821_v38 }
 0x19c   : >> { %6624 = vmatprep.subr.msk.mxu1 %vm863_vm8, %v826_v40  ;;  %6656 = vmatprep.subr.msk.mxu0 %vm863_vm8, %v1434_v39 }
 0x19d   : >> { %6625 = vmatpush3.msk.msra.mxu1 %vm863_vm8, %v826_v40  ;;  %6657 = vmatpush3.msk.msra.mxu0 %vm863_vm8, %v1434_v39 }
 0x19e   : >> { %v1550_v45 = vpop.permute.xlu1 %1549  ;;  %6627 = vmatmul.mubr.msk.f32.vlgmr.msra.gmra.mrb[0].mxu1 %vm850_vm5, %v828_v41  ;;  %v1058_v46 = vpop.permute.xlu0 %1057 }
 0x19f   : >> { %6659 = vmatmul.mubr.msk.f32.vlgmr.msra.gmra.mrb[0].mxu0 %vm850_vm5, %v5862_v42  ;;  %6629 = vmatprep.mubr.msk.f32.mxu1 %vm850_vm5, %v829_v43  ;;  %v1556_v50 = vsel %vm823_vm6, %v7931_v62, %v1550_v45  ;;  %v1064_v51 = vsel %vm823_vm6, %v7934_v63, %v1058_v46  ;;  %v5834_v63 = vld [vmem:[%s9146_s30 + $0x58] sm:$0xff] }
 0x1a0   : >> { %6661 = vmatprep.mubr.msk.f32.mxu0 %vm850_vm5, %v5863_v44 }
 0x1a2   : >> { %v1554_v52 = vpop.permute.xlu1 %1553  ;;  %6630 = vmatmul.mubr.msk.f32.gmra.mrb[2].mxu1 %vm850_vm5, %v830_v47  ;;  %v1062_v53 = vpop.permute.xlu0 %1061 }
 0x1a3   : >> { %v1557_v54 = vsel %vm825_vm7, %v1556_v50, %v1554_v52  ;;  %v1065_v55 = vsel %vm825_vm7, %v1064_v51, %v1062_v53  ;;  %6662 = vmatmul.mubr.msk.f32.gmra.mrb[2].mxu0 %vm850_vm5, %v5864_v48  ;;  %6634 = vmatprep.mubr.msk.f32.mxu1 %vm850_vm5, %v5831_v49 }
 0x1a4   : >> { %6632 = vmatprep.subr.msk.mxu1 %vm863_vm8, %v1065_v55  ;;  %6664 = vmatprep.subr.msk.mxu0 %vm863_vm8, %v1557_v54 }
 0x1a5   : >> { %6633 = vmatpush3.msk.msra.mxu1 %vm863_vm8, %v1065_v55  ;;  %6665 = vmatpush3.msk.msra.mxu0 %vm863_vm8, %v1557_v54 }
 0x1a6   : >> { %v1673_v61 = vpop.permute.xlu1 %1672  ;;  %6635 = vmatmul.mubr.msk.f32.vlgmr.msra.gmra.mrb[0].mxu1 %vm850_vm5, %v5832_v56  ;;  %6666 = vmatprep.mubr.msk.f32.mxu0 %vm850_vm5, %v5871_v57  ;;  %v1181_v62 = vpop.permute.xlu0 %1180 }
 0x1a7   : >> { %6667 = vmatmul.mubr.msk.f32.vlgmr.msra.gmra.mrb[0].mxu0 %vm850_vm5, %v5872_v58  ;;  %6637 = vmatprep.mubr.msk.f32.mxu1 %vm850_vm5, %v5833_v59  ;;  %v1679_v2 = vsel %vm823_vm6, %v7945_v4, %v1673_v61  ;;  %v1187_v3 = vsel %vm823_vm6, %v7948_v5, %v1181_v62  ;;  %v5881_v4 = vld [vmem:[%s9146_s30 + $0xe0] sm:$0xff]  ;;  %v5882_v5 = vld [vmem:[%s9146_s30 + $0xe8] sm:$0xff] }
 0x1a8   : >> { %6669 = vmatprep.mubr.msk.f32.mxu0 %vm850_vm5, %v5873_v60 }
 0x1aa   : >> { %v1677_v6 = vpop.permute.xlu1 %1676  ;;  %6638 = vmatmul.mubr.msk.f32.gmra.mrb[2].mxu1 %vm850_vm5, %v5834_v63  ;;  %v1185_v7 = vpop.permute.xlu0 %1184 }
 0x1ab   : >> { %v1680_v8 = vsel %vm825_vm7, %v1679_v2, %v1677_v6  ;;  %v1188_v9 = vsel %vm825_vm7, %v1187_v3, %v1185_v7  ;;  %6670 = vmatmul.mubr.msk.f32.gmra.mrb[2].mxu0 %vm850_vm5, %v5874_v0  ;;  %6642 = vmatprep.mubr.msk.f32.mxu1 %vm850_vm5, %v5841_v1 }
 0x1ac   : >> { %6640 = vmatprep.subr.msk.mxu1 %vm863_vm8, %v1188_v9  ;;  %6672 = vmatprep.subr.msk.mxu0 %vm863_vm8, %v1680_v8 }
 0x1ad   : >> { %6641 = vmatpush3.msk.msra.mxu1 %vm863_vm8, %v1188_v9  ;;  %6673 = vmatpush3.msk.msra.mxu0 %vm863_vm8, %v1680_v8 }
 0x1ae   : >> { %6643 = vmatmul.mubr.msk.f32.vlgmr.msra.gmra.mrb[0].mxu1 %vm850_vm5, %v5842_v11  ;;  %7240 = vmatprep.subr.msk.mxu1 %vm863_vm8, %v7994_v28  ;;  %v1796_v13 = vpop.permute.xlu0 %1795  ;;  %v1800_v14 = vpop.permute.xlu1 %1799 }
 0x1af   : >> { %6674 = vmatprep.mubr.msk.f32.mxu0 %vm850_vm5, %v5881_v4  ;;  %7241 = vmatpush3.msk.msra.mxu1 %vm863_vm8, %v7994_v28  ;;  %v1802_v16 = vsel %vm823_vm6, %v7959_v10, %v1796_v13  ;;  %v5884_v10 = vld [vmem:[%s9146_s30 + $0xf8] sm:$0xff] }
 0x1b0   : >> { %6675 = vmatmul.mubr.msk.f32.vlgmr.msra.gmra.mrb[0].mxu0 %vm850_vm5, %v5882_v5  ;;  %v1803_v18 = vsel %vm825_vm7, %v1802_v16, %v1800_v14  ;;  %6645 = vmatprep.mubr.msk.f32.mxu1 %vm850_vm5, %v5843_v12 }
 0x1b1   : >> { %6677 = vmatprep.mubr.msk.f32.mxu0 %vm850_vm5, %v5883_v15  ;;  %6680 = vmatprep.subr.msk.mxu0 %vm863_vm8, %v1803_v18 }
 0x1b2   : >> { %6646 = vmatmul.mubr.msk.f32.gmra.mrb[2].mxu1 %vm850_vm5, %v5844_v17  ;;  %6681 = vmatpush3.msk.msra.mxu0 %vm863_vm8, %v1803_v18 }
 0x1b3   : >> { %6653 = vmatprep.mubr.msk.f32.mxu1 %vm850_vm5, %v5853_v19 }
 0x1b4   : >> { %6678 = vmatmul.mubr.msk.f32.gmra.mrb[2].mxu0 %vm850_vm5, %v5884_v10 }
 0x1b5   : >> { %6682 = vmatprep.mubr.msk.f32.mxu0 %vm850_vm5, %v5891_v20 }
 0x1b8   : >> { %6683 = vmatmul.mubr.msk.f32.vlgmr.msra.gmra.mrb[0].mxu0 %vm850_vm5, %v5892_v21 }
 0x1b9   : >> { %6685 = vmatprep.mubr.msk.f32.mxu0 %vm850_vm5, %v5893_v22 }
 0x1ba   : >> { %6654 = vmatmul.mubr.msk.f32.vlgmr.msra.gmra.mrb[2].mxu1 %vm850_vm5, %v5854_v23 }
 0x1bc   : >> { %6686 = vmatmul.mubr.msk.f32.gmra.mrb[2].mxu0 %vm850_vm5, %v5894_v24 }
 0x1bf   : >> { %v1920_v29 = vpop.permute.xlu0 %1919  ;;  %v1925_v32 = vpop.permute.xlu1 %1924 }
 0x1c3   : >> { %v1935_v44 = vpop.permute.xlu0 %1934  ;;  %v1930_v46 = vpop.permute.xlu1 %1929 }
 0x281   : >> { %v6644_v25 = vpop.f32.mrb[0].mxu1 }
 0x282   : >> { %v1275_v26 = vpop.f32.mrb[1].mxu1 }
 0x28b   : >> { %v6684_v28 = vpop.f32.mrb[0].mxu0 }
 0x28c   : >> { %v7242_v30 = vadd.f32 %v6684_v28, %v6644_v25  ;;  %v1890_v31 = vpop.f32.mrb[1].mxu0 }
 0x28d   : >> { %v7243_v33 = vadd.f32 %v1890_v31, %v1275_v26  ;;  %v6655_v34 = vpop.f32.mrb[2].mxu1 }
 0x28e   : >> { %v1938_v35 = vadd.f32 %v7242_v30, %v1925_v32  ;;  %v1408_v36 = vpop.f32.mrb[3].mxu1 }
 0x28f   : >> { %v1937_v37 = vadd.f32 %v7243_v33, %v1920_v29  ;;  %v6687_v38 = vpop.f32.mrb[2].mxu0 }
 0x290   : >> { %vm1942_vm9 = vcmp.ge.f32.partialorder %v1938_v35, 0.0  ;;  %v1946_v39 = vmul.f32 0.1, %v1938_v35  ;;  %v7244_v40 = vadd.f32 %v6687_v38, %v6655_v34  ;;  %v1900_v41 = vpop.f32.mrb[3].mxu0 }
 0x291   : >> { %vm1941_vm11 = vcmp.ge.f32.partialorder %v1937_v37, 0.0  ;;  %v1945_v42 = vmul.f32 0.1, %v1937_v37  ;;  %v7245_v43 = vadd.f32 %v1900_v41, %v1408_v36 }
 0x292   : >> { %v1940_v45 = vadd.f32 %v7244_v40, %v1935_v44  ;;  %v1950_v47 = vsel %vm1942_vm9, %v1938_v35, %v1946_v39 }
 0x293   : >> { %v1939_v48 = vadd.f32 %v7245_v43, %v1930_v46  ;;  %v1949_v49 = vsel %vm1941_vm11, %v1937_v37, %v1945_v42  ;;  %1957 = vst.msk [vmem:[%s1954_s22 + $0x8] sm:$0xff] %vm1955_vm10, %v1950_v47 }
 0x294   : >> { %vm1944_vm12 = vcmp.ge.f32.partialorder %v1940_v45, 0.0  ;;  %v1948_v50 = vmul.f32 0.1, %v1940_v45  ;;  %v7467_v51 = vpack.i.bf16 %v1950_v47, %v1949_v49  ;;  %1956 = vst.msk [vmem:[%s1954_s22] sm:$0xff] %vm1955_vm10, %v1949_v49 }
 0x295   : >> { %vm1943_vm13 = vcmp.ge.f32.partialorder %v1939_v48, 0.0  ;;  %v1947_v52 = vmul.f32 0.1, %v1939_v48 }
 0x296   : >> { %7468 = vrot.lane.b32.xlu1 %v7467_v51, %s7647_s21  ;;  %v1952_v53 = vsel %vm1944_vm12, %v1940_v45, %v1948_v50 }
 0x297   : >> { %v1951_v54 = vsel %vm1943_vm13, %v1939_v48, %v1947_v52  ;;  %1959 = vst.msk [vmem:[%s1954_s22 + $0x18] sm:$0xff] %vm1955_vm10, %v1952_v53 }
 0x298   : >> { %1958 = vst.msk [vmem:[%s1954_s22 + $0x10] sm:$0xff] %vm1955_vm10, %v1951_v54  ;;  %v7472_v55 = vpack.i.bf16 %v1952_v53, %v1951_v54 }
 0x29a   : >> { %7473 = vrot.lane.b32.xlu0 %v7472_v55, %s7647_s21 }
 0x308   : >> { %v7469_v56 = vpop.permute.xlu1 %7468 }
 0x309   : >> { %v7471_v57 = vunpack.i.h.bf16 %v7469_v56  ;;  %v7470_v58 = vunpack.i.l.bf16 %v7469_v56 }
 0x30b   : >> { %v1978_v59 = vsel %vm1976_vm14, 0.0, %v7471_v57  ;;  %v1977_v60 = vsel %vm1976_vm14, 0.0, %v7470_v58 }
 0x30c   : >> { %v1983_v61 = vsel %vm1981_vm15, %v1978_v59, 0.0  ;;  %v1982_v62 = vsel %vm1981_vm15, %v1977_v60, 0.0  ;;  %v7474_v63 = vpop.permute.xlu0 %7473 }
 0x30d   : >> { %v1986_v0 = vpack.c.bf16 %v1983_v61, %v1982_v62  ;;  %v7476_v1 = vunpack.i.h.bf16 %v7474_v63  ;;  %v7475_v2 = vunpack.i.l.bf16 %v7474_v63  ;;  %810 = sbr.rel (!%p808_p4) target bundleno = 273 (0x111), region = 302 }
 0x30f   : >> { %5902 = vst.msk [vmem:[%s5535_s12 + $0x40] sm:$0xff] %vm1991_vm0, %v1986_v0  ;;  %v1980_v3 = vsel %vm1976_vm14, 0.0, %v7476_v1  ;;  %v1979_v6 = vsel %vm1976_vm14, 0.0, %v7475_v2 }
 0x310   : >> { %v1985_v7 = vsel %vm1981_vm15, %v1980_v3, 0.0  ;;  %v1984_v8 = vsel %vm1981_vm15, %v1979_v6, 0.0 }
 0x311   : >> { %v1987_v9 = vpack.c.bf16 %v1985_v7, %v1984_v8 }
 0x313   : >> { %5903 = vst.msk [vmem:[%s5535_s12 + $0x48] sm:$0xff] %vm1991_vm0, %v1987_v9 }
 0x314 LB: >> { %s6279_s13 = sshll.u32 %s7624_s23, 5  ;;  %s7648_s15 = smov 127   ;;  %vm2076_vm1 = vcmask 785408   ;;  %v7489_v14 = vld [vmem:[%s9109_s4 + $0x40] sm:$0xff]   ;;  %v7491_v15 = vld [vmem:[%s9109_s4 + $0x10] sm:$0xff]   ;;  %v2856_v29 = vld [vmem:[%s9110_s5 + $0x8] sm:$0xff]  ;;  %s7624_s23 = sphi %s8204_s23, %s2016_s23  }
 0x315   : >> { %s8212_s0 = scalar_lea.vmem [#allocation3], %s6279_s13  ;;  %s7649_s16 = smov 126   ;;  %6764 = vmatprep.mubr.msk.bf16.mxu0 %vm2076_vm1, %v7489_v14  ;;  %6700 = vmatprep.mubr.msk.bf16.mxu1 %vm2076_vm1, %v7491_v15  ;;  %v2855_v30 = vld [vmem:[%s9110_s5] sm:$0xff]  ;;  %v7650_v31 = vmov 0   ;;  %v2857_v32 = vld [vmem:[%s9110_s5 + $0x10] sm:$0xff]  ;;  %v2858_v33 = vld [vmem:[%s9110_s5 + $0x18] sm:$0xff] }
 0x316   : >> { %7478 = vset.pattern.permute.xlu1 %v7650_v31  ;;  %7477 = vset.pattern.permute.xlu0 %v7650_v31  ;;  %v7490_v40 = vld [vmem:[%s9109_s4 + $0x48] sm:$0xff]   ;;  %v7493_v42 = vld [vmem:[%s9109_s4 + $0x50] sm:$0xff]   ;;  %v7492_v46 = vld [vmem:[%s9109_s4 + $0x18] sm:$0xff]   ;;  %s2896_s21 = scalar_lea.vmem %s7838_s20, %s6279_s13  ;;  %s7651_s13 = smov 1  }
 0x317   : >> { %v7495_v48 = vld [vmem:[%s9109_s4] sm:$0xff]   ;;  %v7494_v53 = vld [vmem:[%s9109_s4 + $0x58] sm:$0xff]   ;;  %v7496_v58 = vld [vmem:[%s9109_s4 + $0x8] sm:$0xff]   ;;  %s6008_s26 = sshll.u32 %s7624_s23, 4  ;;  %s2016_s23 = sadd.s32 1, %s7624_s23  }
 0x318   : >> { %v7497_v56 = vld [vmem:[%s9109_s4 + $0x60] sm:$0xff]   ;;  %v7498_v1 = vld [vmem:[%s9109_s4 + $0x68] sm:$0xff]   ;;  %v7501_v6 = vld [vmem:[%s9109_s4 + $0x70] sm:$0xff]   ;;  %s5574_s12 = scalar_lea.vmem [#allocation4], %s6008_s26  ;;  %p2013_p5 = scmp.ge.s32.totalorder %s2016_s23, 8  }
 0x319   : >> { %v7499_v60 = vld [vmem:[%s9109_s4 + $0x20] sm:$0xff]   ;;  %v7500_v8 = vld [vmem:[%s9109_s4 + $0x28] sm:$0xff]   ;;  %v7502_v14 = vld [vmem:[%s9109_s4 + $0x78] sm:$0xff]   ;;  %2937 = vst [vmem:[#allocation5] sm:$0xff] (%p2013_p5), %v7643_v27  ;;  %s8473_s20 = smov (%p2013_p5), 0  }
 0x31a   : >> { %v5949_v11 = vld [vmem:[%s8212_s0 + $0x40] sm:$0xff]  ;;  %v5909_v4 = vld [vmem:[%s8212_s0 + $0x10] sm:$0xff]  ;;  %v5950_v5 = vld [vmem:[%s8212_s0 + $0x48] sm:$0xff]  ;;  %2938 = vst [vmem:[#allocation5 + $0x8] sm:$0xff] (%p2013_p5), %v7643_v27 }
 0x31b   : >> { %2393 = vrot.lane.b32.xlu0 %v5949_v11, %s7648_s15  ;;  %2399 = vrot.lane.b32.xlu1 %v5949_v11, %s7649_s16  ;;  %v5910_v12 = vld [vmem:[%s8212_s0 + $0x18] sm:$0xff]  ;;  %v8223_v13 = vld [vmem:[%s8212_s0 + $0x50] sm:$0xff]  ;;  %2939 = vst [vmem:[#allocation5 + $0x10] sm:$0xff] (%p2013_p5), %v7643_v27  ;;  %2940 = vst [vmem:[#allocation5 + $0x18] sm:$0xff] (%p2013_p5), %v7643_v27 }
 0x31c   : >> { %6752 = vmatprep.subr.bf16.mxu0 %v5949_v11  ;;  %6688 = vmatprep.subr.bf16.mxu1 %v5909_v4  ;;  %v8236_v16 = vld [vmem:[%s8212_s0 + $0x58] sm:$0xff]  ;;  %v8249_v17 = vld [vmem:[%s8212_s0] sm:$0xff]  ;;  %v8259_v19 = vld [vmem:[%s8212_s0 + $0x8] sm:$0xff]  ;;  %2941 = vst [vmem:[#allocation5 + $0x20] sm:$0xff] (%p2013_p5), %v7643_v27 }
 0x31d   : >> { %6753 = vmatpush3.bf16.msra.mxu0 %v5949_v11  ;;  %6689 = vmatpush3.bf16.msra.mxu1 %v5909_v4  ;;  %v8252_v18 = vld [vmem:[%s8212_s0 + $0x60] sm:$0xff]  ;;  %v8262_v10 = vld [vmem:[%s8212_s0 + $0x68] sm:$0xff]  ;;  %v8280_v21 = vld [vmem:[%s8212_s0 + $0x70] sm:$0xff]  ;;  %2942 = vst [vmem:[#allocation5 + $0x28] sm:$0xff] (%p2013_p5), %v7643_v27 }
 0x31e   : >> { %6754 = vmatprep.subr.bf16.mxu0 %v5950_v5  ;;  %6690 = vmatprep.subr.bf16.mxu1 %v5910_v12  ;;  %v8277_v20 = vld [vmem:[%s8212_s0 + $0x20] sm:$0xff]  ;;  %v8287_v22 = vld [vmem:[%s8212_s0 + $0x28] sm:$0xff]  ;;  %v8290_v23 = vld [vmem:[%s8212_s0 + $0x78] sm:$0xff]  ;;  %2943 = vst [vmem:[#allocation5 + $0x30] sm:$0xff] (%p2013_p5), %v7643_v27 }
 0x31f   : >> { %2395 = vrot.lane.b32.xlu0 %v5950_v5, %s7648_s15  ;;  %2401 = vrot.lane.b32.xlu1 %v5950_v5, %s7649_s16  ;;  %v8305_v24 = vld [vmem:[%s8212_s0 + $0x30] sm:$0xff]  ;;  %v8308_v25 = vld [vmem:[%s8212_s0 + $0x80] sm:$0xff]  ;;  %2944 = vst [vmem:[#allocation5 + $0x38] sm:$0xff] (%p2013_p5), %v7643_v27  ;;  %2946 = vst [vmem:[#allocation5 + $0x80] sm:$0xff] (%p2013_p5), %v7643_v27 }
 0x320   : >> { %v8315_v26 = vld [vmem:[%s8212_s0 + $0x38] sm:$0xff]  ;;  %v8318_v28 = vld [vmem:[%s8212_s0 + $0x88] sm:$0xff]  ;;  %v7503_v11 = vld [vmem:[%s9109_s4 + $0x30] sm:$0xff]   ;;  %2947 = vst [vmem:[#allocation5 + $0x88] sm:$0xff] (%p2013_p5), %v7643_v27 }
 0x321   : >> { %6755 = vmatpush3.bf16.msra.mxu0 %v5950_v5  ;;  %6691 = vmatpush3.bf16.msra.mxu1 %v5910_v12  ;;  %2948 = vst [vmem:[#allocation5 + $0x90] sm:$0xff] (%p2013_p5), %v7643_v27  ;;  %2949 = vst [vmem:[#allocation5 + $0x98] sm:$0xff] (%p2013_p5), %v7643_v27 }
 0x322   : > { %2950 = vst [vmem:[#allocation5 + $0xa0] sm:$0xff] (%p2013_p5), %v7643_v27  ;;  %2951 = vst [vmem:[#allocation5 + $0xa8] sm:$0xff] (%p2013_p5), %v7643_v27 }
 0x323   : >> { %2049 = vrot.lane.b32.xlu0 %v5909_v4, %s7648_s15  ;;  %2487 = vrot.lane.b32.xlu1 %v8223_v13, %s7648_s15  ;;  %2952 = vst [vmem:[#allocation5 + $0xb0] sm:$0xff] (%p2013_p5), %v7643_v27  ;;  %2953 = vst [vmem:[#allocation5 + $0xb8] sm:$0xff] (%p2013_p5), %v7643_v27 }
 0x327   : >> { %2051 = vrot.lane.b32.xlu0 %v5910_v12, %s7648_s15  ;;  %2489 = vrot.lane.b32.xlu1 %v8236_v16, %s7648_s15 }
 0x32b   : >> { %2055 = vrot.lane.b32.xlu0 %v5909_v4, %s7649_s16  ;;  %2493 = vrot.lane.b32.xlu1 %v8223_v13, %s7649_s16 }
 0x32f   : >> { %2057 = vrot.lane.b32.xlu0 %v5910_v12, %s7649_s16  ;;  %2495 = vrot.lane.b32.xlu1 %v8236_v16, %s7649_s16 }
 0x333   : >> { %2025 = vrot.lane.b32.xlu0 %v8249_v17, %s7648_s15  ;;  %2581 = vrot.lane.b32.xlu1 %v8252_v18, %s7648_s15 }
 0x337   : >> { %2027 = vrot.lane.b32.xlu0 %v8259_v19, %s7648_s15  ;;  %2583 = vrot.lane.b32.xlu1 %v8262_v10, %s7648_s15 }
 0x33b   : >> { %2031 = vrot.lane.b32.xlu0 %v8249_v17, %s7649_s16  ;;  %2587 = vrot.lane.b32.xlu1 %v8252_v18, %s7649_s16 }
 0x33f   : >> { %2033 = vrot.lane.b32.xlu0 %v8259_v19, %s7649_s16  ;;  %2589 = vrot.lane.b32.xlu1 %v8262_v10, %s7649_s16 }
 0x343   : >> { %2205 = vrot.lane.b32.xlu0 %v8277_v20, %s7648_s15  ;;  %2675 = vrot.lane.b32.xlu1 %v8280_v21, %s7648_s15 }
 0x347   : >> { %2207 = vrot.lane.b32.xlu0 %v8287_v22, %s7648_s15  ;;  %2677 = vrot.lane.b32.xlu1 %v8290_v23, %s7648_s15 }
 0x34b   : >> { %2211 = vrot.lane.b32.xlu0 %v8277_v20, %s7649_s16  ;;  %2681 = vrot.lane.b32.xlu1 %v8280_v21, %s7649_s16 }
 0x34f   : >> { %2213 = vrot.lane.b32.xlu0 %v8287_v22, %s7649_s16  ;;  %2683 = vrot.lane.b32.xlu1 %v8290_v23, %s7649_s16 }
 0x353   : >> { %2299 = vrot.lane.b32.xlu0 %v8305_v24, %s7648_s15  ;;  %2769 = vrot.lane.b32.xlu1 %v8308_v25, %s7648_s15 }
 0x357   : >> { %2301 = vrot.lane.b32.xlu0 %v8315_v26, %s7648_s15  ;;  %2771 = vrot.lane.b32.xlu1 %v8318_v28, %s7648_s15 }
 0x35b   : >> { %2305 = vrot.lane.b32.xlu0 %v8305_v24, %s7649_s16  ;;  %2775 = vrot.lane.b32.xlu1 %v8308_v25, %s7649_s16 }
 0x35f   : >> { %2307 = vrot.lane.b32.xlu0 %v8315_v26, %s7649_s16  ;;  %2777 = vrot.lane.b32.xlu1 %v8318_v28, %s7649_s16 }
 0x363   : >> { %2866 = vperm.xlu1 %7478, %v2856_v29   ;;  %2861 = vperm.xlu0 %7477, %v2855_v30  }
 0x367   : >> { %2871 = vperm.xlu1 %7478, %v2857_v32   ;;  %2876 = vperm.xlu0 %7477, %v2858_v33  }
 0x38d   : >> { %v2394_v34 = vpop.permute.xlu0 %2393  ;;  %v2400_v35 = vpop.permute.xlu1 %2399 }
 0x38e   : >> { %6756 = vmatprep.subr.bf16.mxu0 %v2394_v34 }
 0x38f   : >> { %6757 = vmatpush3.bf16.msra.mxu0 %v2394_v34 }
 0x391   : >> { %v2396_v36 = vpop.permute.xlu0 %2395  ;;  %v2402_v38 = vpop.permute.xlu1 %2401 }
 0x392   : >> { %6758 = vmatprep.subr.bf16.mxu0 %v2396_v36 }
 0x393   : >> { %6759 = vmatpush3.bf16.msra.mxu0 %v2396_v36 }
 0x394   : >> { %6760 = vmatprep.subr.bf16.mxu0 %v2400_v35 }
 0x395   : >> { %v2050_v37 = vpop.permute.xlu0 %2049  ;;  %v2488_v41 = vpop.permute.xlu1 %2487 }
 0x396   : >> { %6692 = vmatprep.subr.bf16.mxu1 %v2050_v37 }
 0x397   : >> { %6693 = vmatpush3.bf16.msra.mxu1 %v2050_v37  ;;  %6761 = vmatpush3.bf16.msra.mxu0 %v2400_v35 }
 0x398   : >> { %6762 = vmatprep.subr.bf16.mxu0 %v2402_v38 }
 0x399   : >> { %v2052_v39 = vpop.permute.xlu0 %2051  ;;  %v2490_v45 = vpop.permute.xlu1 %2489 }
 0x39a   : >> { %6694 = vmatprep.subr.bf16.mxu1 %v2052_v39 }
 0x39b   : >> { %6695 = vmatpush3.bf16.msra.mxu1 %v2052_v39  ;;  %6763 = vmatpush3.bf16.msra.mxu0 %v2402_v38 }
 0x39c   : >> { %6768 = vmatprep.subr.bf16.mxu0 %v8223_v13 }
 0x39d   : >> { %v2056_v43 = vpop.permute.xlu0 %2055  ;;  %v2494_v49 = vpop.permute.xlu1 %2493 }
 0x39e   : >> { %6696 = vmatprep.subr.bf16.mxu1 %v2056_v43  ;;  %6765 = vmatmul.mubr.msk.bf16.vlgmr.msra.gmra.mrb[0].mxu0 %vm2076_vm1, %v7490_v40 }
 0x39f   : >> { %6697 = vmatpush3.bf16.msra.mxu1 %v2056_v43  ;;  %6769 = vmatpush3.bf16.msra.mxu0 %v8223_v13 }
 0x3a0   : >> { %6770 = vmatprep.subr.bf16.mxu0 %v8236_v16  ;;  %6780 = vmatprep.mubr.msk.bf16.mxu0 %vm2076_vm1, %v7493_v42 }
 0x3a1   : >> { %v2058_v44 = vpop.permute.xlu0 %2057  ;;  %v2496_v51 = vpop.permute.xlu1 %2495 }
 0x3a2   : >> { %6698 = vmatprep.subr.bf16.mxu1 %v2058_v44 }
 0x3a3   : >> { %6699 = vmatpush3.bf16.msra.mxu1 %v2058_v44  ;;  %6771 = vmatpush3.bf16.msra.mxu0 %v8236_v16 }
 0x3a4   : >> { %6704 = vmatprep.subr.bf16.mxu1 %v8249_v17  ;;  %6772 = vmatprep.subr.bf16.mxu0 %v2488_v41 }
 0x3a5   : >> { %v2026_v47 = vpop.permute.xlu0 %2025  ;;  %v2582_v54 = vpop.permute.xlu1 %2581 }
 0x3a6   : >> { %6701 = vmatmul.mubr.msk.bf16.vlgmr.msra.gmra.mrb[0].mxu1 %vm2076_vm1, %v7492_v46 }
 0x3a7   : >> { %6705 = vmatpush3.bf16.msra.mxu1 %v8249_v17  ;;  %6773 = vmatpush3.bf16.msra.mxu0 %v2488_v41  ;;  %v7505_v17 = vld [vmem:[%s9109_s4 + $0x80] sm:$0xff]  }
 0x3a8   : >> { %6706 = vmatprep.subr.bf16.mxu1 %v8259_v19  ;;  %6774 = vmatprep.subr.bf16.mxu0 %v2490_v45 }
 0x3a9   : >> { %v2028_v50 = vpop.permute.xlu0 %2027  ;;  %6716 = vmatprep.mubr.msk.bf16.mxu1 %vm2076_vm1, %v7495_v48  ;;  %v2584_v57 = vpop.permute.xlu1 %2583 }
 0x3ab   : >> { %6707 = vmatpush3.bf16.msra.mxu1 %v8259_v19  ;;  %6775 = vmatpush3.bf16.msra.mxu0 %v2490_v45  ;;  %v7504_v19 = vld [vmem:[%s9109_s4 + $0x38] sm:$0xff]  }
 0x3ac   : >> { %6708 = vmatprep.subr.bf16.mxu1 %v2026_v47  ;;  %6776 = vmatprep.subr.bf16.mxu0 %v2494_v49 }
 0x3ad   : >> { %v2032_v52 = vpop.permute.xlu0 %2031  ;;  %v2588_v61 = vpop.permute.xlu1 %2587 }
 0x3af   : >> { %6709 = vmatpush3.bf16.msra.mxu1 %v2026_v47  ;;  %6777 = vmatpush3.bf16.msra.mxu0 %v2494_v49 }
 0x3b0   : >> { %6710 = vmatprep.subr.bf16.mxu1 %v2028_v50  ;;  %6778 = vmatprep.subr.bf16.mxu0 %v2496_v51 }
 0x3b1   : >> { %v2034_v55 = vpop.permute.xlu0 %2033  ;;  %v2590_v63 = vpop.permute.xlu1 %2589 }
 0x3b3   : >> { %6711 = vmatpush3.bf16.msra.mxu1 %v2028_v50  ;;  %6779 = vmatpush3.bf16.msra.mxu0 %v2496_v51 }
 0x3b4   : >> { %6712 = vmatprep.subr.bf16.mxu1 %v2032_v52  ;;  %6784 = vmatprep.subr.bf16.mxu0 %v8252_v18 }
 0x3b5   : >> { %v2206_v59 = vpop.permute.xlu0 %2205  ;;  %v2676_v2 = vpop.permute.xlu1 %2675 }
 0x3b6   : >> { %6781 = vmatmul.mubr.msk.bf16.vlgmr.msra.gmra.mrb[0].mxu0 %vm2076_vm1, %v7494_v53 }
 0x3b7   : >> { %6713 = vmatpush3.bf16.msra.mxu1 %v2032_v52  ;;  %6785 = vmatpush3.bf16.msra.mxu0 %v8252_v18 }
 0x3b8   : >> { %6714 = vmatprep.subr.bf16.mxu1 %v2034_v55  ;;  %6786 = vmatprep.subr.bf16.mxu0 %v8262_v10 }
 0x3b9   : >> { %6796 = vmatprep.mubr.msk.bf16.mxu0 %vm2076_vm1, %v7497_v56  ;;  %v2208_v62 = vpop.permute.xlu0 %2207  ;;  %v2678_v7 = vpop.permute.xlu1 %2677 }
 0x3bb   : >> { %6715 = vmatpush3.bf16.msra.mxu1 %v2034_v55  ;;  %6787 = vmatpush3.bf16.msra.mxu0 %v8262_v10 }
 0x3bc   : >> { %6720 = vmatprep.subr.bf16.mxu1 %v8277_v20  ;;  %6788 = vmatprep.subr.bf16.mxu0 %v2582_v54 }
 0x3bd   : >> { %v2212_v0 = vpop.permute.xlu0 %2211  ;;  %v2682_v4 = vpop.permute.xlu1 %2681 }
 0x3be   : >> { %6717 = vmatmul.mubr.msk.bf16.vlgmr.msra.gmra.mrb[0].mxu1 %vm2076_vm1, %v7496_v58 }
 0x3bf   : >> { %6721 = vmatpush3.bf16.msra.mxu1 %v8277_v20  ;;  %6789 = vmatpush3.bf16.msra.mxu0 %v2582_v54 }
 0x3c0   : >> { %6722 = vmatprep.subr.bf16.mxu1 %v8287_v22  ;;  %6790 = vmatprep.subr.bf16.mxu0 %v2584_v57 }
 0x3c1   : >> { %6732 = vmatprep.mubr.msk.bf16.mxu1 %vm2076_vm1, %v7499_v60  ;;  %v2214_v3 = vpop.permute.xlu0 %2213  ;;  %v2684_v12 = vpop.permute.xlu1 %2683 }
 0x3c3   : >> { %6723 = vmatpush3.bf16.msra.mxu1 %v8287_v22  ;;  %6791 = vmatpush3.bf16.msra.mxu0 %v2584_v57 }
 0x3c4   : >> { %6724 = vmatprep.subr.bf16.mxu1 %v2206_v59  ;;  %6792 = vmatprep.subr.bf16.mxu0 %v2588_v61 }
 0x3c5   : >> { %v2300_v9 = vpop.permute.xlu0 %2299  ;;  %v2770_v15 = vpop.permute.xlu1 %2769 }
 0x3c7   : >> { %6725 = vmatpush3.bf16.msra.mxu1 %v2206_v59  ;;  %6793 = vmatpush3.bf16.msra.mxu0 %v2588_v61 }
 0x3c8   : >> { %6726 = vmatprep.subr.bf16.mxu1 %v2208_v62  ;;  %6794 = vmatprep.subr.bf16.mxu0 %v2590_v63 }
 0x3c9   : >> { %v2302_v5 = vpop.permute.xlu0 %2301  ;;  %v2772_v18 = vpop.permute.xlu1 %2771 }
 0x3cb   : >> { %6727 = vmatpush3.bf16.msra.mxu1 %v2208_v62  ;;  %6795 = vmatpush3.bf16.msra.mxu0 %v2590_v63 }
 0x3cc   : >> { %6728 = vmatprep.subr.bf16.mxu1 %v2212_v0  ;;  %6800 = vmatprep.subr.bf16.mxu0 %v8280_v21 }
 0x3cd   : >> { %v2306_v13 = vpop.permute.xlu0 %2305  ;;  %v2776_v10 = vpop.permute.xlu1 %2775 }
 0x3ce   : >> { %6797 = vmatmul.mubr.msk.bf16.vlgmr.msra.gmra.mrb[0].mxu0 %vm2076_vm1, %v7498_v1 }
 0x3cf   : >> { %6729 = vmatpush3.bf16.msra.mxu1 %v2212_v0  ;;  %6801 = vmatpush3.bf16.msra.mxu0 %v8280_v21  ;;  %v7506_v21 = vld [vmem:[%s9109_s4 + $0x88] sm:$0xff]  }
 0x3d0   : >> { %6730 = vmatprep.subr.bf16.mxu1 %v2214_v3  ;;  %6802 = vmatprep.subr.bf16.mxu0 %v8290_v23 }
 0x3d1   : >> { %6812 = vmatprep.mubr.msk.bf16.mxu0 %vm2076_vm1, %v7501_v6  ;;  %v2308_v16 = vpop.permute.xlu0 %2307  ;;  %v2778_v20 = vpop.permute.xlu1 %2777 }
 0x3d3   : >> { %6731 = vmatpush3.bf16.msra.mxu1 %v2214_v3  ;;  %6803 = vmatpush3.bf16.msra.mxu0 %v8290_v23 }
 0x3d4   : >> { %6736 = vmatprep.subr.bf16.mxu1 %v8305_v24  ;;  %6804 = vmatprep.subr.bf16.mxu0 %v2676_v2 }
 0x3d6   : >> { %6733 = vmatmul.mubr.msk.bf16.vlgmr.msra.gmra.mrb[0].mxu1 %vm2076_vm1, %v7500_v8 }
 0x3d7   : >> { %6737 = vmatpush3.bf16.msra.mxu1 %v8305_v24  ;;  %6805 = vmatpush3.bf16.msra.mxu0 %v2676_v2 }
 0x3d8   : >> { %6738 = vmatprep.subr.bf16.mxu1 %v8315_v26  ;;  %6806 = vmatprep.subr.bf16.mxu0 %v2678_v7 }
 0x3d9   : >> { %6748 = vmatprep.mubr.msk.bf16.mxu1 %vm2076_vm1, %v7503_v11 }
 0x3db   : >> { %6739 = vmatpush3.bf16.msra.mxu1 %v8315_v26  ;;  %6807 = vmatpush3.bf16.msra.mxu0 %v2678_v7 }
 0x3dc   : >> { %6740 = vmatprep.subr.bf16.mxu1 %v2300_v9  ;;  %6808 = vmatprep.subr.bf16.mxu0 %v2682_v4 }
 0x3df   : >> { %6741 = vmatpush3.bf16.msra.mxu1 %v2300_v9  ;;  %6809 = vmatpush3.bf16.msra.mxu0 %v2682_v4 }
 0x3e0   : >> { %6742 = vmatprep.subr.bf16.mxu1 %v2302_v5  ;;  %6810 = vmatprep.subr.bf16.mxu0 %v2684_v12 }
 0x3e2   : >> { %v2867_v26 = vpop.permute.xlu1 %2866 }
 0x3e3   : >> { %6743 = vmatpush3.bf16.msra.mxu1 %v2302_v5  ;;  %6811 = vmatpush3.bf16.msra.mxu0 %v2684_v12 }
 0x3e4   : >> { %6744 = vmatprep.subr.bf16.mxu1 %v2306_v13  ;;  %6816 = vmatprep.subr.bf16.mxu0 %v8308_v25 }
 0x3e6   : >> { %6813 = vmatmul.mubr.msk.bf16.vlgmr.msra.gmra.mrb[0].mxu0 %vm2076_vm1, %v7502_v14  ;;  %v2872_v30 = vpop.permute.xlu1 %2871 }
 0x3e7   : >> { %6745 = vmatpush3.bf16.msra.mxu1 %v2306_v13  ;;  %6817 = vmatpush3.bf16.msra.mxu0 %v8308_v25 }
 0x3e8   : >> { %6746 = vmatprep.subr.bf16.mxu1 %v2308_v16  ;;  %6818 = vmatprep.subr.bf16.mxu0 %v8318_v28 }
 0x3e9   : >> { %6828 = vmatprep.mubr.msk.bf16.mxu0 %vm2076_vm1, %v7505_v17 }
 0x3eb   : >> { %6747 = vmatpush3.bf16.msra.mxu1 %v2308_v16  ;;  %6819 = vmatpush3.bf16.msra.mxu0 %v8318_v28  ;;  %v2862_v28 = vpop.permute.xlu0 %2861 }
 0x3ec   : >> { %6820 = vmatprep.subr.bf16.mxu0 %v2770_v15 }
 0x3ee   : >> { %6749 = vmatmul.mubr.msk.bf16.vlgmr.msra.gmra.mrb[0].mxu1 %vm2076_vm1, %v7504_v19 }
 0x3ef   : >> { %6821 = vmatpush3.bf16.msra.mxu0 %v2770_v15  ;;  %v2877_v39 = vpop.permute.xlu0 %2876 }
 0x3f0   : >> { %6822 = vmatprep.subr.bf16.mxu0 %v2772_v18 }
 0x3f3   : >> { %6823 = vmatpush3.bf16.msra.mxu0 %v2772_v18 }
 0x3f4   : >> { %6824 = vmatprep.subr.bf16.mxu0 %v2776_v10 }
 0x3f7   : >> { %6825 = vmatpush3.bf16.msra.mxu0 %v2776_v10 }
 0x3f8   : >> { %6826 = vmatprep.subr.bf16.mxu0 %v2778_v20 }
 0x3fb   : >> { %6827 = vmatpush3.bf16.msra.mxu0 %v2778_v20 }
 0x3fe   : >> { %6829 = vmatmul.mubr.msk.bf16.vlgmr.msra.gmra.mrb[0].mxu0 %vm2076_vm1, %v7506_v21 }
 0x4c1   : >> { %v6750_v22 = vpop.f32.mrb[0].mxu1 }
 0x4c2   : >> { %v2366_v23 = vpop.f32.mrb[1].mxu1 }
 0x4c3   : >> { %v6751_v24 = vpop.f32.mrb[2].mxu1 }
 0x4c4   : >> { %v2369_v25 = vpop.f32.mrb[3].mxu1 }
 0x4d1   : >> { %v6830_v29 = vpop.f32.mrb[0].mxu0 }
 0x4d2   : >> { %v7274_v31 = vadd.f32 %v6830_v29, %v6750_v22  ;;  %v2836_v32 = vpop.f32.mrb[1].mxu0 }
 0x4d3   : >> { %v7275_v33 = vadd.f32 %v2836_v32, %v2366_v23  ;;  %v6831_v34 = vpop.f32.mrb[2].mxu0 }
 0x4d4   : >> { %v2881_v35 = vadd.f32 %v7274_v31, %v2872_v30  ;;  %v7276_v36 = vadd.f32 %v6831_v34, %v6751_v24  ;;  %v2839_v37 = vpop.f32.mrb[3].mxu0 }
 0x4d5   : >> { %v2879_v38 = vadd.f32 %v7275_v33, %v2862_v28  ;;  %v7277_v40 = vadd.f32 %v2839_v37, %v2369_v25 }
 0x4d6   : >> { %vm2885_vm2 = vcmp.ge.f32.partialorder %v2881_v35, 0.0  ;;  %v2889_v41 = vmul.f32 0.1, %v2881_v35  ;;  %v2882_v42 = vadd.f32 %v7276_v36, %v2877_v39 }
 0x4d7   : >> { %vm2883_vm3 = vcmp.ge.f32.partialorder %v2879_v38, 0.0  ;;  %v2887_v43 = vmul.f32 0.1, %v2879_v38  ;;  %v2880_v44 = vadd.f32 %v7277_v40, %v2867_v26 }
 0x4d8   : >> { %vm2886_vm4 = vcmp.ge.f32.partialorder %v2882_v42, 0.0  ;;  %v2890_v45 = vmul.f32 0.1, %v2882_v42  ;;  %v2893_v46 = vsel %vm2885_vm2, %v2881_v35, %v2889_v41 }
 0x4d9   : >> { %vm2884_vm5 = vcmp.ge.f32.partialorder %v2880_v44, 0.0  ;;  %v2888_v47 = vmul.f32 0.1, %v2880_v44  ;;  %2900 = vst.msk [vmem:[%s2896_s21 + $0x10] sm:$0xff] %vm1955_vm10, %v2893_v46  ;;  %v2891_v48 = vsel %vm2883_vm3, %v2879_v38, %v2887_v43 }
 0x4da   : >> { %v2894_v49 = vsel %vm2886_vm4, %v2882_v42, %v2890_v45  ;;  %2898 = vst.msk [vmem:[%s2896_s21] sm:$0xff] %vm1955_vm10, %v2891_v48 }
 0x4db   : >> { %v7484_v50 = vpack.i.bf16 %v2894_v49, %v2893_v46  ;;  %2901 = vst.msk [vmem:[%s2896_s21 + $0x18] sm:$0xff] %vm1955_vm10, %v2894_v49  ;;  %v2892_v51 = vsel %vm2884_vm5, %v2880_v44, %v2888_v47 }
 0x4dc   : >> { %v7479_v52 = vpack.i.bf16 %v2892_v51, %v2891_v48  ;;  %2899 = vst.msk [vmem:[%s2896_s21 + $0x8] sm:$0xff] %vm1955_vm10, %v2892_v51 }
 0x4dd   : >> { %7485 = vrot.lane.b32.xlu0 %v7484_v50, %s7651_s13 }
 0x4de   : >> { %7480 = vrot.lane.b32.xlu1 %v7479_v52, %s7651_s13 }
 0x54f   : >> { %v7486_v53 = vpop.permute.xlu0 %7485 }
 0x550   : >> { %v7488_v54 = vunpack.i.h.bf16 %v7486_v53  ;;  %v7487_v55 = vunpack.i.l.bf16 %v7486_v53  ;;  %v7481_v56 = vpop.permute.xlu1 %7480 }
 0x551   : >> { %v7483_v57 = vunpack.i.h.bf16 %v7481_v56  ;;  %v7482_v58 = vunpack.i.l.bf16 %v7481_v56  ;;  %2015 = sbr.rel (!%p2013_p5) target bundleno = 788 (0x314), region = 313 }
 0x552   : >> { %v2922_v59 = vsel %vm1976_vm14, 0.0, %v7488_v54  ;;  %v2921_v60 = vsel %vm1976_vm14, 0.0, %v7487_v55 }
 0x553   : >> { %v2927_v61 = vsel %vm1981_vm15, %v2922_v59, 0.0  ;;  %v2926_v62 = vsel %vm1981_vm15, %v2921_v60, 0.0  ;;  %v2920_v63 = vsel %vm1976_vm14, 0.0, %v7483_v57  ;;  %v2919_v0 = vsel %vm1976_vm14, 0.0, %v7482_v58 }
 0x554   : >> { %v2929_v1 = vpack.c.bf16 %v2927_v61, %v2926_v62  ;;  %v2925_v2 = vsel %vm1981_vm15, %v2920_v63, 0.0  ;;  %v2924_v3 = vsel %vm1981_vm15, %v2919_v0, 0.0 }
 0x555   : >> { %v2928_v6 = vpack.c.bf16 %v2925_v2, %v2924_v3 }
 0x556   : >> { %6010 = vst.msk [vmem:[%s5574_s12 + $0x48] sm:$0xff] %vm1991_vm0, %v2929_v1 }
 0x557   : >> { %6009 = vst.msk [vmem:[%s5574_s12 + $0x40] sm:$0xff] %vm1991_vm0, %v2928_v6 }
 0x558 LB: >> { %s6289_s23 = sshll.u32 %s7628_s20, 5  ;;  %s7652_s15 = smov 127   ;;  %v7519_v5 = vld [vmem:[%s9111_s6 + $0x40] sm:$0xff]   ;;  %v7521_v12 = vld [vmem:[%s9111_s6 + $0x10] sm:$0xff]   ;;  %v3799_v25 = vld [vmem:[%s9112_s7 + $0x8] sm:$0xff]  ;;  %v7654_v28 = vmov 0   ;;  %s7628_s20 = sphi %s8473_s20, %s2959_s20  }
 0x559   : >> { %s8481_s0 = scalar_lea.vmem [#allocation4], %s6289_s23  ;;  %s7653_s2 = smov 126   ;;  %6908 = vmatprep.mubr.msk.bf16.mxu0 %vm2076_vm1, %v7519_v5  ;;  %6844 = vmatprep.mubr.msk.bf16.mxu1 %vm2076_vm1, %v7521_v12  ;;  %v3798_v26 = vld [vmem:[%s9112_s7] sm:$0xff]  ;;  %v3800_v29 = vld [vmem:[%s9112_s7 + $0x10] sm:$0xff]  ;;  %v3801_v30 = vld [vmem:[%s9112_s7 + $0x18] sm:$0xff] }
 0x55a   : >> { %7508 = vset.pattern.permute.xlu1 %v7654_v28  ;;  %7507 = vset.pattern.permute.xlu0 %v7654_v28  ;;  %v7520_v37 = vld [vmem:[%s9111_s6 + $0x48] sm:$0xff]   ;;  %v7523_v39 = vld [vmem:[%s9111_s6 + $0x50] sm:$0xff]   ;;  %v7522_v43 = vld [vmem:[%s9111_s6 + $0x18] sm:$0xff]   ;;  %s3839_s29 = scalar_lea.vmem %s7843_s28, %s6289_s23  ;;  %s7655_s23 = smov 1  }
 0x55b   : >> { %v7525_v45 = vld [vmem:[%s9111_s6] sm:$0xff]   ;;  %v7524_v50 = vld [vmem:[%s9111_s6 + $0x58] sm:$0xff]   ;;  %v7526_v55 = vld [vmem:[%s9111_s6 + $0x8] sm:$0xff]  }
 0x55c   : >> { %v7527_v53 = vld [vmem:[%s9111_s6 + $0x60] sm:$0xff]   ;;  %v7528_v62 = vld [vmem:[%s9111_s6 + $0x68] sm:$0xff]   ;;  %v7531_v1 = vld [vmem:[%s9111_s6 + $0x70] sm:$0xff]  }
 0x55d   : >> { %v7529_v57 = vld [vmem:[%s9111_s6 + $0x20] sm:$0xff]   ;;  %v7530_v3 = vld [vmem:[%s9111_s6 + $0x28] sm:$0xff]   ;;  %v7532_v5 = vld [vmem:[%s9111_s6 + $0x78] sm:$0xff]  }
 0x55e   : >> { %v6056_v7 = vld [vmem:[%s8481_s0 + $0x40] sm:$0xff]  ;;  %v6016_v8 = vld [vmem:[%s8481_s0 + $0x10] sm:$0xff]  ;;  %v6057_v9 = vld [vmem:[%s8481_s0 + $0x48] sm:$0xff] }
 0x55f   : >> { %3336 = vrot.lane.b32.xlu0 %v6056_v7, %s7652_s15  ;;  %3342 = vrot.lane.b32.xlu1 %v6056_v7, %s7653_s2  ;;  %v6017_v11 = vld [vmem:[%s8481_s0 + $0x18] sm:$0xff]  ;;  %v8492_v4 = vld [vmem:[%s8481_s0 + $0x50] sm:$0xff] }
 0x560   : >> { %6896 = vmatprep.subr.bf16.mxu0 %v6056_v7  ;;  %6832 = vmatprep.subr.bf16.mxu1 %v6016_v8  ;;  %v8505_v13 = vld [vmem:[%s8481_s0 + $0x58] sm:$0xff]  ;;  %v8518_v14 = vld [vmem:[%s8481_s0] sm:$0xff]  ;;  %v8528_v16 = vld [vmem:[%s8481_s0 + $0x8] sm:$0xff] }
 0x561   : >> { %6897 = vmatpush3.bf16.msra.mxu0 %v6056_v7  ;;  %6833 = vmatpush3.bf16.msra.mxu1 %v6016_v8  ;;  %v8521_v15 = vld [vmem:[%s8481_s0 + $0x60] sm:$0xff]  ;;  %v8531_v17 = vld [vmem:[%s8481_s0 + $0x68] sm:$0xff]  ;;  %v8549_v19 = vld [vmem:[%s8481_s0 + $0x70] sm:$0xff] }
 0x562   : >> { %6898 = vmatprep.subr.bf16.mxu0 %v6057_v9  ;;  %6834 = vmatprep.subr.bf16.mxu1 %v6017_v11  ;;  %v8546_v18 = vld [vmem:[%s8481_s0 + $0x20] sm:$0xff]  ;;  %v8556_v10 = vld [vmem:[%s8481_s0 + $0x28] sm:$0xff]  ;;  %v8559_v20 = vld [vmem:[%s8481_s0 + $0x78] sm:$0xff] }
 0x563   : >> { %3338 = vrot.lane.b32.xlu0 %v6057_v9, %s7652_s15  ;;  %3344 = vrot.lane.b32.xlu1 %v6057_v9, %s7653_s2  ;;  %v8574_v21 = vld [vmem:[%s8481_s0 + $0x30] sm:$0xff]  ;;  %v8577_v22 = vld [vmem:[%s8481_s0 + $0x80] sm:$0xff] }
 0x564   : >> { %v8584_v23 = vld [vmem:[%s8481_s0 + $0x38] sm:$0xff]  ;;  %v8587_v24 = vld [vmem:[%s8481_s0 + $0x88] sm:$0xff]  ;;  %v7533_v7 = vld [vmem:[%s9111_s6 + $0x30] sm:$0xff]  }
 0x565   : >> { %6899 = vmatpush3.bf16.msra.mxu0 %v6057_v9  ;;  %6835 = vmatpush3.bf16.msra.mxu1 %v6017_v11 }
 0x567   : >> { %2992 = vrot.lane.b32.xlu0 %v6016_v8, %s7652_s15  ;;  %3430 = vrot.lane.b32.xlu1 %v8492_v4, %s7652_s15 }
 0x56b   : >> { %2994 = vrot.lane.b32.xlu0 %v6017_v11, %s7652_s15  ;;  %3432 = vrot.lane.b32.xlu1 %v8505_v13, %s7652_s15 }
 0x56f   : >> { %2998 = vrot.lane.b32.xlu0 %v6016_v8, %s7653_s2  ;;  %3436 = vrot.lane.b32.xlu1 %v8492_v4, %s7653_s2 }
 0x573   : >> { %3000 = vrot.lane.b32.xlu0 %v6017_v11, %s7653_s2  ;;  %3438 = vrot.lane.b32.xlu1 %v8505_v13, %s7653_s2 }
 0x577   : >> { %2968 = vrot.lane.b32.xlu0 %v8518_v14, %s7652_s15  ;;  %3524 = vrot.lane.b32.xlu1 %v8521_v15, %s7652_s15 }
 0x57b   : >> { %2970 = vrot.lane.b32.xlu0 %v8528_v16, %s7652_s15  ;;  %3526 = vrot.lane.b32.xlu1 %v8531_v17, %s7652_s15 }
 0x57f   : >> { %2974 = vrot.lane.b32.xlu0 %v8518_v14, %s7653_s2  ;;  %3530 = vrot.lane.b32.xlu1 %v8521_v15, %s7653_s2 }
 0x583   : >> { %2976 = vrot.lane.b32.xlu0 %v8528_v16, %s7653_s2  ;;  %3532 = vrot.lane.b32.xlu1 %v8531_v17, %s7653_s2 }
 0x587   : >> { %3148 = vrot.lane.b32.xlu0 %v8546_v18, %s7652_s15  ;;  %3618 = vrot.lane.b32.xlu1 %v8549_v19, %s7652_s15 }
 0x58b   : >> { %3150 = vrot.lane.b32.xlu0 %v8556_v10, %s7652_s15  ;;  %3620 = vrot.lane.b32.xlu1 %v8559_v20, %s7652_s15 }
 0x58f   : >> { %3154 = vrot.lane.b32.xlu0 %v8546_v18, %s7653_s2  ;;  %3624 = vrot.lane.b32.xlu1 %v8549_v19, %s7653_s2 }
 0x593   : >> { %3156 = vrot.lane.b32.xlu0 %v8556_v10, %s7653_s2  ;;  %3626 = vrot.lane.b32.xlu1 %v8559_v20, %s7653_s2 }
 0x597   : >> { %3242 = vrot.lane.b32.xlu0 %v8574_v21, %s7652_s15  ;;  %3712 = vrot.lane.b32.xlu1 %v8577_v22, %s7652_s15 }
 0x59b   : >> { %3244 = vrot.lane.b32.xlu0 %v8584_v23, %s7652_s15  ;;  %3714 = vrot.lane.b32.xlu1 %v8587_v24, %s7652_s15 }
 0x59f   : >> { %3248 = vrot.lane.b32.xlu0 %v8574_v21, %s7653_s2  ;;  %3718 = vrot.lane.b32.xlu1 %v8577_v22, %s7653_s2 }
 0x5a3   : >> { %3250 = vrot.lane.b32.xlu0 %v8584_v23, %s7653_s2  ;;  %3720 = vrot.lane.b32.xlu1 %v8587_v24, %s7653_s2  ;;  %s6115_s2 = sshll.u32 %s7628_s20, 4  ;;  %s2959_s20 = sadd.s32 1, %s7628_s20  }
 0x5a4   : >> { %s5613_s16 = scalar_lea.vmem [#allocation5], %s6115_s2  ;;  %p2956_p6 = scmp.ge.s32.totalorder %s2959_s20, 4  }
 0x5a5   : > { %3880 = vst [vmem:[#allocation6] sm:$0xff] (%p2956_p6), %v7643_v27  ;;  %3881 = vst [vmem:[#allocation6 + $0x8] sm:$0xff] (%p2956_p6), %v7643_v27  ;;  %s8730_s22 = smov (%p2956_p6), 0  }
 0x5a6   : > { %3883 = vst [vmem:[#allocation6 + $0x30] sm:$0xff] (%p2956_p6), %v7643_v27  ;;  %3884 = vst [vmem:[#allocation6 + $0x38] sm:$0xff] (%p2956_p6), %v7643_v27 }
 0x5a7   : >> { %3809 = vperm.xlu1 %7508, %v3799_v25   ;;  %3804 = vperm.xlu0 %7507, %v3798_v26  }
 0x5ab   : >> { %3814 = vperm.xlu1 %7508, %v3800_v29   ;;  %3819 = vperm.xlu0 %7507, %v3801_v30  }
 0x5d1   : >> { %v3337_v31 = vpop.permute.xlu0 %3336  ;;  %v3343_v32 = vpop.permute.xlu1 %3342 }
 0x5d2   : >> { %6900 = vmatprep.subr.bf16.mxu0 %v3337_v31 }
 0x5d3   : >> { %6901 = vmatpush3.bf16.msra.mxu0 %v3337_v31 }
 0x5d5   : >> { %v3339_v33 = vpop.permute.xlu0 %3338  ;;  %v3345_v35 = vpop.permute.xlu1 %3344 }
 0x5d6   : >> { %6902 = vmatprep.subr.bf16.mxu0 %v3339_v33 }
 0x5d7   : >> { %6903 = vmatpush3.bf16.msra.mxu0 %v3339_v33 }
 0x5d8   : >> { %6904 = vmatprep.subr.bf16.mxu0 %v3343_v32 }
 0x5d9   : >> { %v2993_v34 = vpop.permute.xlu0 %2992  ;;  %v3431_v38 = vpop.permute.xlu1 %3430 }
 0x5da   : >> { %6836 = vmatprep.subr.bf16.mxu1 %v2993_v34 }
 0x5db   : >> { %6837 = vmatpush3.bf16.msra.mxu1 %v2993_v34  ;;  %6905 = vmatpush3.bf16.msra.mxu0 %v3343_v32 }
 0x5dc   : >> { %6906 = vmatprep.subr.bf16.mxu0 %v3345_v35 }
 0x5dd   : >> { %v2995_v36 = vpop.permute.xlu0 %2994  ;;  %v3433_v42 = vpop.permute.xlu1 %3432 }
 0x5de   : >> { %6838 = vmatprep.subr.bf16.mxu1 %v2995_v36 }
 0x5df   : >> { %6839 = vmatpush3.bf16.msra.mxu1 %v2995_v36  ;;  %6907 = vmatpush3.bf16.msra.mxu0 %v3345_v35 }
 0x5e0   : >> { %6912 = vmatprep.subr.bf16.mxu0 %v8492_v4 }
 0x5e1   : >> { %v2999_v40 = vpop.permute.xlu0 %2998  ;;  %v3437_v46 = vpop.permute.xlu1 %3436 }
 0x5e2   : >> { %6840 = vmatprep.subr.bf16.mxu1 %v2999_v40  ;;  %6909 = vmatmul.mubr.msk.bf16.vlgmr.msra.gmra.mrb[0].mxu0 %vm2076_vm1, %v7520_v37 }
 0x5e3   : >> { %6841 = vmatpush3.bf16.msra.mxu1 %v2999_v40  ;;  %6913 = vmatpush3.bf16.msra.mxu0 %v8492_v4 }
 0x5e4   : >> { %6914 = vmatprep.subr.bf16.mxu0 %v8505_v13  ;;  %6924 = vmatprep.mubr.msk.bf16.mxu0 %vm2076_vm1, %v7523_v39 }
 0x5e5   : >> { %v3001_v41 = vpop.permute.xlu0 %3000  ;;  %v3439_v48 = vpop.permute.xlu1 %3438 }
 0x5e6   : >> { %6842 = vmatprep.subr.bf16.mxu1 %v3001_v41 }
 0x5e7   : >> { %6843 = vmatpush3.bf16.msra.mxu1 %v3001_v41  ;;  %6915 = vmatpush3.bf16.msra.mxu0 %v8505_v13 }
 0x5e8   : >> { %6848 = vmatprep.subr.bf16.mxu1 %v8518_v14  ;;  %6916 = vmatprep.subr.bf16.mxu0 %v3431_v38 }
 0x5e9   : >> { %v2969_v44 = vpop.permute.xlu0 %2968  ;;  %v3525_v51 = vpop.permute.xlu1 %3524 }
 0x5ea   : >> { %6845 = vmatmul.mubr.msk.bf16.vlgmr.msra.gmra.mrb[0].mxu1 %vm2076_vm1, %v7522_v43 }
 0x5eb   : >> { %6849 = vmatpush3.bf16.msra.mxu1 %v8518_v14  ;;  %6917 = vmatpush3.bf16.msra.mxu0 %v3431_v38  ;;  %v7535_v14 = vld [vmem:[%s9111_s6 + $0x80] sm:$0xff]  }
 0x5ec   : >> { %6850 = vmatprep.subr.bf16.mxu1 %v8528_v16  ;;  %6918 = vmatprep.subr.bf16.mxu0 %v3433_v42 }
 0x5ed   : >> { %v2971_v47 = vpop.permute.xlu0 %2970  ;;  %6860 = vmatprep.mubr.msk.bf16.mxu1 %vm2076_vm1, %v7525_v45  ;;  %v3527_v54 = vpop.permute.xlu1 %3526 }
 0x5ef   : >> { %6851 = vmatpush3.bf16.msra.mxu1 %v8528_v16  ;;  %6919 = vmatpush3.bf16.msra.mxu0 %v3433_v42  ;;  %v7534_v16 = vld [vmem:[%s9111_s6 + $0x38] sm:$0xff]  }
 0x5f0   : >> { %6852 = vmatprep.subr.bf16.mxu1 %v2969_v44  ;;  %6920 = vmatprep.subr.bf16.mxu0 %v3437_v46 }
 0x5f1   : >> { %v2975_v49 = vpop.permute.xlu0 %2974  ;;  %v3531_v58 = vpop.permute.xlu1 %3530 }
 0x5f3   : >> { %6853 = vmatpush3.bf16.msra.mxu1 %v2969_v44  ;;  %6921 = vmatpush3.bf16.msra.mxu0 %v3437_v46 }
 0x5f4   : >> { %6854 = vmatprep.subr.bf16.mxu1 %v2971_v47  ;;  %6922 = vmatprep.subr.bf16.mxu0 %v3439_v48 }
 0x5f5   : >> { %v2977_v52 = vpop.permute.xlu0 %2976  ;;  %v3533_v60 = vpop.permute.xlu1 %3532 }
 0x5f7   : >> { %6855 = vmatpush3.bf16.msra.mxu1 %v2971_v47  ;;  %6923 = vmatpush3.bf16.msra.mxu0 %v3439_v48 }
 0x5f8   : >> { %6856 = vmatprep.subr.bf16.mxu1 %v2975_v49  ;;  %6928 = vmatprep.subr.bf16.mxu0 %v8521_v15 }
 0x5f9   : >> { %v3149_v56 = vpop.permute.xlu0 %3148  ;;  %v3619_v63 = vpop.permute.xlu1 %3618 }
 0x5fa   : >> { %6925 = vmatmul.mubr.msk.bf16.vlgmr.msra.gmra.mrb[0].mxu0 %vm2076_vm1, %v7524_v50 }
 0x5fb   : >> { %6857 = vmatpush3.bf16.msra.mxu1 %v2975_v49  ;;  %6929 = vmatpush3.bf16.msra.mxu0 %v8521_v15 }
 0x5fc   : >> { %6858 = vmatprep.subr.bf16.mxu1 %v2977_v52  ;;  %6930 = vmatprep.subr.bf16.mxu0 %v8531_v17 }
 0x5fd   : >> { %6940 = vmatprep.mubr.msk.bf16.mxu0 %vm2076_vm1, %v7527_v53  ;;  %v3151_v59 = vpop.permute.xlu0 %3150  ;;  %v3621_v2 = vpop.permute.xlu1 %3620 }
 0x5ff   : >> { %6859 = vmatpush3.bf16.msra.mxu1 %v2977_v52  ;;  %6931 = vmatpush3.bf16.msra.mxu0 %v8531_v17 }
 0x600   : >> { %6864 = vmatprep.subr.bf16.mxu1 %v8546_v18  ;;  %6932 = vmatprep.subr.bf16.mxu0 %v3525_v51 }
 0x601   : >> { %v3155_v61 = vpop.permute.xlu0 %3154  ;;  %v3625_v8 = vpop.permute.xlu1 %3624 }
 0x602   : >> { %6861 = vmatmul.mubr.msk.bf16.vlgmr.msra.gmra.mrb[0].mxu1 %vm2076_vm1, %v7526_v55 }
 0x603   : >> { %6865 = vmatpush3.bf16.msra.mxu1 %v8546_v18  ;;  %6933 = vmatpush3.bf16.msra.mxu0 %v3525_v51 }
 0x604   : >> { %6866 = vmatprep.subr.bf16.mxu1 %v8556_v10  ;;  %6934 = vmatprep.subr.bf16.mxu0 %v3527_v54 }
 0x605   : >> { %6876 = vmatprep.mubr.msk.bf16.mxu1 %vm2076_vm1, %v7529_v57  ;;  %v3157_v0 = vpop.permute.xlu0 %3156  ;;  %v3627_v11 = vpop.permute.xlu1 %3626 }
 0x607   : >> { %6867 = vmatpush3.bf16.msra.mxu1 %v8556_v10  ;;  %6935 = vmatpush3.bf16.msra.mxu0 %v3527_v54 }
 0x608   : >> { %6868 = vmatprep.subr.bf16.mxu1 %v3149_v56  ;;  %6936 = vmatprep.subr.bf16.mxu0 %v3531_v58 }
 0x609   : >> { %v3243_v6 = vpop.permute.xlu0 %3242  ;;  %v3713_v12 = vpop.permute.xlu1 %3712 }
 0x60b   : >> { %6869 = vmatpush3.bf16.msra.mxu1 %v3149_v56  ;;  %6937 = vmatpush3.bf16.msra.mxu0 %v3531_v58 }
 0x60c   : >> { %6870 = vmatprep.subr.bf16.mxu1 %v3151_v59  ;;  %6938 = vmatprep.subr.bf16.mxu0 %v3533_v60 }
 0x60d   : >> { %v3245_v9 = vpop.permute.xlu0 %3244  ;;  %v3715_v15 = vpop.permute.xlu1 %3714 }
 0x60f   : >> { %6871 = vmatpush3.bf16.msra.mxu1 %v3151_v59  ;;  %6939 = vmatpush3.bf16.msra.mxu0 %v3533_v60 }
 0x610   : >> { %6872 = vmatprep.subr.bf16.mxu1 %v3155_v61  ;;  %6944 = vmatprep.subr.bf16.mxu0 %v8549_v19 }
 0x611   : >> { %v3249_v4 = vpop.permute.xlu0 %3248  ;;  %v3719_v17 = vpop.permute.xlu1 %3718 }
 0x612   : >> { %6941 = vmatmul.mubr.msk.bf16.vlgmr.msra.gmra.mrb[0].mxu0 %vm2076_vm1, %v7528_v62 }
 0x613   : >> { %6873 = vmatpush3.bf16.msra.mxu1 %v3155_v61  ;;  %6945 = vmatpush3.bf16.msra.mxu0 %v8549_v19  ;;  %v7536_v19 = vld [vmem:[%s9111_s6 + $0x88] sm:$0xff]  }
 0x614   : >> { %6874 = vmatprep.subr.bf16.mxu1 %v3157_v0  ;;  %6946 = vmatprep.subr.bf16.mxu0 %v8559_v20 }
 0x615   : >> { %6956 = vmatprep.mubr.msk.bf16.mxu0 %vm2076_vm1, %v7531_v1  ;;  %v3251_v13 = vpop.permute.xlu0 %3250  ;;  %v3721_v18 = vpop.permute.xlu1 %3720 }
 0x617   : >> { %6875 = vmatpush3.bf16.msra.mxu1 %v3157_v0  ;;  %6947 = vmatpush3.bf16.msra.mxu0 %v8559_v20 }
 0x618   : >> { %6880 = vmatprep.subr.bf16.mxu1 %v8574_v21  ;;  %6948 = vmatprep.subr.bf16.mxu0 %v3619_v63 }
 0x61a   : >> { %6877 = vmatmul.mubr.msk.bf16.vlgmr.msra.gmra.mrb[0].mxu1 %vm2076_vm1, %v7530_v3 }
 0x61b   : >> { %6881 = vmatpush3.bf16.msra.mxu1 %v8574_v21  ;;  %6949 = vmatpush3.bf16.msra.mxu0 %v3619_v63 }
 0x61c   : >> { %6882 = vmatprep.subr.bf16.mxu1 %v8584_v23  ;;  %6950 = vmatprep.subr.bf16.mxu0 %v3621_v2 }
 0x61d   : >> { %6892 = vmatprep.mubr.msk.bf16.mxu1 %vm2076_vm1, %v7533_v7 }
 0x61f   : >> { %6883 = vmatpush3.bf16.msra.mxu1 %v8584_v23  ;;  %6951 = vmatpush3.bf16.msra.mxu0 %v3621_v2 }
 0x620   : >> { %6884 = vmatprep.subr.bf16.mxu1 %v3243_v6  ;;  %6952 = vmatprep.subr.bf16.mxu0 %v3625_v8 }
 0x623   : >> { %6885 = vmatpush3.bf16.msra.mxu1 %v3243_v6  ;;  %6953 = vmatpush3.bf16.msra.mxu0 %v3625_v8 }
 0x624   : >> { %6886 = vmatprep.subr.bf16.mxu1 %v3245_v9  ;;  %6954 = vmatprep.subr.bf16.mxu0 %v3627_v11 }
 0x626   : >> { %v3810_v23 = vpop.permute.xlu1 %3809 }
 0x627   : >> { %6887 = vmatpush3.bf16.msra.mxu1 %v3245_v9  ;;  %6955 = vmatpush3.bf16.msra.mxu0 %v3627_v11 }
 0x628   : >> { %6888 = vmatprep.subr.bf16.mxu1 %v3249_v4  ;;  %6960 = vmatprep.subr.bf16.mxu0 %v8577_v22 }
 0x62a   : >> { %6957 = vmatmul.mubr.msk.bf16.vlgmr.msra.gmra.mrb[0].mxu0 %vm2076_vm1, %v7532_v5  ;;  %v3815_v26 = vpop.permute.xlu1 %3814 }
 0x62b   : >> { %6889 = vmatpush3.bf16.msra.mxu1 %v3249_v4  ;;  %6961 = vmatpush3.bf16.msra.mxu0 %v8577_v22 }
 0x62c   : >> { %6890 = vmatprep.subr.bf16.mxu1 %v3251_v13  ;;  %6962 = vmatprep.subr.bf16.mxu0 %v8587_v24 }
 0x62d   : >> { %6972 = vmatprep.mubr.msk.bf16.mxu0 %vm2076_vm1, %v7535_v14 }
 0x62f   : >> { %6891 = vmatpush3.bf16.msra.mxu1 %v3251_v13  ;;  %6963 = vmatpush3.bf16.msra.mxu0 %v8587_v24  ;;  %v3805_v24 = vpop.permute.xlu0 %3804 }
 0x630   : >> { %6964 = vmatprep.subr.bf16.mxu0 %v3713_v12 }
 0x632   : >> { %6893 = vmatmul.mubr.msk.bf16.vlgmr.msra.gmra.mrb[0].mxu1 %vm2076_vm1, %v7534_v16 }
 0x633   : >> { %6965 = vmatpush3.bf16.msra.mxu0 %v3713_v12  ;;  %v3820_v36 = vpop.permute.xlu0 %3819 }
 0x634   : >> { %6966 = vmatprep.subr.bf16.mxu0 %v3715_v15 }
 0x637   : >> { %6967 = vmatpush3.bf16.msra.mxu0 %v3715_v15 }
 0x638   : >> { %6968 = vmatprep.subr.bf16.mxu0 %v3719_v17 }
 0x63b   : >> { %6969 = vmatpush3.bf16.msra.mxu0 %v3719_v17 }
 0x63c   : >> { %6970 = vmatprep.subr.bf16.mxu0 %v3721_v18 }
 0x63f   : >> { %6971 = vmatpush3.bf16.msra.mxu0 %v3721_v18 }
 0x642   : >> { %6973 = vmatmul.mubr.msk.bf16.vlgmr.msra.gmra.mrb[0].mxu0 %vm2076_vm1, %v7536_v19 }
 0x705   : >> { %v6894_v10 = vpop.f32.mrb[0].mxu1 }
 0x706   : >> { %v3309_v20 = vpop.f32.mrb[1].mxu1 }
 0x707   : >> { %v6895_v21 = vpop.f32.mrb[2].mxu1 }
 0x708   : >> { %v3312_v22 = vpop.f32.mrb[3].mxu1 }
 0x715   : >> { %v6974_v25 = vpop.f32.mrb[0].mxu0 }
 0x716   : >> { %v7306_v28 = vadd.f32 %v6974_v25, %v6894_v10  ;;  %v3779_v29 = vpop.f32.mrb[1].mxu0 }
 0x717   : >> { %v7307_v30 = vadd.f32 %v3779_v29, %v3309_v20  ;;  %v6975_v31 = vpop.f32.mrb[2].mxu0 }
 0x718   : >> { %v3824_v32 = vadd.f32 %v7306_v28, %v3815_v26  ;;  %v7308_v33 = vadd.f32 %v6975_v31, %v6895_v21  ;;  %v3782_v34 = vpop.f32.mrb[3].mxu0 }
 0x719   : >> { %v3822_v35 = vadd.f32 %v7307_v30, %v3805_v24  ;;  %v7309_v37 = vadd.f32 %v3782_v34, %v3312_v22 }
 0x71a   : >> { %vm3828_vm6 = vcmp.ge.f32.partialorder %v3824_v32, 0.0  ;;  %v3832_v38 = vmul.f32 0.1, %v3824_v32  ;;  %v3825_v39 = vadd.f32 %v7308_v33, %v3820_v36 }
 0x71b   : >> { %vm3826_vm7 = vcmp.ge.f32.partialorder %v3822_v35, 0.0  ;;  %v3830_v40 = vmul.f32 0.1, %v3822_v35  ;;  %v3823_v41 = vadd.f32 %v7309_v37, %v3810_v23 }
 0x71c   : >> { %vm3829_vm8 = vcmp.ge.f32.partialorder %v3825_v39, 0.0  ;;  %v3833_v42 = vmul.f32 0.1, %v3825_v39  ;;  %v3836_v43 = vsel %vm3828_vm6, %v3824_v32, %v3832_v38 }
 0x71d   : >> { %vm3827_vm9 = vcmp.ge.f32.partialorder %v3823_v41, 0.0  ;;  %v3831_v44 = vmul.f32 0.1, %v3823_v41  ;;  %3843 = vst.msk [vmem:[%s3839_s29 + $0x10] sm:$0xff] %vm1955_vm10, %v3836_v43  ;;  %v3834_v45 = vsel %vm3826_vm7, %v3822_v35, %v3830_v40 }
 0x71e   : >> { %v3837_v46 = vsel %vm3829_vm8, %v3825_v39, %v3833_v42  ;;  %3841 = vst.msk [vmem:[%s3839_s29] sm:$0xff] %vm1955_vm10, %v3834_v45 }
 0x71f   : >> { %v7514_v47 = vpack.i.bf16 %v3837_v46, %v3836_v43  ;;  %3844 = vst.msk [vmem:[%s3839_s29 + $0x18] sm:$0xff] %vm1955_vm10, %v3837_v46  ;;  %v3835_v48 = vsel %vm3827_vm9, %v3823_v41, %v3831_v44 }
 0x720   : >> { %v7509_v49 = vpack.i.bf16 %v3835_v48, %v3834_v45  ;;  %3842 = vst.msk [vmem:[%s3839_s29 + $0x8] sm:$0xff] %vm1955_vm10, %v3835_v48 }
 0x721   : >> { %7515 = vrot.lane.b32.xlu0 %v7514_v47, %s7655_s23 }
 0x722   : >> { %7510 = vrot.lane.b32.xlu1 %v7509_v49, %s7655_s23 }
 0x793   : >> { %v7516_v50 = vpop.permute.xlu0 %7515 }
 0x794   : >> { %v7518_v51 = vunpack.i.h.bf16 %v7516_v50  ;;  %v7517_v52 = vunpack.i.l.bf16 %v7516_v50  ;;  %v7511_v53 = vpop.permute.xlu1 %7510 }
 0x795   : >> { %v7513_v54 = vunpack.i.h.bf16 %v7511_v53  ;;  %v7512_v55 = vunpack.i.l.bf16 %v7511_v53  ;;  %2958 = sbr.rel (!%p2956_p6) target bundleno = 1368 (0x558), region = 324 }
 0x796   : >> { %v3865_v56 = vsel %vm1976_vm14, 0.0, %v7518_v51  ;;  %v3864_v57 = vsel %vm1976_vm14, 0.0, %v7517_v52 }
 0x797   : >> { %v3870_v58 = vsel %vm1981_vm15, %v3865_v56, 0.0  ;;  %v3869_v59 = vsel %vm1981_vm15, %v3864_v57, 0.0  ;;  %v3863_v60 = vsel %vm1976_vm14, 0.0, %v7513_v54  ;;  %v3862_v61 = vsel %vm1976_vm14, 0.0, %v7512_v55 }
 0x798   : >> { %v3872_v62 = vpack.c.bf16 %v3870_v58, %v3869_v59  ;;  %v3868_v63 = vsel %vm1981_vm15, %v3863_v60, 0.0  ;;  %v3867_v0 = vsel %vm1981_vm15, %v3862_v61, 0.0 }
 0x799   : >> { %v3871_v1 = vpack.c.bf16 %v3868_v63, %v3867_v0 }
 0x79a   : >> { %6117 = vst.msk [vmem:[%s5613_s16 + $0x48] sm:$0xff] %vm1991_vm0, %v3872_v62 }
 0x79b   : >> { %6116 = vst.msk [vmem:[%s5613_s16 + $0x40] sm:$0xff] %vm1991_vm0, %v3871_v1 }
 0x79c LB: >> { %s6299_s21 = sshll.u32 %s7632_s22, 5  ;;  %s7656_s28 = smov 127   ;;  %v7549_v9 = vld [vmem:[%s9113_s8 + $0x40] sm:$0xff]   ;;  %v7551_v11 = vld [vmem:[%s9113_s8 + $0x10] sm:$0xff]   ;;  %v4730_v22 = vld [vmem:[%s9114_s9 + $0x8] sm:$0xff]  ;;  %v7658_v24 = vmov 0   ;;  %s7632_s22 = sphi %s8730_s22, %s3890_s22  }
 0x79d   : >> { %s8738_s20 = scalar_lea.vmem [#allocation5], %s6299_s21  ;;  %s7657_s13 = smov 126   ;;  %7052 = vmatprep.mubr.msk.bf16.mxu0 %vm2076_vm1, %v7549_v9  ;;  %6988 = vmatprep.mubr.msk.bf16.mxu1 %vm2076_vm1, %v7551_v11  ;;  %v4729_v23 = vld [vmem:[%s9114_s9] sm:$0xff]  ;;  %v4731_v25 = vld [vmem:[%s9114_s9 + $0x10] sm:$0xff]  ;;  %v4732_v26 = vld [vmem:[%s9114_s9 + $0x18] sm:$0xff] }
 0x79e   : >> { %7538 = vset.pattern.permute.xlu1 %v7658_v24  ;;  %7537 = vset.pattern.permute.xlu0 %v7658_v24  ;;  %v7550_v34 = vld [vmem:[%s9113_s8 + $0x48] sm:$0xff]   ;;  %v7553_v36 = vld [vmem:[%s9113_s8 + $0x50] sm:$0xff]   ;;  %v7552_v40 = vld [vmem:[%s9113_s8 + $0x18] sm:$0xff]   ;;  %s4770_s16 = scalar_lea.vmem %s7856_s25, %s6299_s21  ;;  %s7659_s21 = smov 1  }
 0x79f   : >> { %v7555_v42 = vld [vmem:[%s9113_s8] sm:$0xff]   ;;  %v7554_v47 = vld [vmem:[%s9113_s8 + $0x58] sm:$0xff]   ;;  %v7556_v52 = vld [vmem:[%s9113_s8 + $0x8] sm:$0xff]  }
 0x7a0   : >> { %v7557_v50 = vld [vmem:[%s9113_s8 + $0x60] sm:$0xff]   ;;  %v7558_v59 = vld [vmem:[%s9113_s8 + $0x68] sm:$0xff]   ;;  %v7561_v62 = vld [vmem:[%s9113_s8 + $0x70] sm:$0xff]  }
 0x7a1   : >> { %v7559_v54 = vld [vmem:[%s9113_s8 + $0x20] sm:$0xff]   ;;  %v7560_v0 = vld [vmem:[%s9113_s8 + $0x28] sm:$0xff]   ;;  %v7562_v9 = vld [vmem:[%s9113_s8 + $0x78] sm:$0xff]  }
 0x7a2   : >> { %v6163_v2 = vld [vmem:[%s8738_s20 + $0x40] sm:$0xff]  ;;  %v6123_v3 = vld [vmem:[%s8738_s20 + $0x10] sm:$0xff]  ;;  %v6164_v6 = vld [vmem:[%s8738_s20 + $0x48] sm:$0xff] }
 0x7a3   : >> { %4267 = vrot.lane.b32.xlu0 %v6163_v2, %s7656_s28  ;;  %4273 = vrot.lane.b32.xlu1 %v6163_v2, %s7657_s13  ;;  %v6124_v7 = vld [vmem:[%s8738_s20 + $0x18] sm:$0xff]  ;;  %v8749_v8 = vld [vmem:[%s8738_s20 + $0x50] sm:$0xff] }
 0x7a4   : >> { %7040 = vmatprep.subr.bf16.mxu0 %v6163_v2  ;;  %6976 = vmatprep.subr.bf16.mxu1 %v6123_v3  ;;  %v8762_v4 = vld [vmem:[%s8738_s20 + $0x58] sm:$0xff]  ;;  %v8775_v5 = vld [vmem:[%s8738_s20] sm:$0xff]  ;;  %v8785_v13 = vld [vmem:[%s8738_s20 + $0x8] sm:$0xff] }
 0x7a5   : >> { %7041 = vmatpush3.bf16.msra.mxu0 %v6163_v2  ;;  %6977 = vmatpush3.bf16.msra.mxu1 %v6123_v3  ;;  %v8778_v12 = vld [vmem:[%s8738_s20 + $0x60] sm:$0xff]  ;;  %v8788_v14 = vld [vmem:[%s8738_s20 + $0x68] sm:$0xff]  ;;  %v8806_v16 = vld [vmem:[%s8738_s20 + $0x70] sm:$0xff] }
 0x7a6   : >> { %7042 = vmatprep.subr.bf16.mxu0 %v6164_v6  ;;  %6978 = vmatprep.subr.bf16.mxu1 %v6124_v7  ;;  %v8803_v15 = vld [vmem:[%s8738_s20 + $0x20] sm:$0xff]  ;;  %v8813_v17 = vld [vmem:[%s8738_s20 + $0x28] sm:$0xff]  ;;  %v8816_v18 = vld [vmem:[%s8738_s20 + $0x78] sm:$0xff] }
 0x7a7   : >> { %4269 = vrot.lane.b32.xlu0 %v6164_v6, %s7656_s28  ;;  %4275 = vrot.lane.b32.xlu1 %v6164_v6, %s7657_s13  ;;  %v8831_v19 = vld [vmem:[%s8738_s20 + $0x30] sm:$0xff]  ;;  %v8834_v10 = vld [vmem:[%s8738_s20 + $0x80] sm:$0xff] }
 0x7a8   : >> { %v8841_v20 = vld [vmem:[%s8738_s20 + $0x38] sm:$0xff]  ;;  %v8844_v21 = vld [vmem:[%s8738_s20 + $0x88] sm:$0xff]  ;;  %v7563_v2 = vld [vmem:[%s9113_s8 + $0x30] sm:$0xff]   ;;  %s6222_s20 = sshll.u32 %s7632_s22, 4  ;;  %s3890_s22 = sadd.s32 1, %s7632_s22  }
 0x7a9   : >> { %7043 = vmatpush3.bf16.msra.mxu0 %v6164_v6  ;;  %6979 = vmatpush3.bf16.msra.mxu1 %v6124_v7  ;;  %p3887_p7 = scmp.ge.s32.totalorder %s3890_s22, 2  }
 0x7aa   : > { %4811 = vst [vmem:[#allocation7] sm:$0xff] (%p3887_p7), %v7643_v27  ;;  %4812 = vst [vmem:[#allocation7 + $0x8] sm:$0xff] (%p3887_p7), %v7643_v27  ;;  %s8987_s26 = smov (%p3887_p7), 0  }
 0x7ab   : >> { %3923 = vrot.lane.b32.xlu0 %v6123_v3, %s7656_s28  ;;  %4361 = vrot.lane.b32.xlu1 %v8749_v8, %s7656_s28  ;;  %4814 = vst [vmem:[#allocation7 + $0x30] sm:$0xff] (%p3887_p7), %v7643_v27  ;;  %4815 = vst [vmem:[#allocation7 + $0x38] sm:$0xff] (%p3887_p7), %v7643_v27 }
 0x7af   : >> { %3925 = vrot.lane.b32.xlu0 %v6124_v7, %s7656_s28  ;;  %4363 = vrot.lane.b32.xlu1 %v8762_v4, %s7656_s28 }
 0x7b3   : >> { %3929 = vrot.lane.b32.xlu0 %v6123_v3, %s7657_s13  ;;  %4367 = vrot.lane.b32.xlu1 %v8749_v8, %s7657_s13 }
 0x7b7   : >> { %3931 = vrot.lane.b32.xlu0 %v6124_v7, %s7657_s13  ;;  %4369 = vrot.lane.b32.xlu1 %v8762_v4, %s7657_s13 }
 0x7bb   : >> { %3899 = vrot.lane.b32.xlu0 %v8775_v5, %s7656_s28  ;;  %4455 = vrot.lane.b32.xlu1 %v8778_v12, %s7656_s28 }
 0x7bf   : >> { %3901 = vrot.lane.b32.xlu0 %v8785_v13, %s7656_s28  ;;  %4457 = vrot.lane.b32.xlu1 %v8788_v14, %s7656_s28 }
 0x7c3   : >> { %3905 = vrot.lane.b32.xlu0 %v8775_v5, %s7657_s13  ;;  %4461 = vrot.lane.b32.xlu1 %v8778_v12, %s7657_s13 }
 0x7c7   : >> { %3907 = vrot.lane.b32.xlu0 %v8785_v13, %s7657_s13  ;;  %4463 = vrot.lane.b32.xlu1 %v8788_v14, %s7657_s13 }
 0x7cb   : >> { %4079 = vrot.lane.b32.xlu0 %v8803_v15, %s7656_s28  ;;  %4549 = vrot.lane.b32.xlu1 %v8806_v16, %s7656_s28 }
 0x7cf   : >> { %4081 = vrot.lane.b32.xlu0 %v8813_v17, %s7656_s28  ;;  %4551 = vrot.lane.b32.xlu1 %v8816_v18, %s7656_s28 }
 0x7d3   : >> { %4085 = vrot.lane.b32.xlu0 %v8803_v15, %s7657_s13  ;;  %4555 = vrot.lane.b32.xlu1 %v8806_v16, %s7657_s13 }
 0x7d7   : >> { %4087 = vrot.lane.b32.xlu0 %v8813_v17, %s7657_s13  ;;  %4557 = vrot.lane.b32.xlu1 %v8816_v18, %s7657_s13 }
 0x7db   : >> { %4173 = vrot.lane.b32.xlu0 %v8831_v19, %s7656_s28  ;;  %4643 = vrot.lane.b32.xlu1 %v8834_v10, %s7656_s28 }
 0x7df   : >> { %4175 = vrot.lane.b32.xlu0 %v8841_v20, %s7656_s28  ;;  %4645 = vrot.lane.b32.xlu1 %v8844_v21, %s7656_s28  ;;  %s5652_s28 = scalar_lea.vmem [#allocation6], %s6222_s20 }
 0x7e3   : >> { %4179 = vrot.lane.b32.xlu0 %v8831_v19, %s7657_s13  ;;  %4649 = vrot.lane.b32.xlu1 %v8834_v10, %s7657_s13 }
 0x7e7   : >> { %4181 = vrot.lane.b32.xlu0 %v8841_v20, %s7657_s13  ;;  %4651 = vrot.lane.b32.xlu1 %v8844_v21, %s7657_s13 }
 0x7eb   : >> { %4740 = vperm.xlu1 %7538, %v4730_v22   ;;  %4735 = vperm.xlu0 %7537, %v4729_v23  }
 0x7ef   : >> { %4745 = vperm.xlu1 %7538, %v4731_v25   ;;  %4750 = vperm.xlu0 %7537, %v4732_v26  }
 0x815   : >> { %v4268_v28 = vpop.permute.xlu0 %4267  ;;  %v4274_v29 = vpop.permute.xlu1 %4273 }
 0x816   : >> { %7044 = vmatprep.subr.bf16.mxu0 %v4268_v28 }
 0x817   : >> { %7045 = vmatpush3.bf16.msra.mxu0 %v4268_v28 }
 0x819   : >> { %v4270_v30 = vpop.permute.xlu0 %4269  ;;  %v4276_v32 = vpop.permute.xlu1 %4275 }
 0x81a   : >> { %7046 = vmatprep.subr.bf16.mxu0 %v4270_v30 }
 0x81b   : >> { %7047 = vmatpush3.bf16.msra.mxu0 %v4270_v30 }
 0x81c   : >> { %7048 = vmatprep.subr.bf16.mxu0 %v4274_v29 }
 0x81d   : >> { %v3924_v31 = vpop.permute.xlu0 %3923  ;;  %v4362_v35 = vpop.permute.xlu1 %4361 }
 0x81e   : >> { %6980 = vmatprep.subr.bf16.mxu1 %v3924_v31 }
 0x81f   : >> { %6981 = vmatpush3.bf16.msra.mxu1 %v3924_v31  ;;  %7049 = vmatpush3.bf16.msra.mxu0 %v4274_v29 }
 0x820   : >> { %7050 = vmatprep.subr.bf16.mxu0 %v4276_v32 }
 0x821   : >> { %v3926_v33 = vpop.permute.xlu0 %3925  ;;  %v4364_v39 = vpop.permute.xlu1 %4363 }
 0x822   : >> { %6982 = vmatprep.subr.bf16.mxu1 %v3926_v33 }
 0x823   : >> { %6983 = vmatpush3.bf16.msra.mxu1 %v3926_v33  ;;  %7051 = vmatpush3.bf16.msra.mxu0 %v4276_v32 }
 0x824   : >> { %7056 = vmatprep.subr.bf16.mxu0 %v8749_v8 }
 0x825   : >> { %v3930_v37 = vpop.permute.xlu0 %3929  ;;  %v4368_v43 = vpop.permute.xlu1 %4367 }
 0x826   : >> { %6984 = vmatprep.subr.bf16.mxu1 %v3930_v37  ;;  %7053 = vmatmul.mubr.msk.bf16.vlgmr.msra.gmra.mrb[0].mxu0 %vm2076_vm1, %v7550_v34 }
 0x827   : >> { %6985 = vmatpush3.bf16.msra.mxu1 %v3930_v37  ;;  %7057 = vmatpush3.bf16.msra.mxu0 %v8749_v8 }
 0x828   : >> { %7058 = vmatprep.subr.bf16.mxu0 %v8762_v4  ;;  %7068 = vmatprep.mubr.msk.bf16.mxu0 %vm2076_vm1, %v7553_v36 }
 0x829   : >> { %v3932_v38 = vpop.permute.xlu0 %3931  ;;  %v4370_v45 = vpop.permute.xlu1 %4369 }
 0x82a   : >> { %6986 = vmatprep.subr.bf16.mxu1 %v3932_v38 }
 0x82b   : >> { %6987 = vmatpush3.bf16.msra.mxu1 %v3932_v38  ;;  %7059 = vmatpush3.bf16.msra.mxu0 %v8762_v4 }
 0x82c   : >> { %6992 = vmatprep.subr.bf16.mxu1 %v8775_v5  ;;  %7060 = vmatprep.subr.bf16.mxu0 %v4362_v35 }
 0x82d   : >> { %v3900_v41 = vpop.permute.xlu0 %3899  ;;  %v4456_v48 = vpop.permute.xlu1 %4455 }
 0x82e   : >> { %6989 = vmatmul.mubr.msk.bf16.vlgmr.msra.gmra.mrb[0].mxu1 %vm2076_vm1, %v7552_v40 }
 0x82f   : >> { %6993 = vmatpush3.bf16.msra.mxu1 %v8775_v5  ;;  %7061 = vmatpush3.bf16.msra.mxu0 %v4362_v35  ;;  %v7565_v5 = vld [vmem:[%s9113_s8 + $0x80] sm:$0xff]  }
 0x830   : >> { %6994 = vmatprep.subr.bf16.mxu1 %v8785_v13  ;;  %7062 = vmatprep.subr.bf16.mxu0 %v4364_v39 }
 0x831   : >> { %v3902_v44 = vpop.permute.xlu0 %3901  ;;  %7004 = vmatprep.mubr.msk.bf16.mxu1 %vm2076_vm1, %v7555_v42  ;;  %v4458_v51 = vpop.permute.xlu1 %4457 }
 0x833   : >> { %6995 = vmatpush3.bf16.msra.mxu1 %v8785_v13  ;;  %7063 = vmatpush3.bf16.msra.mxu0 %v4364_v39  ;;  %v7564_v13 = vld [vmem:[%s9113_s8 + $0x38] sm:$0xff]  }
 0x834   : >> { %6996 = vmatprep.subr.bf16.mxu1 %v3900_v41  ;;  %7064 = vmatprep.subr.bf16.mxu0 %v4368_v43 }
 0x835   : >> { %v3906_v46 = vpop.permute.xlu0 %3905  ;;  %v4462_v55 = vpop.permute.xlu1 %4461 }
 0x837   : >> { %6997 = vmatpush3.bf16.msra.mxu1 %v3900_v41  ;;  %7065 = vmatpush3.bf16.msra.mxu0 %v4368_v43 }
 0x838   : >> { %6998 = vmatprep.subr.bf16.mxu1 %v3902_v44  ;;  %7066 = vmatprep.subr.bf16.mxu0 %v4370_v45 }
 0x839   : >> { %v3908_v49 = vpop.permute.xlu0 %3907  ;;  %v4464_v57 = vpop.permute.xlu1 %4463 }
 0x83b   : >> { %6999 = vmatpush3.bf16.msra.mxu1 %v3902_v44  ;;  %7067 = vmatpush3.bf16.msra.mxu0 %v4370_v45 }
 0x83c   : >> { %7000 = vmatprep.subr.bf16.mxu1 %v3906_v46  ;;  %7072 = vmatprep.subr.bf16.mxu0 %v8778_v12 }
 0x83d   : >> { %v4080_v53 = vpop.permute.xlu0 %4079  ;;  %v4550_v60 = vpop.permute.xlu1 %4549 }
 0x83e   : >> { %7069 = vmatmul.mubr.msk.bf16.vlgmr.msra.gmra.mrb[0].mxu0 %vm2076_vm1, %v7554_v47 }
 0x83f   : >> { %7001 = vmatpush3.bf16.msra.mxu1 %v3906_v46  ;;  %7073 = vmatpush3.bf16.msra.mxu0 %v8778_v12 }
 0x840   : >> { %7002 = vmatprep.subr.bf16.mxu1 %v3908_v49  ;;  %7074 = vmatprep.subr.bf16.mxu0 %v8788_v14 }
 0x841   : >> { %7084 = vmatprep.mubr.msk.bf16.mxu0 %vm2076_vm1, %v7557_v50  ;;  %v4082_v56 = vpop.permute.xlu0 %4081  ;;  %v4552_v63 = vpop.permute.xlu1 %4551 }
 0x843   : >> { %7003 = vmatpush3.bf16.msra.mxu1 %v3908_v49  ;;  %7075 = vmatpush3.bf16.msra.mxu0 %v8788_v14 }
 0x844   : >> { %7008 = vmatprep.subr.bf16.mxu1 %v8803_v15  ;;  %7076 = vmatprep.subr.bf16.mxu0 %v4456_v48 }
 0x845   : >> { %v4086_v58 = vpop.permute.xlu0 %4085  ;;  %v4556_v3 = vpop.permute.xlu1 %4555 }
 0x846   : >> { %7005 = vmatmul.mubr.msk.bf16.vlgmr.msra.gmra.mrb[0].mxu1 %vm2076_vm1, %v7556_v52 }
 0x847   : >> { %7009 = vmatpush3.bf16.msra.mxu1 %v8803_v15  ;;  %7077 = vmatpush3.bf16.msra.mxu0 %v4456_v48 }
 0x848   : >> { %7010 = vmatprep.subr.bf16.mxu1 %v8813_v17  ;;  %7078 = vmatprep.subr.bf16.mxu0 %v4458_v51 }
 0x849   : >> { %7020 = vmatprep.mubr.msk.bf16.mxu1 %vm2076_vm1, %v7559_v54  ;;  %v4088_v61 = vpop.permute.xlu0 %4087  ;;  %v4558_v7 = vpop.permute.xlu1 %4557 }
 0x84b   : >> { %7011 = vmatpush3.bf16.msra.mxu1 %v8813_v17  ;;  %7079 = vmatpush3.bf16.msra.mxu0 %v4458_v51 }
 0x84c   : >> { %7012 = vmatprep.subr.bf16.mxu1 %v4080_v53  ;;  %7080 = vmatprep.subr.bf16.mxu0 %v4462_v55 }
 0x84d   : >> { %v4174_v1 = vpop.permute.xlu0 %4173  ;;  %v4644_v11 = vpop.permute.xlu1 %4643 }
 0x84f   : >> { %7013 = vmatpush3.bf16.msra.mxu1 %v4080_v53  ;;  %7081 = vmatpush3.bf16.msra.mxu0 %v4462_v55 }
 0x850   : >> { %7014 = vmatprep.subr.bf16.mxu1 %v4082_v56  ;;  %7082 = vmatprep.subr.bf16.mxu0 %v4464_v57 }
 0x851   : >> { %v4176_v6 = vpop.permute.xlu0 %4175  ;;  %v4646_v12 = vpop.permute.xlu1 %4645 }
 0x853   : >> { %7015 = vmatpush3.bf16.msra.mxu1 %v4082_v56  ;;  %7083 = vmatpush3.bf16.msra.mxu0 %v4464_v57 }
 0x854   : >> { %7016 = vmatprep.subr.bf16.mxu1 %v4086_v58  ;;  %7088 = vmatprep.subr.bf16.mxu0 %v8806_v16 }
 0x855   : >> { %v4180_v8 = vpop.permute.xlu0 %4179  ;;  %v4650_v14 = vpop.permute.xlu1 %4649 }
 0x856   : >> { %7085 = vmatmul.mubr.msk.bf16.vlgmr.msra.gmra.mrb[0].mxu0 %vm2076_vm1, %v7558_v59 }
 0x857   : >> { %7017 = vmatpush3.bf16.msra.mxu1 %v4086_v58  ;;  %7089 = vmatpush3.bf16.msra.mxu0 %v8806_v16  ;;  %v7566_v16 = vld [vmem:[%s9113_s8 + $0x88] sm:$0xff]  }
 0x858   : >> { %7018 = vmatprep.subr.bf16.mxu1 %v4088_v61  ;;  %7090 = vmatprep.subr.bf16.mxu0 %v8816_v18 }
 0x859   : >> { %7100 = vmatprep.mubr.msk.bf16.mxu0 %vm2076_vm1, %v7561_v62  ;;  %v4182_v4 = vpop.permute.xlu0 %4181  ;;  %v4652_v15 = vpop.permute.xlu1 %4651 }
 0x85b   : >> { %7019 = vmatpush3.bf16.msra.mxu1 %v4088_v61  ;;  %7091 = vmatpush3.bf16.msra.mxu0 %v8816_v18 }
 0x85c   : >> { %7024 = vmatprep.subr.bf16.mxu1 %v8831_v19  ;;  %7092 = vmatprep.subr.bf16.mxu0 %v4550_v60 }
 0x85e   : >> { %7021 = vmatmul.mubr.msk.bf16.vlgmr.msra.gmra.mrb[0].mxu1 %vm2076_vm1, %v7560_v0 }
 0x85f   : >> { %7025 = vmatpush3.bf16.msra.mxu1 %v8831_v19  ;;  %7093 = vmatpush3.bf16.msra.mxu0 %v4550_v60 }
 0x860   : >> { %7026 = vmatprep.subr.bf16.mxu1 %v8841_v20  ;;  %7094 = vmatprep.subr.bf16.mxu0 %v4552_v63 }
 0x861   : >> { %7036 = vmatprep.mubr.msk.bf16.mxu1 %vm2076_vm1, %v7563_v2 }
 0x863   : >> { %7027 = vmatpush3.bf16.msra.mxu1 %v8841_v20  ;;  %7095 = vmatpush3.bf16.msra.mxu0 %v4552_v63 }
 0x864   : >> { %7028 = vmatprep.subr.bf16.mxu1 %v4174_v1  ;;  %7096 = vmatprep.subr.bf16.mxu0 %v4556_v3 }
 0x867   : >> { %7029 = vmatpush3.bf16.msra.mxu1 %v4174_v1  ;;  %7097 = vmatpush3.bf16.msra.mxu0 %v4556_v3 }
 0x868   : >> { %7030 = vmatprep.subr.bf16.mxu1 %v4176_v6  ;;  %7098 = vmatprep.subr.bf16.mxu0 %v4558_v7 }
 0x86a   : >> { %v4741_v20 = vpop.permute.xlu1 %4740 }
 0x86b   : >> { %7031 = vmatpush3.bf16.msra.mxu1 %v4176_v6  ;;  %7099 = vmatpush3.bf16.msra.mxu0 %v4558_v7 }
 0x86c   : >> { %7032 = vmatprep.subr.bf16.mxu1 %v4180_v8  ;;  %7104 = vmatprep.subr.bf16.mxu0 %v8834_v10 }
 0x86e   : >> { %7101 = vmatmul.mubr.msk.bf16.vlgmr.msra.gmra.mrb[0].mxu0 %vm2076_vm1, %v7562_v9  ;;  %v4746_v23 = vpop.permute.xlu1 %4745 }
 0x86f   : >> { %7033 = vmatpush3.bf16.msra.mxu1 %v4180_v8  ;;  %7105 = vmatpush3.bf16.msra.mxu0 %v8834_v10 }
 0x870   : >> { %7034 = vmatprep.subr.bf16.mxu1 %v4182_v4  ;;  %7106 = vmatprep.subr.bf16.mxu0 %v8844_v21 }
 0x871   : >> { %7116 = vmatprep.mubr.msk.bf16.mxu0 %vm2076_vm1, %v7565_v5 }
 0x873   : >> { %7035 = vmatpush3.bf16.msra.mxu1 %v4182_v4  ;;  %7107 = vmatpush3.bf16.msra.mxu0 %v8844_v21  ;;  %v4736_v21 = vpop.permute.xlu0 %4735 }
 0x874   : >> { %7108 = vmatprep.subr.bf16.mxu0 %v4644_v11 }
 0x876   : >> { %7037 = vmatmul.mubr.msk.bf16.vlgmr.msra.gmra.mrb[0].mxu1 %vm2076_vm1, %v7564_v13 }
 0x877   : >> { %7109 = vmatpush3.bf16.msra.mxu0 %v4644_v11  ;;  %v4751_v33 = vpop.permute.xlu0 %4750 }
 0x878   : >> { %7110 = vmatprep.subr.bf16.mxu0 %v4646_v12 }
 0x87b   : >> { %7111 = vmatpush3.bf16.msra.mxu0 %v4646_v12 }
 0x87c   : >> { %7112 = vmatprep.subr.bf16.mxu0 %v4650_v14 }
 0x87f   : >> { %7113 = vmatpush3.bf16.msra.mxu0 %v4650_v14 }
 0x880   : >> { %7114 = vmatprep.subr.bf16.mxu0 %v4652_v15 }
 0x883   : >> { %7115 = vmatpush3.bf16.msra.mxu0 %v4652_v15 }
 0x886   : >> { %7117 = vmatmul.mubr.msk.bf16.vlgmr.msra.gmra.mrb[0].mxu0 %vm2076_vm1, %v7566_v16 }
 0x949   : >> { %v7038_v17 = vpop.f32.mrb[0].mxu1 }
 0x94a   : >> { %v4240_v18 = vpop.f32.mrb[1].mxu1 }
 0x94b   : >> { %v7039_v19 = vpop.f32.mrb[2].mxu1 }
 0x94c   : >> { %v4243_v10 = vpop.f32.mrb[3].mxu1 }
 0x959   : >> { %v7118_v22 = vpop.f32.mrb[0].mxu0 }
 0x95a   : >> { %v7338_v24 = vadd.f32 %v7118_v22, %v7038_v17  ;;  %v4710_v25 = vpop.f32.mrb[1].mxu0 }
 0x95b   : >> { %v7339_v26 = vadd.f32 %v4710_v25, %v4240_v18  ;;  %v7119_v28 = vpop.f32.mrb[2].mxu0 }
 0x95c   : >> { %v4755_v29 = vadd.f32 %v7338_v24, %v4746_v23  ;;  %v7340_v30 = vadd.f32 %v7119_v28, %v7039_v19  ;;  %v4713_v31 = vpop.f32.mrb[3].mxu0 }
 0x95d   : >> { %v4753_v32 = vadd.f32 %v7339_v26, %v4736_v21  ;;  %v7341_v34 = vadd.f32 %v4713_v31, %v4243_v10 }
 0x95e   : >> { %vm4759_vm11 = vcmp.ge.f32.partialorder %v4755_v29, 0.0  ;;  %v4763_v35 = vmul.f32 0.1, %v4755_v29  ;;  %v4756_v36 = vadd.f32 %v7340_v30, %v4751_v33 }
 0x95f   : >> { %vm4757_vm12 = vcmp.ge.f32.partialorder %v4753_v32, 0.0  ;;  %v4761_v37 = vmul.f32 0.1, %v4753_v32  ;;  %v4754_v38 = vadd.f32 %v7341_v34, %v4741_v20 }
 0x960   : >> { %vm4760_vm13 = vcmp.ge.f32.partialorder %v4756_v36, 0.0  ;;  %v4764_v39 = vmul.f32 0.1, %v4756_v36  ;;  %v4767_v40 = vsel %vm4759_vm11, %v4755_v29, %v4763_v35 }
 0x961   : >> { %vm4758_vm2 = vcmp.ge.f32.partialorder %v4754_v38, 0.0  ;;  %v4762_v41 = vmul.f32 0.1, %v4754_v38  ;;  %4774 = vst.msk [vmem:[%s4770_s16 + $0x10] sm:$0xff] %vm1955_vm10, %v4767_v40  ;;  %v4765_v42 = vsel %vm4757_vm12, %v4753_v32, %v4761_v37 }
 0x962   : >> { %v4768_v43 = vsel %vm4760_vm13, %v4756_v36, %v4764_v39  ;;  %4772 = vst.msk [vmem:[%s4770_s16] sm:$0xff] %vm1955_vm10, %v4765_v42 }
 0x963   : >> { %v7544_v44 = vpack.i.bf16 %v4768_v43, %v4767_v40  ;;  %4775 = vst.msk [vmem:[%s4770_s16 + $0x18] sm:$0xff] %vm1955_vm10, %v4768_v43  ;;  %v4766_v45 = vsel %vm4758_vm2, %v4754_v38, %v4762_v41 }
 0x964   : >> { %v7539_v46 = vpack.i.bf16 %v4766_v45, %v4765_v42  ;;  %4773 = vst.msk [vmem:[%s4770_s16 + $0x8] sm:$0xff] %vm1955_vm10, %v4766_v45 }
 0x965   : >> { %7545 = vrot.lane.b32.xlu0 %v7544_v44, %s7659_s21 }
 0x966   : >> { %7540 = vrot.lane.b32.xlu1 %v7539_v46, %s7659_s21 }
 0x9d7   : >> { %v7546_v47 = vpop.permute.xlu0 %7545 }
 0x9d8   : >> { %v7548_v48 = vunpack.i.h.bf16 %v7546_v47  ;;  %v7547_v49 = vunpack.i.l.bf16 %v7546_v47  ;;  %v7541_v50 = vpop.permute.xlu1 %7540 }
 0x9d9   : >> { %v7543_v51 = vunpack.i.h.bf16 %v7541_v50  ;;  %v7542_v52 = vunpack.i.l.bf16 %v7541_v50  ;;  %3889 = sbr.rel (!%p3887_p7) target bundleno = 1948 (0x79c), region = 335 }
 0x9da   : >> { %v4796_v53 = vsel %vm1976_vm14, 0.0, %v7548_v48  ;;  %v4795_v54 = vsel %vm1976_vm14, 0.0, %v7547_v49 }
 0x9db   : >> { %v4801_v55 = vsel %vm1981_vm15, %v4796_v53, 0.0  ;;  %v4800_v56 = vsel %vm1981_vm15, %v4795_v54, 0.0  ;;  %v4794_v57 = vsel %vm1976_vm14, 0.0, %v7543_v51  ;;  %v4793_v58 = vsel %vm1976_vm14, 0.0, %v7542_v52 }
 0x9dc   : >> { %v4803_v59 = vpack.c.bf16 %v4801_v55, %v4800_v56  ;;  %v4799_v60 = vsel %vm1981_vm15, %v4794_v57, 0.0  ;;  %v4798_v61 = vsel %vm1981_vm15, %v4793_v58, 0.0 }
 0x9dd   : >> { %v4802_v62 = vpack.c.bf16 %v4799_v60, %v4798_v61 }
 0x9de   : >> { %6224 = vst.msk [vmem:[%s5652_s28 + $0x18] sm:$0xff] %vm1991_vm0, %v4803_v59 }
 0x9df   : >> { %6223 = vst.msk [vmem:[%s5652_s28 + $0x10] sm:$0xff] %vm1991_vm0, %v4802_v62 }
 0x9e0 LB: >> { %s6308_s13 = sshll.u32 %s7636_s26, 4  ;;  %s7660_s25 = smov 127   ;;  %v7579_v27 = vld [vmem:[%s9115_s10] sm:$0xff]   ;;  %v7581_v7 = vld [vmem:[%s9115_s10 + $0x10] sm:$0xff]   ;;  %v5096_v8 = vld [vmem:[%s9116_s11 + $0x8] sm:$0xff]  ;;  %v7662_v11 = vmov 0   ;;  %s7636_s26 = sphi %s8987_s26, %s4821_s26  }
 0x9e1   : >> { %s4824_s22 = scalar_lea.vmem [#allocation6], %s6308_s13  ;;  %s7661_s12 = smov 126   ;;  %7148 = vmatprep.mubr.msk.bf16.mxu0 %vm2076_vm1, %v7579_v27  ;;  %7132 = vmatprep.mubr.msk.bf16.mxu1 %vm2076_vm1, %v7581_v7  ;;  %v5095_v9 = vld [vmem:[%s9116_s11] sm:$0xff]  ;;  %v5097_v4 = vld [vmem:[%s9116_s11 + $0x10] sm:$0xff]  ;;  %v5098_v5 = vld [vmem:[%s9116_s11 + $0x18] sm:$0xff] }
 0x9e2   : >> { %7568 = vset.pattern.permute.xlu1 %v7662_v11  ;;  %7567 = vset.pattern.permute.xlu0 %v7662_v11  ;;  %v7580_v18 = vld [vmem:[%s9115_s10 + $0x8] sm:$0xff]   ;;  %v7583_v10 = vld [vmem:[%s9115_s10 + $0x20] sm:$0xff]   ;;  %v7582_v23 = vld [vmem:[%s9115_s10 + $0x18] sm:$0xff]   ;;  %s6253_s21 = sshll.u32 %s7636_s26, 5  ;;  %s7663_s28 = smov 1  }
 0x9e3   : >> { %v7584_v26 = vld [vmem:[%s9115_s10 + $0x28] sm:$0xff]   ;;  %s5136_s20 = scalar_lea.vmem %s7861_s14, %s6253_s21  ;;  %s4821_s26 = sadd.s32 1, %s7636_s26  }
 0x9e4   : >> { %p4818_p8 = scmp.ge.s32.totalorder %s4821_s26, 2  }
 0x9e6   : >> { %v4825_v63 = vld [vmem:[%s4824_s22] sm:$0xff]  ;;  %v6228_v0 = vld [vmem:[%s4824_s22 + $0x10] sm:$0xff]  ;;  %v4826_v1 = vld [vmem:[%s4824_s22 + $0x8] sm:$0xff] }
 0x9e7   : >> { %4829 = vrot.lane.b32.xlu0 %v4825_v63, %s7660_s25  ;;  %4835 = vrot.lane.b32.xlu1 %v4825_v63, %s7661_s12  ;;  %v6229_v2 = vld [vmem:[%s4824_s22 + $0x18] sm:$0xff]  ;;  %v6243_v3 = vld [vmem:[%s4824_s22 + $0x20] sm:$0xff] }
 0x9e8   : >> { %7136 = vmatprep.subr.bf16.mxu0 %v4825_v63  ;;  %7120 = vmatprep.subr.bf16.mxu1 %v6228_v0  ;;  %v6244_v6 = vld [vmem:[%s4824_s22 + $0x28] sm:$0xff]  ;;  %s5665_s22 = scalar_lea.vmem [#allocation7], %s6308_s13 }
 0x9e9   : >> { %7137 = vmatpush3.bf16.msra.mxu0 %v4825_v63  ;;  %7121 = vmatpush3.bf16.msra.mxu1 %v6228_v0 }
 0x9ea   : >> { %7138 = vmatprep.subr.bf16.mxu0 %v4826_v1  ;;  %7122 = vmatprep.subr.bf16.mxu1 %v6229_v2 }
 0x9eb   : >> { %4831 = vrot.lane.b32.xlu0 %v4826_v1, %s7660_s25  ;;  %4837 = vrot.lane.b32.xlu1 %v4826_v1, %s7661_s12 }
 0x9ed   : >> { %7139 = vmatpush3.bf16.msra.mxu0 %v4826_v1  ;;  %7123 = vmatpush3.bf16.msra.mxu1 %v6229_v2 }
 0x9ef   : >> { %4853 = vrot.lane.b32.xlu0 %v6228_v0, %s7660_s25  ;;  %5009 = vrot.lane.b32.xlu1 %v6243_v3, %s7660_s25 }
 0x9f3   : >> { %4855 = vrot.lane.b32.xlu0 %v6229_v2, %s7660_s25  ;;  %5011 = vrot.lane.b32.xlu1 %v6244_v6, %s7660_s25  ;;  %s9052_s25 = smov (%p4818_p8), 0  }
 0x9f7   : >> { %4859 = vrot.lane.b32.xlu0 %v6228_v0, %s7661_s12  ;;  %5015 = vrot.lane.b32.xlu1 %v6243_v3, %s7661_s12 }
 0x9fb   : >> { %4861 = vrot.lane.b32.xlu0 %v6229_v2, %s7661_s12  ;;  %5017 = vrot.lane.b32.xlu1 %v6244_v6, %s7661_s12 }
 0x9ff   : >> { %5106 = vperm.xlu1 %7568, %v5096_v8   ;;  %5101 = vperm.xlu0 %7567, %v5095_v9  }
 0xa03   : >> { %5111 = vperm.xlu1 %7568, %v5097_v4   ;;  %5116 = vperm.xlu0 %7567, %v5098_v5  }
 0xa59   : >> { %v4830_v12 = vpop.permute.xlu0 %4829  ;;  %v4836_v13 = vpop.permute.xlu1 %4835 }
 0xa5a   : >> { %7140 = vmatprep.subr.bf16.mxu0 %v4830_v12 }
 0xa5b   : >> { %7141 = vmatpush3.bf16.msra.mxu0 %v4830_v12 }
 0xa5d   : >> { %v4832_v14 = vpop.permute.xlu0 %4831  ;;  %v4838_v15 = vpop.permute.xlu1 %4837 }
 0xa5e   : >> { %7142 = vmatprep.subr.bf16.mxu0 %v4832_v14 }
 0xa5f   : >> { %7143 = vmatpush3.bf16.msra.mxu0 %v4832_v14 }
 0xa60   : >> { %7144 = vmatprep.subr.bf16.mxu0 %v4836_v13 }
 0xa61   : >> { %v4854_v16 = vpop.permute.xlu0 %4853  ;;  %v5010_v19 = vpop.permute.xlu1 %5009 }
 0xa62   : >> { %7124 = vmatprep.subr.bf16.mxu1 %v4854_v16 }
 0xa63   : >> { %7145 = vmatpush3.bf16.msra.mxu0 %v4836_v13  ;;  %7125 = vmatpush3.bf16.msra.mxu1 %v4854_v16 }
 0xa64   : >> { %7146 = vmatprep.subr.bf16.mxu0 %v4838_v15 }
 0xa65   : >> { %v4856_v17 = vpop.permute.xlu0 %4855  ;;  %v5012_v21 = vpop.permute.xlu1 %5011 }
 0xa66   : >> { %7126 = vmatprep.subr.bf16.mxu1 %v4856_v17 }
 0xa67   : >> { %7147 = vmatpush3.bf16.msra.mxu0 %v4838_v15  ;;  %7127 = vmatpush3.bf16.msra.mxu1 %v4856_v17 }
 0xa68   : >> { %7152 = vmatprep.subr.bf16.mxu0 %v6243_v3 }
 0xa69   : >> { %v4860_v20 = vpop.permute.xlu0 %4859  ;;  %v5016_v24 = vpop.permute.xlu1 %5015 }
 0xa6a   : >> { %7149 = vmatmul.mubr.msk.bf16.vlgmr.msra.gmra.mrb[0].mxu0 %vm2076_vm1, %v7580_v18  ;;  %7128 = vmatprep.subr.bf16.mxu1 %v4860_v20 }
 0xa6b   : >> { %7153 = vmatpush3.bf16.msra.mxu0 %v6243_v3  ;;  %7129 = vmatpush3.bf16.msra.mxu1 %v4860_v20 }
 0xa6c   : >> { %7154 = vmatprep.subr.bf16.mxu0 %v6244_v6  ;;  %7164 = vmatprep.mubr.msk.bf16.mxu0 %vm2076_vm1, %v7583_v10 }
 0xa6d   : >> { %v4862_v22 = vpop.permute.xlu0 %4861  ;;  %v5018_v25 = vpop.permute.xlu1 %5017 }
 0xa6e   : >> { %7130 = vmatprep.subr.bf16.mxu1 %v4862_v22 }
 0xa6f   : >> { %7155 = vmatpush3.bf16.msra.mxu0 %v6244_v6  ;;  %7131 = vmatpush3.bf16.msra.mxu1 %v4862_v22 }
 0xa70   : >> { %7156 = vmatprep.subr.bf16.mxu0 %v5010_v19 }
 0xa72   : >> { %7133 = vmatmul.mubr.msk.bf16.vlgmr.msra.gmra.mrb[0].mxu1 %vm2076_vm1, %v7582_v23 }
 0xa73   : >> { %7157 = vmatpush3.bf16.msra.mxu0 %v5010_v19 }
 0xa74   : >> { %7158 = vmatprep.subr.bf16.mxu0 %v5012_v21 }
 0xa77   : >> { %7159 = vmatpush3.bf16.msra.mxu0 %v5012_v21 }
 0xa78   : >> { %7160 = vmatprep.subr.bf16.mxu0 %v5016_v24 }
 0xa7b   : >> { %7161 = vmatpush3.bf16.msra.mxu0 %v5016_v24 }
 0xa7c   : >> { %7162 = vmatprep.subr.bf16.mxu0 %v5018_v25 }
 0xa7e   : >> { %v5107_v32 = vpop.permute.xlu1 %5106  ;;  %v5102_v33 = vpop.permute.xlu0 %5101 }
 0xa7f   : >> { %7163 = vmatpush3.bf16.msra.mxu0 %v5018_v25 }
 0xa82   : >> { %7165 = vmatmul.mubr.msk.bf16.vlgmr.msra.gmra.mrb[0].mxu0 %vm2076_vm1, %v7584_v26  ;;  %v5112_v35 = vpop.permute.xlu1 %5111  ;;  %v5117_v43 = vpop.permute.xlu0 %5116 }
 0xb45   : >> { %v7134_v28 = vpop.f32.mrb[0].mxu1 }
 0xb46   : >> { %v4921_v29 = vpop.f32.mrb[1].mxu1 }
 0xb47   : >> { %v7135_v30 = vpop.f32.mrb[2].mxu1 }
 0xb48   : >> { %v4924_v31 = vpop.f32.mrb[3].mxu1 }
 0xb55   : >> { %v7166_v34 = vpop.f32.mrb[0].mxu0 }
 0xb56   : >> { %v7370_v36 = vadd.f32 %v7166_v34, %v7134_v28  ;;  %v5076_v37 = vpop.f32.mrb[1].mxu0 }
 0xb57   : >> { %v7371_v38 = vadd.f32 %v5076_v37, %v4921_v29  ;;  %v7167_v39 = vpop.f32.mrb[2].mxu0 }
 0xb58   : >> { %v5121_v40 = vadd.f32 %v7370_v36, %v5112_v35  ;;  %v7372_v41 = vadd.f32 %v7167_v39, %v7135_v30  ;;  %v5079_v42 = vpop.f32.mrb[3].mxu0 }
 0xb59   : >> { %v5119_v44 = vadd.f32 %v7371_v38, %v5102_v33  ;;  %v7373_v45 = vadd.f32 %v5079_v42, %v4924_v31 }
 0xb5a   : >> { %vm5125_vm3 = vcmp.ge.f32.partialorder %v5121_v40, 0.0  ;;  %v5129_v46 = vmul.f32 0.1, %v5121_v40  ;;  %v5122_v47 = vadd.f32 %v7372_v41, %v5117_v43 }
 0xb5b   : >> { %vm5123_vm4 = vcmp.ge.f32.partialorder %v5119_v44, 0.0  ;;  %v5127_v48 = vmul.f32 0.1, %v5119_v44  ;;  %v5120_v49 = vadd.f32 %v7373_v45, %v5107_v32 }
 0xb5c   : >> { %vm5126_vm5 = vcmp.ge.f32.partialorder %v5122_v47, 0.0  ;;  %v5130_v50 = vmul.f32 0.1, %v5122_v47  ;;  %v5133_v51 = vsel %vm5125_vm3, %v5121_v40, %v5129_v46 }
 0xb5d   : >> { %vm5124_vm6 = vcmp.ge.f32.partialorder %v5120_v49, 0.0  ;;  %v5128_v52 = vmul.f32 0.1, %v5120_v49  ;;  %5140 = vst.msk [vmem:[%s5136_s20 + $0x10] sm:$0xff] %vm1955_vm10, %v5133_v51  ;;  %v5131_v53 = vsel %vm5123_vm4, %v5119_v44, %v5127_v48 }
 0xb5e   : >> { %v5134_v54 = vsel %vm5126_vm5, %v5122_v47, %v5130_v50  ;;  %5138 = vst.msk [vmem:[%s5136_s20] sm:$0xff] %vm1955_vm10, %v5131_v53 }
 0xb5f   : >> { %v7574_v55 = vpack.i.bf16 %v5134_v54, %v5133_v51  ;;  %5141 = vst.msk [vmem:[%s5136_s20 + $0x18] sm:$0xff] %vm1955_vm10, %v5134_v54  ;;  %v5132_v56 = vsel %vm5124_vm6, %v5120_v49, %v5128_v52 }
 0xb60   : >> { %v7569_v57 = vpack.i.bf16 %v5132_v56, %v5131_v53  ;;  %5139 = vst.msk [vmem:[%s5136_s20 + $0x8] sm:$0xff] %vm1955_vm10, %v5132_v56 }
 0xb61   : >> { %7575 = vrot.lane.b32.xlu0 %v7574_v55, %s7663_s28 }
 0xb62   : >> { %7570 = vrot.lane.b32.xlu1 %v7569_v57, %s7663_s28 }
 0xbd3   : >> { %v7576_v58 = vpop.permute.xlu0 %7575 }
 0xbd4   : >> { %v7578_v59 = vunpack.i.h.bf16 %v7576_v58  ;;  %v7577_v60 = vunpack.i.l.bf16 %v7576_v58  ;;  %v7571_v61 = vpop.permute.xlu1 %7570 }
 0xbd5   : >> { %v7573_v62 = vunpack.i.h.bf16 %v7571_v61  ;;  %v7572_v63 = vunpack.i.l.bf16 %v7571_v61  ;;  %4820 = sbr.rel (!%p4818_p8) target bundleno = 2528 (0x9e0), region = 346 }
 0xbd6   : >> { %v5162_v0 = vsel %vm1976_vm14, 0.0, %v7578_v59  ;;  %v5161_v1 = vsel %vm1976_vm14, 0.0, %v7577_v60 }
 0xbd7   : >> { %v5167_v27 = vsel %vm1981_vm15, %v5162_v0, 0.0  ;;  %v5166_v2 = vsel %vm1981_vm15, %v5161_v1, 0.0  ;;  %v5160_v3 = vsel %vm1976_vm14, 0.0, %v7573_v62  ;;  %v5159_v6 = vsel %vm1976_vm14, 0.0, %v7572_v63 }
 0xbd8   : >> { %v5169_v7 = vpack.c.bf16 %v5167_v27, %v5166_v2  ;;  %v5165_v8 = vsel %vm1981_vm15, %v5160_v3, 0.0  ;;  %v5164_v9 = vsel %vm1981_vm15, %v5159_v6, 0.0 }
 0xbd9   : >> { %v5168_v11 = vpack.c.bf16 %v5165_v8, %v5164_v9 }
 0xbda   : >> { %6256 = vst.msk [vmem:[%s5665_s22 + $0x18] sm:$0xff] %vm1991_vm0, %v5169_v7 }
 0xbdb   : >> { %6255 = vst.msk [vmem:[%s5665_s22 + $0x10] sm:$0xff] %vm1991_vm0, %v5168_v11 }
 0xbdc LB: >> { %v7664_v4 = vmov 0.0   ;;  %s6309_s13 = sshll.u32 %s7640_s25, 4  ;;  %s7665_s0 = smov 127   ;;  %vm7667_vm10 = vmmov 0   ;;  %v7668_v18 = vmov 0   ;;  %vm5384_vm14 = vcmask 262144   ;;  %s7640_s25 = sphi %s9052_s25, %s5180_s25  }
 0xbdd   : >> { %7168 = vmatprep.subr.bf16.mxu0 %v7664_v4  ;;  %7184 = vmatprep.subr.bf16.mxu1 %v7664_v4  ;;  %s5183_s12 = scalar_lea.vmem [#allocation7], %s6309_s13  ;;  %s7666_s26 = smov 126  }
 0xbde   : >> { %7180 = vmatprep.mubr.msk.bf16.mxu0 %vm7667_vm10, %v7664_v4  ;;  %7196 = vmatprep.mubr.msk.bf16.mxu1 %vm7667_vm10, %v7664_v4  ;;  %s9149_s24 = sld [smem:[#allocation14_spill]]  ;;  %s9150_s2 = sld [smem:[#allocation13_spill]] }
 0xbdf   : >> { %7585 = vset.pattern.permute.xlu0 %v7668_v18  ;;  %s5383_s22 = scalar_lea.vmem %s7867_s3, %s7640_s25  ;;  %s5180_s25 = sadd.s32 1, %s7640_s25  }
 0xbe0   : >> { %p5177_p9 = scmp.ge.s32.totalorder %s5180_s25, 2  }
 0xbe2   : >> { %v6260_v5 = vld [vmem:[%s5183_s12 + $0x10] sm:$0xff]  ;;  %v5184_v12 = vld [vmem:[%s5183_s12] sm:$0xff]  ;;  %v6261_v13 = vld [vmem:[%s5183_s12 + $0x18] sm:$0xff] }
 0xbe3   : >> { %5209 = vrot.lane.b32.xlu0 %v6260_v5, %s7665_s0  ;;  %5215 = vrot.lane.b32.xlu1 %v6260_v5, %s7666_s26  ;;  %v5185_v14 = vld [vmem:[%s5183_s12 + $0x8] sm:$0xff]  ;;  %v6266_v15 = vld [vmem:[%s5183_s12 + $0x20] sm:$0xff] }
 0xbe4   : >> { %7169 = vmatpush3.bf16.msra.mxu0 %v6260_v5  ;;  %7185 = vmatpush3.bf16.msra.mxu1 %v5184_v12  ;;  %v6267_v16 = vld [vmem:[%s5183_s12 + $0x28] sm:$0xff]  ;;  %v5376_v17 = vld [vmem:[%s9149_s24] sm:$0xff] }
 0xbe5   : >> { %7170 = vmatprep.subr.bf16.mxu0 %v7664_v4  ;;  %7186 = vmatprep.subr.bf16.mxu1 %v7664_v4  ;;  %v6262_v24 = vld [vmem:[%s9150_s2 + $0x4] sm:$0xf]  ;;  %v5200_v29 = vld [vmem:[%s9150_s2] sm:$0xf]  ;;  %v6268_v33 = vld [vmem:[%s9150_s2 + $0x8] sm:$0xf] }
 0xbe7   : >> { %5211 = vrot.lane.b32.xlu0 %v6261_v13, %s7665_s0  ;;  %5217 = vrot.lane.b32.xlu1 %v6261_v13, %s7666_s26 }
 0xbe8   : >> { %7171 = vmatpush3.bf16.msra.mxu0 %v6261_v13  ;;  %7187 = vmatpush3.bf16.msra.mxu1 %v5185_v14 }
 0xbe9   : >> { %7172 = vmatprep.subr.bf16.mxu0 %v7664_v4  ;;  %7188 = vmatprep.subr.bf16.mxu1 %v7664_v4 }
 0xbeb   : >> { %5188 = vrot.lane.b32.xlu0 %v5184_v12, %s7665_s0  ;;  %5318 = vrot.lane.b32.xlu1 %v6266_v15, %s7665_s0 }
 0xbef   : >> { %5190 = vrot.lane.b32.xlu0 %v5185_v14, %s7665_s0  ;;  %5320 = vrot.lane.b32.xlu1 %v6267_v16, %s7665_s0 }
 0xbf3   : >> { %5194 = vrot.lane.b32.xlu0 %v5184_v12, %s7666_s26  ;;  %5324 = vrot.lane.b32.xlu1 %v6266_v15, %s7666_s26 }
 0xbf7   : >> { %5196 = vrot.lane.b32.xlu0 %v5185_v14, %s7666_s26  ;;  %5326 = vrot.lane.b32.xlu1 %v6267_v16, %s7666_s26 }
 0xbfb   : >> { %5379 = vperm.xlu0 %7585, %v5376_v17  }
 0xc55   : >> { %v5210_v19 = vpop.permute.xlu0 %5209  ;;  %v5216_v20 = vpop.permute.xlu1 %5215 }
 0xc56   : >> { %7173 = vmatpush3.bf16.msra.mxu0 %v5210_v19 }
 0xc57   : >> { %7174 = vmatprep.subr.bf16.mxu0 %v7664_v4 }
 0xc59   : >> { %v5212_v10 = vpop.permute.xlu0 %5211  ;;  %v5218_v22 = vpop.permute.xlu1 %5217 }
 0xc5a   : >> { %7175 = vmatpush3.bf16.msra.mxu0 %v5212_v10 }
 0xc5b   : >> { %7176 = vmatprep.subr.bf16.mxu0 %v7664_v4 }
 0xc5d   : >> { %v5189_v21 = vpop.permute.xlu0 %5188  ;;  %v5319_v26 = vpop.permute.xlu1 %5318 }
 0xc5e   : >> { %7177 = vmatpush3.bf16.msra.mxu0 %v5216_v20  ;;  %7189 = vmatpush3.bf16.msra.mxu1 %v5189_v21 }
 0xc5f   : >> { %7178 = vmatprep.subr.bf16.mxu0 %v7664_v4  ;;  %7190 = vmatprep.subr.bf16.mxu1 %v7664_v4 }
 0xc61   : >> { %v5191_v23 = vpop.permute.xlu0 %5190  ;;  %v5321_v30 = vpop.permute.xlu1 %5320 }
 0xc62   : >> { %7179 = vmatpush3.bf16.msra.mxu0 %v5218_v22  ;;  %7191 = vmatpush3.bf16.msra.mxu1 %v5191_v23 }
 0xc63   : >> { %7200 = vmatprep.subr.bf16.mxu0 %v7664_v4  ;;  %7192 = vmatprep.subr.bf16.mxu1 %v7664_v4 }
 0xc65   : >> { %7181 = vmatmul.mubr.msk.bf16.vlgmr.msra.gmra.mrb[0].mxu0 %vm2076_vm1, %v6262_v24  ;;  %v5195_v25 = vpop.permute.xlu0 %5194  ;;  %v5325_v31 = vpop.permute.xlu1 %5324 }
 0xc66   : >> { %7193 = vmatpush3.bf16.msra.mxu1 %v5195_v25  ;;  %7201 = vmatpush3.bf16.msra.mxu0 %v6266_v15 }
 0xc67   : >> { %7202 = vmatprep.subr.bf16.mxu0 %v7664_v4  ;;  %7194 = vmatprep.subr.bf16.mxu1 %v7664_v4 }
 0xc68   : >> { %7212 = vmatprep.mubr.msk.bf16.mxu0 %vm7667_vm10, %v7664_v4 }
 0xc69   : >> { %v5197_v28 = vpop.permute.xlu0 %5196  ;;  %v5327_v32 = vpop.permute.xlu1 %5326 }
 0xc6a   : >> { %7195 = vmatpush3.bf16.msra.mxu1 %v5197_v28  ;;  %7203 = vmatpush3.bf16.msra.mxu0 %v6267_v16 }
 0xc6b   : >> { %7204 = vmatprep.subr.bf16.mxu0 %v7664_v4 }
 0xc6d   : >> { %7197 = vmatmul.mubr.msk.bf16.vlgmr.msra.gmra.mrb[0].mxu1 %vm2076_vm1, %v5200_v29 }
 0xc6e   : >> { %7205 = vmatpush3.bf16.msra.mxu0 %v5319_v26 }
 0xc6f   : >> { %7206 = vmatprep.subr.bf16.mxu0 %v7664_v4 }
 0xc72   : >> { %7207 = vmatpush3.bf16.msra.mxu0 %v5321_v30 }
 0xc73   : >> { %7208 = vmatprep.subr.bf16.mxu0 %v7664_v4 }
 0xc76   : >> { %7209 = vmatpush3.bf16.msra.mxu0 %v5325_v31 }
 0xc77   : >> { %7210 = vmatprep.subr.bf16.mxu0 %v7664_v4 }
 0xc7a   : >> { %7211 = vmatpush3.bf16.msra.mxu0 %v5327_v32  ;;  %v5380_v44 = vpop.permute.xlu0 %5379 }
 0xc7d   : >> { %7213 = vmatmul.mubr.msk.bf16.vlgmr.msra.gmra.mrb[4].mxu0 %vm2076_vm1, %v6268_v33 }
 0xd38   : >> { %v5261_v34 = vpop.f32.mrb[0].mxu0 }
 0xd39   : >> { %v7182_v35 = vpop.f32.mrb[1].mxu0 }
 0xd3a   : >> { %v5264_v36 = vpop.f32.mrb[2].mxu0 }
 0xd3b   : >> { %v7183_v37 = vpop.f32.mrb[3].mxu0 }
 0xd40   : >> { %v5304_v38 = vpop.f32.mrb[0].mxu1 }
 0xd41   : >> { %v5305_v39 = vadd.f32 %v5304_v38, %v5261_v34  ;;  %v7198_v40 = vpop.f32.mrb[1].mxu1 }
 0xd42   : >> { %v5307_v41 = vpop.f32.mrb[2].mxu1 }
 0xd43   : >> { %v7199_v42 = vpop.f32.mrb[3].mxu1 }
 0xd4f   : > { %5179 = sbr.rel (!%p5177_p9) target bundleno = 3036 (0xbdc), region = 357 }
 0xd50   : >> { %v5369_v43 = vpop.f32.mrb[4].mxu0 }
 0xd51   : >> { %v5375_v45 = vadd.f32 %v5369_v43, %v5305_v39  ;;  %v7214_v46 = vpop.f32.mrb[5].mxu0 }
 0xd52   : >> { %v5372_v47 = vpop.f32.mrb[6].mxu0 }
 0xd53   : >> { %v5382_v48 = vadd.f32 %v5380_v44, %v5375_v45  ;;  %v7215_v49 = vpop.f32.mrb[7].mxu0 }
 0xd55   : >> { %5385 = vst.msk [vmem:[%s5383_s22] sm:$0x1] %vm5384_vm14, %v5382_v48 }
 0xd56 PF: > { %s9151_s13 = sld [smem:[#allocation8_spill]] }
 0xd5c   : > { %s30_s0 = sadd.s32 1, %s9151_s13  }
 0xd5d   : > { %p27_p10 = scmp.ge.s32.totalorder %s30_s0, 6  }
 0xd5f   :  { %29 = sbr.rel (!%p27_p10) target bundleno = 10 (0xa), region = 368 }

</bundles_post_ra>
